<compile_context>
chip_gen: v7x
topology: tpu7x:2x2x1
jax: 0.10.0
libtpu: 0.0.40
codegen_flags: <defaults>
</compile_context>

<pallas_src>
import jax
import jax.numpy as jnp
from jax import lax
from jax.experimental import pallas as pl
from jax.experimental.pallas import tpu as pltpu

EPS = 1e-5


def distance_kernel(xt_ref, w1_ref, p1_ref, w2_ref, p2_ref, w3_ref, p3_ref,
                    p4_ref, out_ref):
    """Feature-major MLP forward: activations are [features, batch] (batch on lanes)."""
    bf16 = jnp.bfloat16
    inv_b = 1.0 / xt_ref.shape[1]            # static 1/B

    def relu_bn(h, p_ref):
        # p_ref: [out, 3] = (bias | gamma | beta), all f32.
        b = p_ref[:, 0:1]
        g = p_ref[:, 1:2]
        be = p_ref[:, 2:3]
        h = jnp.maximum(h + b, 0.0)                                  # bias + ReLU
        # One pass over h: sum and sum-of-squares (f32), biased variance.
        mean = jnp.sum(h, axis=1, keepdims=True) * inv_b
        ex2 = jnp.sum(h * h, axis=1, keepdims=True) * inv_b
        var = jnp.maximum(ex2 - mean * mean, 0.0)
        scale = g * lax.rsqrt(var + EPS)                             # gamma / sqrt(var+eps)
        shift = be - mean * scale
        return h * scale + shift                                     # single fused normalize

    # Layer 1: Linear(2*indim, 512) as one bf16 MXU matmul, f32 accumulate.
    h = jnp.dot(w1_ref[...], xt_ref[...], preferred_element_type=jnp.float32)  # [512, B]
    h = relu_bn(h, p1_ref)

    # Layer 2: Linear(512, 128), bf16 operands, f32 accumulate.
    h = jnp.dot(w2_ref[...], h.astype(bf16), preferred_element_type=jnp.float32)  # [128, B]
    h = relu_bn(h, p2_ref)

    # Layer 3: Linear(128, 4), bf16 operands (single underfilled MXU push).
    h = jnp.dot(w3_ref[...], h.astype(bf16), preferred_element_type=jnp.float32)  # [4, B]
    h = relu_bn(h, p3_ref)

    # Layer 4: Linear(4, 1) + Sigmoid on the VPU (broadcast mul + sublane sum).
    w4 = p4_ref[0:4, :]                                              # [4, 1]
    b4 = p4_ref[4:5, :]                                              # [1, 1]
    logits = jnp.sum(h * w4, axis=0, keepdims=True) + b4             # [1, B]
    out_ref[...] = jax.nn.sigmoid(logits)                            # lane-dense store


def init_params(key, indim):
    """PyTorch-layout parameters (W: [out, in], b/gamma/beta: [out]); indim < 2048 branch."""
    dims = [(indim * 2, 512), (512, 128), (128, 4), (4, 1)]
    params = []
    for li, (fan_in, fan_out) in enumerate(dims):
        key, kw, kb = jax.random.split(key, 3)
        bound = 1.0 / jnp.sqrt(float(fan_in))
        w = jax.random.uniform(kw, (fan_out, fan_in), jnp.float32, -bound, bound)
        b = jax.random.uniform(kb, (fan_out,), jnp.float32, -bound, bound)
        params += [w, b]
        if li < 3:   # first three Linears are followed by ReLU + BatchNorm1d
            params += [jnp.ones((fan_out,), jnp.float32),
                       jnp.zeros((fan_out,), jnp.float32)]
    return params


def distance_forward(x1, x2, params):
    (w1, b1, g1, be1, w2, b2, g2, be2, w3, b3, g3, be3, w4, b4) = params
    B, indim = x1.shape
    bf16 = jnp.bfloat16

    # Layout plumbing in XLA (outside the kernel): feature-major bf16 input,
    # bf16 weights, packed [out, 3] BN params, [5, 1] head (w4 | b4).
    xt = jnp.concatenate([x1, x2], axis=1).T.astype(bf16)            # [2*indim, B]
    pack = lambda b, g, be: jnp.stack([b, g, be], axis=1)            # [out, 3] f32

    kernel_inputs = [
        xt,
        w1.astype(bf16), pack(b1, g1, be1),
        w2.astype(bf16), pack(b2, g2, be2),
        w3.astype(bf16), pack(b3, g3, be3),
        jnp.concatenate([w4.reshape(4, 1), b4.reshape(1, 1)], axis=0).astype(jnp.float32),
    ]

    # Scoped-VMEM limit sized to the real working set (inputs + weights + the
    # [512,B]/[128,B] f32 intermediates), with slack; capped below v7x physical.
    work_bytes = sum(int(a.size) * a.dtype.itemsize for a in kernel_inputs)
    work_bytes += (512 + 128 + 4 + 1) * B * 4
    vmem_limit = int(min(max(4 * work_bytes + (8 << 20), 32 << 20), 60 << 20))

    in_specs = [pl.BlockSpec(memory_space=pltpu.MemorySpace.VMEM)
                for _ in kernel_inputs]
    out = pl.pallas_call(
        distance_kernel,
        out_shape=jax.ShapeDtypeStruct((1, B), jnp.float32),
        in_specs=in_specs,
        out_specs=pl.BlockSpec(memory_space=pltpu.MemorySpace.VMEM),
        compiler_params=pltpu.CompilerParams(vmem_limit_bytes=vmem_limit),
    )(*kernel_inputs)
    return out.reshape(B, 1)   # match the PyTorch module's [B, 1] output


def distance_reference(x1, x2, params):
    """Pure-JAX f32 reference with PyTorch Distance.forward semantics."""
    (w1, b1, g1, be1, w2, b2, g2, be2, w3, b3, g3, be3, w4, b4) = params
    x = jnp.concatenate([x1, x2], axis=1)

    def block(h, w, b, g, be):
        h = jnp.maximum(h @ w.T + b, 0.0)
        m = jnp.mean(h, axis=0, keepdims=True)
        v = jnp.mean((h - m) ** 2, axis=0, keepdims=True)
        return (h - m) * lax.rsqrt(v + EPS) * g + be

    h = block(x, w1, b1, g1, be1)
    h = block(h, w2, b2, g2, be2)
    h = block(h, w3, b3, g3, be3)
    return jax.nn.sigmoid(h @ w4.T + b4)


if __name__ == "__main__":
    indim = 32
    batch = 16

    key = jax.random.PRNGKey(0)
    kx1, kx2, kp = jax.random.split(key, 3)
    x1 = jax.random.normal(kx1, (batch, indim), jnp.float32)
    x2 = jax.random.normal(kx2, (batch, indim), jnp.float32)
    params = init_params(kp, indim)

    out = distance_forward(x1, x2, params)
    out = jax.block_until_ready(out)
    ref = distance_reference(x1, x2, params)

    assert out.shape == (batch, 1)
    assert bool(jnp.all(jnp.isfinite(out)))
    assert bool(jnp.all((out >= 0.0) & (out <= 1.0)))          # sigmoid range
    # Loose tolerance: kernel uses bf16 MXU operands for the matmuls.
    max_err = float(jnp.max(jnp.abs(out - ref)))
    assert max_err < 0.1, max_err
    print("KERNEL_OK")
</pallas_src>

<mosaic_0001>
module attributes {stable_mosaic.version = 11 : i64} {
  func.func @distance_kernel(%arg0: memref<64x16xbf16, #tpu.memory_space<vmem>>, %arg1: memref<512x64xbf16, #tpu.memory_space<vmem>>, %arg2: memref<512x3xf32, #tpu.memory_space<vmem>>, %arg3: memref<128x512xbf16, #tpu.memory_space<vmem>>, %arg4: memref<128x3xf32, #tpu.memory_space<vmem>>, %arg5: memref<4x128xbf16, #tpu.memory_space<vmem>>, %arg6: memref<4x3xf32, #tpu.memory_space<vmem>>, %arg7: memref<5x1xf32, #tpu.memory_space<vmem>>, %arg8: memref<1x16xf32, #tpu.memory_space<vmem>>) attributes {dimension_semantics = [], scalar_prefetch = 0 : i64, scratch_operands = 0 : i64, tpu.core_type = #tpu.core_type<tc>} {
    %c0 = arith.constant 0 : index
    %c0_0 = arith.constant 0 : index
    %0 = vector.load %arg1[%c0, %c0_0] : memref<512x64xbf16, #tpu.memory_space<vmem>>, vector<512x64xbf16>
    %c0_1 = arith.constant 0 : index
    %c0_2 = arith.constant 0 : index
    %1 = vector.load %arg0[%c0_1, %c0_2] : memref<64x16xbf16, #tpu.memory_space<vmem>>, vector<64x16xbf16>
    %cst = arith.constant dense<0.000000e+00> : vector<512x16xf32>
    %2 = tpu.matmul %0, %1, %cst {dimension_numbers = #tpu.dot_dimension_numbers<[1], [0], [0], [1], [0, 0, 1, 1], [], []>} : vector<512x64xbf16>, vector<64x16xbf16>, vector<512x16xf32> -> vector<512x16xf32>
    %c0_3 = arith.constant 0 : index
    %c0_4 = arith.constant 0 : index
    %3 = vector.load %arg2[%c0_3, %c0_4] : memref<512x3xf32, #tpu.memory_space<vmem>>, vector<512x1xf32>
    %c0_5 = arith.constant 0 : index
    %c1 = arith.constant 1 : index
    %4 = vector.load %arg2[%c0_5, %c1] : memref<512x3xf32, #tpu.memory_space<vmem>>, vector<512x1xf32>
    %c0_6 = arith.constant 0 : index
    %c2 = arith.constant 2 : index
    %5 = vector.load %arg2[%c0_6, %c2] : memref<512x3xf32, #tpu.memory_space<vmem>>, vector<512x1xf32>
    %6 = vector.broadcast %3 : vector<512x1xf32> to vector<512x16xf32>
    %7 = arith.addf %2, %6 : vector<512x16xf32>
    %cst_7 = arith.constant 0.000000e+00 : f32
    %8 = vector.broadcast %cst_7 : f32 to vector<512x16xf32>
    %9 = arith.maximumf %7, %8 : vector<512x16xf32>
    %cst_8 = arith.constant dense<0.000000e+00> : vector<512xf32>
    %10 = vector.multi_reduction <add>, %9, %cst_8 [1] : vector<512x16xf32> to vector<512xf32>
    %11 = vector.shape_cast %10 : vector<512xf32> to vector<512x1xf32>
    %cst_9 = arith.constant 6.250000e-02 : f32
    %12 = vector.broadcast %cst_9 : f32 to vector<512x1xf32>
    %13 = arith.mulf %11, %12 : vector<512x1xf32>
    %14 = arith.mulf %9, %9 : vector<512x16xf32>
    %cst_10 = arith.constant dense<0.000000e+00> : vector<512xf32>
    %15 = vector.multi_reduction <add>, %14, %cst_10 [1] : vector<512x16xf32> to vector<512xf32>
    %16 = vector.shape_cast %15 : vector<512xf32> to vector<512x1xf32>
    %cst_11 = arith.constant 6.250000e-02 : f32
    %17 = vector.broadcast %cst_11 : f32 to vector<512x1xf32>
    %18 = arith.mulf %16, %17 : vector<512x1xf32>
    %19 = arith.mulf %13, %13 : vector<512x1xf32>
    %20 = arith.subf %18, %19 : vector<512x1xf32>
    %cst_12 = arith.constant 0.000000e+00 : f32
    %21 = vector.broadcast %cst_12 : f32 to vector<512x1xf32>
    %22 = arith.maximumf %20, %21 : vector<512x1xf32>
    %cst_13 = arith.constant 9.99999974E-6 : f32
    %23 = vector.broadcast %cst_13 : f32 to vector<512x1xf32>
    %24 = arith.addf %22, %23 : vector<512x1xf32>
    %25 = math.rsqrt %24 : vector<512x1xf32>
    %26 = arith.mulf %4, %25 : vector<512x1xf32>
    %27 = arith.mulf %13, %26 : vector<512x1xf32>
    %28 = arith.subf %5, %27 : vector<512x1xf32>
    %29 = vector.broadcast %26 : vector<512x1xf32> to vector<512x16xf32>
    %30 = arith.mulf %9, %29 : vector<512x16xf32>
    %31 = vector.broadcast %28 : vector<512x1xf32> to vector<512x16xf32>
    %32 = arith.addf %30, %31 : vector<512x16xf32>
    %c0_14 = arith.constant 0 : index
    %c0_15 = arith.constant 0 : index
    %33 = vector.load %arg3[%c0_14, %c0_15] : memref<128x512xbf16, #tpu.memory_space<vmem>>, vector<128x512xbf16>
    %34 = arith.truncf %32 : vector<512x16xf32> to vector<512x16xbf16>
    %cst_16 = arith.constant dense<0.000000e+00> : vector<128x16xf32>
    %35 = tpu.matmul %33, %34, %cst_16 {dimension_numbers = #tpu.dot_dimension_numbers<[1], [0], [0], [1], [0, 0, 1, 1], [], []>} : vector<128x512xbf16>, vector<512x16xbf16>, vector<128x16xf32> -> vector<128x16xf32>
    %c0_17 = arith.constant 0 : index
    %c0_18 = arith.constant 0 : index
    %36 = vector.load %arg4[%c0_17, %c0_18] : memref<128x3xf32, #tpu.memory_space<vmem>>, vector<128x1xf32>
    %c0_19 = arith.constant 0 : index
    %c1_20 = arith.constant 1 : index
    %37 = vector.load %arg4[%c0_19, %c1_20] : memref<128x3xf32, #tpu.memory_space<vmem>>, vector<128x1xf32>
    %c0_21 = arith.constant 0 : index
    %c2_22 = arith.constant 2 : index
    %38 = vector.load %arg4[%c0_21, %c2_22] : memref<128x3xf32, #tpu.memory_space<vmem>>, vector<128x1xf32>
    %39 = vector.broadcast %36 : vector<128x1xf32> to vector<128x16xf32>
    %40 = arith.addf %35, %39 : vector<128x16xf32>
    %cst_23 = arith.constant 0.000000e+00 : f32
    %41 = vector.broadcast %cst_23 : f32 to vector<128x16xf32>
    %42 = arith.maximumf %40, %41 : vector<128x16xf32>
    %cst_24 = arith.constant dense<0.000000e+00> : vector<128xf32>
    %43 = vector.multi_reduction <add>, %42, %cst_24 [1] : vector<128x16xf32> to vector<128xf32>
    %44 = vector.shape_cast %43 : vector<128xf32> to vector<128x1xf32>
    %cst_25 = arith.constant 6.250000e-02 : f32
    %45 = vector.broadcast %cst_25 : f32 to vector<128x1xf32>
    %46 = arith.mulf %44, %45 : vector<128x1xf32>
    %47 = arith.mulf %42, %42 : vector<128x16xf32>
    %cst_26 = arith.constant dense<0.000000e+00> : vector<128xf32>
    %48 = vector.multi_reduction <add>, %47, %cst_26 [1] : vector<128x16xf32> to vector<128xf32>
    %49 = vector.shape_cast %48 : vector<128xf32> to vector<128x1xf32>
    %cst_27 = arith.constant 6.250000e-02 : f32
    %50 = vector.broadcast %cst_27 : f32 to vector<128x1xf32>
    %51 = arith.mulf %49, %50 : vector<128x1xf32>
    %52 = arith.mulf %46, %46 : vector<128x1xf32>
    %53 = arith.subf %51, %52 : vector<128x1xf32>
    %cst_28 = arith.constant 0.000000e+00 : f32
    %54 = vector.broadcast %cst_28 : f32 to vector<128x1xf32>
    %55 = arith.maximumf %53, %54 : vector<128x1xf32>
    %cst_29 = arith.constant 9.99999974E-6 : f32
    %56 = vector.broadcast %cst_29 : f32 to vector<128x1xf32>
    %57 = arith.addf %55, %56 : vector<128x1xf32>
    %58 = math.rsqrt %57 : vector<128x1xf32>
    %59 = arith.mulf %37, %58 : vector<128x1xf32>
    %60 = arith.mulf %46, %59 : vector<128x1xf32>
    %61 = arith.subf %38, %60 : vector<128x1xf32>
    %62 = vector.broadcast %59 : vector<128x1xf32> to vector<128x16xf32>
    %63 = arith.mulf %42, %62 : vector<128x16xf32>
    %64 = vector.broadcast %61 : vector<128x1xf32> to vector<128x16xf32>
    %65 = arith.addf %63, %64 : vector<128x16xf32>
    %c0_30 = arith.constant 0 : index
    %c0_31 = arith.constant 0 : index
    %66 = vector.load %arg5[%c0_30, %c0_31] : memref<4x128xbf16, #tpu.memory_space<vmem>>, vector<4x128xbf16>
    %67 = arith.truncf %65 : vector<128x16xf32> to vector<128x16xbf16>
    %cst_32 = arith.constant dense<0.000000e+00> : vector<4x16xf32>
    %68 = tpu.matmul %66, %67, %cst_32 {dimension_numbers = #tpu.dot_dimension_numbers<[1], [0], [0], [1], [0, 0, 1, 1], [], []>} : vector<4x128xbf16>, vector<128x16xbf16>, vector<4x16xf32> -> vector<4x16xf32>
    %c0_33 = arith.constant 0 : index
    %c0_34 = arith.constant 0 : index
    %69 = vector.load %arg6[%c0_33, %c0_34] : memref<4x3xf32, #tpu.memory_space<vmem>>, vector<4x1xf32>
    %c0_35 = arith.constant 0 : index
    %c1_36 = arith.constant 1 : index
    %70 = vector.load %arg6[%c0_35, %c1_36] : memref<4x3xf32, #tpu.memory_space<vmem>>, vector<4x1xf32>
    %c0_37 = arith.constant 0 : index
    %c2_38 = arith.constant 2 : index
    %71 = vector.load %arg6[%c0_37, %c2_38] : memref<4x3xf32, #tpu.memory_space<vmem>>, vector<4x1xf32>
    %72 = vector.broadcast %69 : vector<4x1xf32> to vector<4x16xf32>
    %73 = arith.addf %68, %72 : vector<4x16xf32>
    %cst_39 = arith.constant 0.000000e+00 : f32
    %74 = vector.broadcast %cst_39 : f32 to vector<4x16xf32>
    %75 = arith.maximumf %73, %74 : vector<4x16xf32>
    %cst_40 = arith.constant dense<0.000000e+00> : vector<4xf32>
    %76 = vector.multi_reduction <add>, %75, %cst_40 [1] : vector<4x16xf32> to vector<4xf32>
    %77 = vector.shape_cast %76 : vector<4xf32> to vector<4x1xf32>
    %cst_41 = arith.constant 6.250000e-02 : f32
    %78 = vector.broadcast %cst_41 : f32 to vector<4x1xf32>
    %79 = arith.mulf %77, %78 : vector<4x1xf32>
    %80 = arith.mulf %75, %75 : vector<4x16xf32>
    %cst_42 = arith.constant dense<0.000000e+00> : vector<4xf32>
    %81 = vector.multi_reduction <add>, %80, %cst_42 [1] : vector<4x16xf32> to vector<4xf32>
    %82 = vector.shape_cast %81 : vector<4xf32> to vector<4x1xf32>
    %cst_43 = arith.constant 6.250000e-02 : f32
    %83 = vector.broadcast %cst_43 : f32 to vector<4x1xf32>
    %84 = arith.mulf %82, %83 : vector<4x1xf32>
    %85 = arith.mulf %79, %79 : vector<4x1xf32>
    %86 = arith.subf %84, %85 : vector<4x1xf32>
    %cst_44 = arith.constant 0.000000e+00 : f32
    %87 = vector.broadcast %cst_44 : f32 to vector<4x1xf32>
    %88 = arith.maximumf %86, %87 : vector<4x1xf32>
    %cst_45 = arith.constant 9.99999974E-6 : f32
    %89 = vector.broadcast %cst_45 : f32 to vector<4x1xf32>
    %90 = arith.addf %88, %89 : vector<4x1xf32>
    %91 = math.rsqrt %90 : vector<4x1xf32>
    %92 = arith.mulf %70, %91 : vector<4x1xf32>
    %93 = arith.mulf %79, %92 : vector<4x1xf32>
    %94 = arith.subf %71, %93 : vector<4x1xf32>
    %95 = vector.broadcast %92 : vector<4x1xf32> to vector<4x16xf32>
    %96 = arith.mulf %75, %95 : vector<4x16xf32>
    %97 = vector.broadcast %94 : vector<4x1xf32> to vector<4x16xf32>
    %98 = arith.addf %96, %97 : vector<4x16xf32>
    %c0_46 = arith.constant 0 : index
    %c0_47 = arith.constant 0 : index
    %99 = vector.load %arg7[%c0_46, %c0_47] : memref<5x1xf32, #tpu.memory_space<vmem>>, vector<4x1xf32>
    %c4 = arith.constant 4 : index
    %c0_48 = arith.constant 0 : index
    %100 = vector.load %arg7[%c4, %c0_48] : memref<5x1xf32, #tpu.memory_space<vmem>>, vector<1x1xf32>
    %101 = vector.broadcast %99 : vector<4x1xf32> to vector<4x16xf32>
    %102 = arith.mulf %98, %101 : vector<4x16xf32>
    %cst_49 = arith.constant dense<0.000000e+00> : vector<16xf32>
    %103 = vector.multi_reduction <add>, %102, %cst_49 [0] : vector<4x16xf32> to vector<16xf32>
    %104 = vector.shape_cast %103 : vector<16xf32> to vector<1x16xf32>
    %105 = vector.broadcast %100 : vector<1x1xf32> to vector<1x16xf32>
    %106 = arith.addf %104, %105 : vector<1x16xf32>
    %107 = arith.negf %106 : vector<1x16xf32>
    %108 = math.exp %107 : vector<1x16xf32>
    %cst_50 = arith.constant 1.000000e+00 : f32
    %109 = vector.broadcast %cst_50 : f32 to vector<1x16xf32>
    %110 = arith.addf %109, %108 : vector<1x16xf32>
    %111 = arith.divf %109, %110 : vector<1x16xf32>
    %c0_51 = arith.constant 0 : index
    %c0_52 = arith.constant 0 : index
    %112 = vector.load %arg8[%c0_51, %c0_52] : memref<1x16xf32, #tpu.memory_space<vmem>>, vector<1x16xf32>
    tpu.vector_store %arg8[%c0_51, %c0_52], %111 {strides = array<i32>} : memref<1x16xf32, #tpu.memory_space<vmem>>, vector<1x16xf32>,
    return
  }
}

</mosaic_0001>

<bundles_post_ra>
// kernel: tpu_custom_call.1
= control target key start
LH: loop header
LB: loop body
LE: loop exit
PB: predicated region body
PF: predicated region fallthrough
CT: control target
= control target key end

     0   :  { %v8709_v2 = vmov 0   ;;  %vm671_vm0 = vcmask 523264   ;;  %s8700_s0 = inlined_call_operand.vmem [shape: bf16[64,16], index: 0, kind: input, shape index: {}]   ;;  %s8701_s1 = inlined_call_operand.vmem [shape: bf16[512,64], index: 1, kind: input, shape index: {}]   ;;  %s8702_s2 = inlined_call_operand.vmem [shape: f32[512,3], index: 2, kind: input, shape index: {}]   ;;  %s8703_s3 = inlined_call_operand.vmem [shape: bf16[128,512], index: 3, kind: input, shape index: {}]   ;;  %s8704_s4 = inlined_call_operand.vmem [shape: f32[128,3], index: 4, kind: input, shape index: {}]   ;;  %s8705_s5 = inlined_call_operand.vmem [shape: bf16[4,128], index: 5, kind: input, shape index: {}]   ;;  %s8706_s6 = inlined_call_operand.vmem [shape: f32[4,3], index: 6, kind: input, shape index: {}]   ;;  %s8707_s7 = inlined_call_operand.vmem [shape: f32[5,1], index: 7, kind: input, shape index: {}]   ;;  %s8708_s8 = inlined_call_operand.hbm [shape: f32[1,16], index: 8, kind: output, shape index: {}]  }
   0x1   :  { %v4849_v0 = vld [vmem:[%s8700_s0] sm:$0xff]   ;;  %v4850_v1 = vld [vmem:[%s8700_s0 + $0x8] sm:$0xff]   ;;  %4798 = vset.pattern.permute.xlu0 %v8709_v2  ;;  %4799 = vset.pattern.permute.xlu1 %v8709_v2  ;;  %v4851_v3 = vld [vmem:[%s8700_s0 + $0x10] sm:$0xff]  }
   0x2   :  { %4699 = vmatprep.subr.bf16.mxu0 %v4849_v0  ;;  %v103_v4 = vld [vmem:[%s8702_s2] sm:$0xff]  ;;  %v104_v6 = vld [vmem:[%s8702_s2 + $0x8] sm:$0xff]  ;;  %v4852_v7 = vld [vmem:[%s8700_s0 + $0x18] sm:$0xff]  }
   0x3   :  { %4700 = vmatpush3.bf16.msra.mxu0 %v4849_v0  ;;  %169 = vperm.xlu0 %4798, %v103_v4   ;;  %v4853_v5 = vld [vmem:[%s8701_s1] sm:$0xff]   ;;  %v105_v8 = vld [vmem:[%s8702_s2 + $0x10] sm:$0xff]  ;;  %v106_v10 = vld [vmem:[%s8702_s2 + $0x18] sm:$0xff] }
   0x4   :  { %4701 = vmatprep.subr.bf16.mxu0 %v4850_v1  ;;  %4707 = vmatprep.mubr.msk.bf16.mxu0 %vm671_vm0, %v4853_v5  ;;  %v107_v9 = vld [vmem:[%s8702_s2 + $0x20] sm:$0xff]  ;;  %v4854_v11 = vld [vmem:[%s8701_s1 + $0x8] sm:$0xff]   ;;  %v109_v12 = vld [vmem:[%s8702_s2 + $0x30] sm:$0xff] }
   0x5   :  { %179 = vperm.xlu1 %4799, %v105_v8   ;;  %v4855_v13 = vld [vmem:[%s8701_s1 + $0x10] sm:$0xff]   ;;  %v108_v14 = vld [vmem:[%s8702_s2 + $0x28] sm:$0xff]  ;;  %v111_v15 = vld [vmem:[%s8702_s2 + $0x40] sm:$0xff] }
   0x6   :  { %v110_v16 = vld [vmem:[%s8702_s2 + $0x38] sm:$0xff]  ;;  %v4857_v18 = vld [vmem:[%s8701_s1 + $0x20] sm:$0xff]   ;;  %v113_v19 = vld [vmem:[%s8702_s2 + $0x50] sm:$0xff] }
   0x7   :  { %4702 = vmatpush3.bf16.msra.mxu0 %v4850_v1  ;;  %174 = vperm.xlu0 %4798, %v104_v6   ;;  %v4856_v17 = vld [vmem:[%s8701_s1 + $0x18] sm:$0xff]   ;;  %v112_v20 = vld [vmem:[%s8702_s2 + $0x48] sm:$0xff]  ;;  %v115_v21 = vld [vmem:[%s8702_s2 + $0x60] sm:$0xff] }
   0x8   :  { %4703 = vmatprep.subr.bf16.mxu0 %v4851_v3  ;;  %v114_v22 = vld [vmem:[%s8702_s2 + $0x58] sm:$0xff]  ;;  %v4858_v23 = vld [vmem:[%s8701_s1 + $0x28] sm:$0xff]   ;;  %v4859_v24 = vld [vmem:[%s8701_s1 + $0x30] sm:$0xff]  }
   0x9   :  { %184 = vperm.xlu1 %4799, %v106_v10   ;;  %v117_v25 = vld [vmem:[%s8702_s2 + $0x70] sm:$0xff]  ;;  %v116_v26 = vld [vmem:[%s8702_s2 + $0x68] sm:$0xff]  ;;  %v119_v27 = vld [vmem:[%s8702_s2 + $0x80] sm:$0xff] }
   0xa   :  { %v118_v28 = vld [vmem:[%s8702_s2 + $0x78] sm:$0xff]  ;;  %v121_v30 = vld [vmem:[%s8702_s2 + $0x90] sm:$0xff]  ;;  %v4861_v31 = vld [vmem:[%s8701_s1 + $0x40] sm:$0xff]  }
   0xb   :  { %4704 = vmatpush3.bf16.msra.mxu0 %v4851_v3  ;;  %189 = vperm.xlu0 %4798, %v107_v9   ;;  %v4860_v29 = vld [vmem:[%s8701_s1 + $0x38] sm:$0xff]   ;;  %v120_v32 = vld [vmem:[%s8702_s2 + $0x88] sm:$0xff]  ;;  %v123_v33 = vld [vmem:[%s8702_s2 + $0xa0] sm:$0xff] }
   0xc   :  { %4705 = vmatprep.subr.bf16.mxu0 %v4852_v7  ;;  %v122_v34 = vld [vmem:[%s8702_s2 + $0x98] sm:$0xff]  ;;  %v4862_v35 = vld [vmem:[%s8701_s1 + $0x48] sm:$0xff]   ;;  %v125_v36 = vld [vmem:[%s8702_s2 + $0xb0] sm:$0xff] }
   0xd   :  { %194 = vperm.xlu1 %4799, %v108_v14   ;;  %v4863_v37 = vld [vmem:[%s8701_s1 + $0x50] sm:$0xff]   ;;  %v124_v38 = vld [vmem:[%s8702_s2 + $0xa8] sm:$0xff]  ;;  %v127_v39 = vld [vmem:[%s8702_s2 + $0xc0] sm:$0xff] }
   0xe   :  { %v126_v40 = vld [vmem:[%s8702_s2 + $0xb8] sm:$0xff]  ;;  %v129_v42 = vld [vmem:[%s8702_s2 + $0xd0] sm:$0xff]  ;;  %v4865_v43 = vld [vmem:[%s8701_s1 + $0x60] sm:$0xff]  }
   0xf   :  { %4706 = vmatpush3.bf16.msra.mxu0 %v4852_v7  ;;  %199 = vperm.xlu0 %4798, %v109_v12   ;;  %v4864_v41 = vld [vmem:[%s8701_s1 + $0x58] sm:$0xff]   ;;  %v128_v44 = vld [vmem:[%s8702_s2 + $0xc8] sm:$0xff]  ;;  %v131_v45 = vld [vmem:[%s8702_s2 + $0xe0] sm:$0xff] }
  0x11   :  { %204 = vperm.xlu1 %4799, %v110_v16  }
  0x12   :  { %4708 = vmatmul.mubr.msk.bf16.vlgmr.msra.gmra.mrb[0].mxu0 %vm671_vm0, %v4854_v11 }
  0x13   :  { %4711 = vmatprep.mubr.msk.bf16.mxu0 %vm671_vm0, %v4855_v13  ;;  %209 = vperm.xlu0 %4798, %v111_v15  }
  0x15   :  { %214 = vperm.xlu1 %4799, %v112_v20  }
  0x17   :  { %219 = vperm.xlu0 %4798, %v113_v19  }
  0x19   :  { %224 = vperm.xlu1 %4799, %v114_v22  }
  0x1a   :  { %4712 = vmatmul.mubr.msk.bf16.gmra.mrb[4].mxu0 %vm671_vm0, %v4856_v17 }
  0x1b   :  { %4715 = vmatprep.mubr.msk.bf16.mxu0 %vm671_vm0, %v4857_v18  ;;  %229 = vperm.xlu0 %4798, %v115_v21  }
  0x1d   :  { %234 = vperm.xlu1 %4799, %v116_v26  }
  0x1f   :  { %239 = vperm.xlu0 %4798, %v117_v25  }
  0x21   :  { %244 = vperm.xlu1 %4799, %v118_v28  }
  0x22   :  { %4716 = vmatmul.mubr.msk.bf16.gmra.mrb[8].mxu0 %vm671_vm0, %v4858_v23 }
  0x23   :  { %4719 = vmatprep.mubr.msk.bf16.mxu0 %vm671_vm0, %v4859_v24  ;;  %249 = vperm.xlu0 %4798, %v119_v27  }
  0x25   :  { %254 = vperm.xlu1 %4799, %v120_v32  }
  0x27   :  { %259 = vperm.xlu0 %4798, %v121_v30  }
  0x29   :  { %264 = vperm.xlu1 %4799, %v122_v34  }
  0x2a   :  { %4720 = vmatmul.mubr.msk.bf16.gmra.mrb[12].mxu0 %vm671_vm0, %v4860_v29 }
  0x2b   :  { %4723 = vmatprep.mubr.msk.bf16.mxu0 %vm671_vm0, %v4861_v31  ;;  %269 = vperm.xlu0 %4798, %v123_v33  }
  0x2d   :  { %274 = vperm.xlu1 %4799, %v124_v38  }
  0x2f   :  { %279 = vperm.xlu0 %4798, %v125_v36  }
  0x31   :  { %284 = vperm.xlu1 %4799, %v126_v40  }
  0x32   :  { %4724 = vmatmul.mubr.msk.bf16.gmra.mrb[16].mxu0 %vm671_vm0, %v4862_v35 }
  0x33   :  { %4727 = vmatprep.mubr.msk.bf16.mxu0 %vm671_vm0, %v4863_v37  ;;  %289 = vperm.xlu0 %4798, %v127_v39  }
  0x35   :  { %294 = vperm.xlu1 %4799, %v128_v44  }
  0x37   :  { %299 = vperm.xlu0 %4798, %v129_v42  }
  0x3a   :  { %4728 = vmatmul.mubr.msk.bf16.gmra.mrb[20].mxu0 %vm671_vm0, %v4864_v41 }
  0x3b   :  { %13 = vsyncpa [#allocation3], 0  ;;  %4731 = vmatprep.mubr.msk.bf16.mxu0 %vm671_vm0, %v4865_v43  ;;  %v130_v46 = vld [vmem:[%s8702_s2 + $0xd8] sm:$0xff]  ;;  %309 = vperm.xlu0 %4798, %v131_v45   ;;  %v4866_v47 = vld [vmem:[%s8701_s1 + $0x68] sm:$0xff]   ;;  %vm1121_vm1 = vcmask 130048   ;;  %s5211_s24 = smov 1  }
  0x3c   :  { %v133_v48 = vld [vmem:[%s8702_s2 + $0xf0] sm:$0xff]  ;;  %304 = vperm.xlu1 %4799, %v130_v46   ;;  %v132_v50 = vld [vmem:[%s8702_s2 + $0xe8] sm:$0xff]  ;;  %v135_v51 = vld [vmem:[%s8702_s2 + $0x100] sm:$0xff]  ;;  %vm5214_vm2 = vmmov 0   ;;  %vm4348_vm3 = vcmask 125952   ;;  %vm4409_vm4 = vcmask 122880  }
  0x3d   :  { %v4867_v49 = vld [vmem:[%s8701_s1 + $0x70] sm:$0xff]   ;;  %v134_v52 = vld [vmem:[%s8702_s2 + $0xf8] sm:$0xff]  ;;  %v4869_v55 = vld [vmem:[%s8701_s1 + $0x80] sm:$0xff]  }
  0x3e   :  { %v4868_v53 = vld [vmem:[%s8701_s1 + $0x78] sm:$0xff]   ;;  %v137_v54 = vld [vmem:[%s8702_s2 + $0x110] sm:$0xff]  ;;  %v136_v56 = vld [vmem:[%s8702_s2 + $0x108] sm:$0xff] }
  0x3f   :  { %319 = vperm.xlu0 %4798, %v133_v48   ;;  %v139_v57 = vld [vmem:[%s8702_s2 + $0x120] sm:$0xff]  ;;  %v138_v58 = vld [vmem:[%s8702_s2 + $0x118] sm:$0xff]  ;;  %v4870_v59 = vld [vmem:[%s8701_s1 + $0x88] sm:$0xff]  }
  0x40   :  { %314 = vperm.xlu1 %4799, %v132_v50   ;;  %v141_v60 = vld [vmem:[%s8702_s2 + $0x130] sm:$0xff]  ;;  %v140_v62 = vld [vmem:[%s8702_s2 + $0x128] sm:$0xff]  ;;  %v143_v63 = vld [vmem:[%s8702_s2 + $0x140] sm:$0xff] }
  0x41   :  { %v4871_v61 = vld [vmem:[%s8701_s1 + $0x90] sm:$0xff]   ;;  %v4872_v0 = vld [vmem:[%s8701_s1 + $0x98] sm:$0xff]   ;;  %v4873_v3 = vld [vmem:[%s8701_s1 + $0xa0] sm:$0xff]  }
  0x42   :  { %4732 = vmatmul.mubr.msk.bf16.gmra.mrb[24].mxu0 %vm671_vm0, %v4866_v47  ;;  %v145_v1 = vld [vmem:[%s8702_s2 + $0x150] sm:$0xff]  ;;  %v147_v4 = vld [vmem:[%s8702_s2 + $0x160] sm:$0xff]  ;;  %v4874_v5 = vld [vmem:[%s8701_s1 + $0xa8] sm:$0xff]  }
  0x43   :  { %4735 = vmatprep.mubr.msk.bf16.mxu0 %vm671_vm0, %v4867_v49  ;;  %329 = vperm.xlu0 %4798, %v135_v51   ;;  %v4875_v6 = vld [vmem:[%s8701_s1 + $0xb0] sm:$0xff]   ;;  %v4876_v7 = vld [vmem:[%s8701_s1 + $0xb8] sm:$0xff]   ;;  %v4877_v8 = vld [vmem:[%s8701_s1 + $0xc0] sm:$0xff]  }
  0x44   :  { %324 = vperm.xlu1 %4799, %v134_v52   ;;  %v4878_v9 = vld [vmem:[%s8701_s1 + $0xc8] sm:$0xff]   ;;  %v4879_v10 = vld [vmem:[%s8701_s1 + $0xd0] sm:$0xff]   ;;  %v4880_v11 = vld [vmem:[%s8701_s1 + $0xd8] sm:$0xff]  }
  0x45   :  { %v4881_v12 = vld [vmem:[%s8701_s1 + $0xe0] sm:$0xff]   ;;  %v4882_v13 = vld [vmem:[%s8701_s1 + $0xe8] sm:$0xff]   ;;  %v4883_v14 = vld [vmem:[%s8701_s1 + $0xf0] sm:$0xff]  }
  0x46   :  { %v4884_v15 = vld [vmem:[%s8701_s1 + $0xf8] sm:$0xff]  }
  0x47   :  { %339 = vperm.xlu0 %4798, %v137_v54  }
  0x48   :  { %334 = vperm.xlu1 %4799, %v136_v56  }
  0x4a   :  { %4736 = vmatmul.mubr.msk.bf16.gmra.mrb[28].mxu0 %vm671_vm0, %v4868_v53 }
  0x4b   :  { %4739 = vmatprep.mubr.msk.bf16.mxu0 %vm671_vm0, %v4869_v55  ;;  %349 = vperm.xlu0 %4798, %v139_v57  }
  0x4c   :  { %344 = vperm.xlu1 %4799, %v138_v58  }
  0x4f   :  { %359 = vperm.xlu0 %4798, %v141_v60  }
  0x50   :  { %354 = vperm.xlu1 %4799, %v140_v62  }
  0x52   :  { %4740 = vmatmul.mubr.msk.bf16.gmra.mrb[32].mxu0 %vm671_vm0, %v4870_v59 }
  0x53   :  { %4743 = vmatprep.mubr.msk.bf16.mxu0 %vm671_vm0, %v4871_v61  ;;  %369 = vperm.xlu0 %4798, %v143_v63  }
  0x57   :  { %379 = vperm.xlu0 %4798, %v145_v1  }
  0x5a   :  { %4744 = vmatmul.mubr.msk.bf16.gmra.mrb[36].mxu0 %vm671_vm0, %v4872_v0 }
  0x5b   :  { %4747 = vmatprep.mubr.msk.bf16.mxu0 %vm671_vm0, %v4873_v3  ;;  %389 = vperm.xlu0 %4798, %v147_v4  }
  0x62   :  { %4748 = vmatmul.mubr.msk.bf16.gmra.mrb[40].mxu0 %vm671_vm0, %v4874_v5 }
  0x63   :  { %4751 = vmatprep.mubr.msk.bf16.mxu0 %vm671_vm0, %v4875_v6 }
  0x6a   :  { %4752 = vmatmul.mubr.msk.bf16.gmra.mrb[44].mxu0 %vm671_vm0, %v4876_v7 }
  0x6b   :  { %4755 = vmatprep.mubr.msk.bf16.mxu0 %vm671_vm0, %v4877_v8 }
  0x72   :  { %4756 = vmatmul.mubr.msk.bf16.gmra.mrb[48].mxu0 %vm671_vm0, %v4878_v9 }
  0x73   :  { %4759 = vmatprep.mubr.msk.bf16.mxu0 %vm671_vm0, %v4879_v10 }
  0x7a   :  { %4760 = vmatmul.mubr.msk.bf16.gmra.mrb[52].mxu0 %vm671_vm0, %v4880_v11 }
  0x7b   :  { %4763 = vmatprep.mubr.msk.bf16.mxu0 %vm671_vm0, %v4881_v12 }
  0x82   :  { %4764 = vmatmul.mubr.msk.bf16.gmra.mrb[56].mxu0 %vm671_vm0, %v4882_v13  ;;  %v170_v16 = vpop.permute.xlu0 %169 }
  0x83   :  { %4767 = vmatprep.mubr.msk.bf16.mxu0 %vm671_vm0, %v4883_v14 }
  0x84   :  { %v180_v18 = vpop.permute.xlu1 %179 }
  0x86   :  { %v175_v17 = vpop.permute.xlu0 %174 }
  0x88   :  { %v185_v20 = vpop.permute.xlu1 %184 }
  0x8a   :  { %4768 = vmatmul.mubr.msk.bf16.gmra.mrb[60].mxu0 %vm671_vm0, %v4884_v15  ;;  %v190_v19 = vpop.permute.xlu0 %189 }
  0x8c   :  { %v195_v27 = vpop.permute.xlu1 %194 }
  0x8e   :  { %v200_v21 = vpop.permute.xlu0 %199 }
  0x90   :  { %v205_v39 = vpop.permute.xlu1 %204 }
  0x92   :  { %v210_v34 = vpop.permute.xlu0 %209 }
  0x94   :  { %v215_v54 = vpop.permute.xlu1 %214 }
  0x96   :  { %v220_v48 = vpop.permute.xlu0 %219 }
  0x98   :  { %v5566_v1 = vpop.permute.xlu1 %224 }
  0x9a   :  { %v5559_v59 = vpop.permute.xlu0 %229 }
  0x9e   :  { %v5575_v8 = vpop.permute.xlu0 %239 }
  0xe5   :  { %v4709_v22 = vpop.f32.mrb[0].mxu0 }
  0xe6   :  { %v811_v23 = vadd.f32 %v4709_v22, %v180_v18  ;;  %v802_v24 = vpop.f32.mrb[1].mxu0  ;;  %v250_v22 = vpop.permute.xlu0 %249 }
  0xe7   :  { %v803_v25 = vadd.f32 %v802_v24, %v170_v16  ;;  %v4710_v26 = vpop.f32.mrb[2].mxu0 }
  0xe8   :  { %v5529_v28 = vmax.f32 %v811_v23, 0.0  ;;  %v814_v29 = vadd.f32 %v4710_v26, %v185_v20  ;;  %v805_v30 = vpop.f32.mrb[3].mxu0 }
  0xe9   :  { %v5531_v31 = vmax.f32 %v803_v25, 0.0  ;;  %v806_v36 = vadd.f32 %v805_v30, %v175_v17  ;;  %v5590_v17 = vpop.permute.xlu1 %234 }
  0xea   :  { %8863 = vst [vmem:[#allocation5_spill] sm:$0xff] %v5529_v28  ;;  %v1128_v32 = vsel %vm1121_vm1, %v5529_v28, 0.0  ;;  %v1380_v33 = vmul.f32 %v5529_v28, %v5529_v28  ;;  %v5537_v35 = vmax.f32 %v814_v29, 0.0 }
  0xeb   :  { %8864 = vst [vmem:[#allocation6_spill] sm:$0xff] %v5531_v31  ;;  %1129 = vadd.xlane.f32.xlu1 %v1128_v32  ;;  %v1122_v37 = vsel %vm1121_vm1, %v5531_v31, 0.0  ;;  %v1378_v43 = vmul.f32 %v5531_v31, %v5531_v31  ;;  %v5544_v44 = vmax.f32 %v806_v36, 0.0  ;;  %v164_v31 = vld [vmem:[%s8702_s2 + $0x1e8] sm:$0xff] }
  0xec   :  { %8865 = vst [vmem:[#allocation7_spill] sm:$0xff] %v5537_v35  ;;  %1123 = vadd.xlane.f32.xlu0 %v1122_v37  ;;  %v1448_v42 = vsel %vm1121_vm1, %v1380_v33, 0.0  ;;  %v1131_v46 = vsel %vm1121_vm1, %v5537_v35, 0.0  ;;  %v1381_v53 = vmul.f32 %v5537_v35, %v5537_v35 }
  0xed   :  { %v4713_v38 = vpop.f32.mrb[4].mxu0  ;;  %8866 = vst [vmem:[#allocation8_spill] sm:$0xff] %v5544_v44  ;;  %v1442_v51 = vsel %vm1121_vm1, %v1378_v43, 0.0  ;;  %v1125_v52 = vsel %vm1121_vm1, %v5544_v44, 0.0  ;;  %v1379_v63 = vmul.f32 %v5544_v44, %v5544_v44  ;;  %v5601_v26 = vpop.permute.xlu1 %244 }
  0xee   :  { %v827_v40 = vadd.f32 %v4713_v38, %v200_v21  ;;  %v818_v41 = vpop.f32.mrb[5].mxu0  ;;  %v1451_v62 = vsel %vm1121_vm1, %v1381_v53, 0.0  ;;  %v260_v38 = vpop.permute.xlu0 %259 }
  0xef   :  { %1449 = vadd.xlane.f32.xlu1 %v1448_v42  ;;  %v4714_v45 = vpop.f32.mrb[6].mxu0  ;;  %v819_v50 = vadd.f32 %v818_v41, %v190_v19  ;;  %v1445_v7 = vsel %vm1121_vm1, %v1379_v63, 0.0 }
  0xf0   :  { %v821_v47 = vpop.f32.mrb[7].mxu0  ;;  %1132 = vadd.xlane.f32.xlu0 %v1131_v46  ;;  %v5548_v49 = vmax.f32 %v827_v40, 0.0  ;;  %v830_v60 = vadd.f32 %v4714_v45, %v205_v39 }
  0xf1   :  { %v5555_v56 = vmax.f32 %v819_v50, 0.0  ;;  %v822_v6 = vadd.f32 %v821_v47, %v195_v27  ;;  %v255_v45 = vpop.permute.xlu1 %254 }
  0xf2   :  { %8867 = vst [vmem:[#allocation9_spill] sm:$0xff] %v5548_v49  ;;  %v1140_v58 = vsel %vm1121_vm1, %v5548_v49, 0.0  ;;  %v1384_v4 = vmul.f32 %v5548_v49, %v5548_v49  ;;  %v5572_v5 = vmax.f32 %v830_v60, 0.0  ;;  %v270_v63 = vpop.permute.xlu0 %269 }
  0xf3   :  { %1443 = vadd.xlane.f32.xlu1 %v1442_v51  ;;  %8868 = vst [vmem:[#allocation10_spill] sm:$0xff] %v5555_v56  ;;  %v1134_v3 = vsel %vm1121_vm1, %v5555_v56, 0.0  ;;  %v1382_v13 = vmul.f32 %v5555_v56, %v5555_v56  ;;  %v5584_v14 = vmax.f32 %v822_v6, 0.0  ;;  %v158_v56 = vld [vmem:[%s8702_s2 + $0x1b8] sm:$0xff] }
  0xf4   :  { %1126 = vadd.xlane.f32.xlu0 %v1125_v52  ;;  %8869 = vst [vmem:[#allocation11_spill] sm:$0xff] %v5572_v5  ;;  %v1460_v12 = vsel %vm1121_vm1, %v1384_v4, 0.0  ;;  %v1143_v16 = vsel %vm1121_vm1, %v5572_v5, 0.0  ;;  %v1385_v24 = vmul.f32 %v5572_v5, %v5572_v5  ;;  %v155_v5 = vld [vmem:[%s8702_s2 + $0x1a0] sm:$0xff] }
  0xf5   :  { %v4717_v55 = vpop.f32.mrb[8].mxu0  ;;  %8870 = vst [vmem:[#allocation12_spill] sm:$0xff] %v5584_v14  ;;  %v1454_v21 = vsel %vm1121_vm1, %v1382_v13, 0.0  ;;  %v1137_v23 = vsel %vm1121_vm1, %v5584_v14, 0.0  ;;  %v1383_v36 = vmul.f32 %v5584_v14, %v5584_v14 }
  0xf6   :  { %v834_v57 = vpop.f32.mrb[9].mxu0  ;;  %v843_v10 = vadd.f32 %v4717_v55, %v220_v48 }
  0xf7   :  { %v5561_v61 = vpop.f32.mrb[10].mxu0  ;;  %1141 = vadd.xlane.f32.xlu1 %v1140_v58  ;;  %v835_v20 = vadd.f32 %v834_v57, %v210_v34  ;;  %v1463_v34 = vsel %vm1121_vm1, %v1385_v24, 0.0  ;;  %v1457_v43 = vsel %vm1121_vm1, %v1383_v36, 0.0  ;;  %v265_v57 = vpop.permute.xlu1 %264 }
  0xf8   :  { %v837_v0 = vpop.f32.mrb[11].mxu0  ;;  %1452 = vadd.xlane.f32.xlu0 %v1451_v62  ;;  %v5594_v19 = vmax.f32 %v843_v10, 0.0 }
  0xf9   :  { %v5603_v27 = vmax.f32 %v835_v20, 0.0  ;;  %v838_v32 = vadd.f32 %v837_v0, %v215_v54 }
  0xfa   :  { %8871 = vst [vmem:[#allocation13_spill] sm:$0xff] %v5594_v19  ;;  %v1152_v30 = vsel %vm1121_vm1, %v5594_v19, 0.0 }
  0xfb   :  { %1135 = vadd.xlane.f32.xlu1 %v1134_v3  ;;  %8872 = vst [vmem:[#allocation14_spill] sm:$0xff] %v5603_v27  ;;  %v1146_v40 = vsel %vm1121_vm1, %v5603_v27, 0.0  ;;  %v1386_v41 = vmul.f32 %v5603_v27, %v5603_v27  ;;  %v5614_v42 = vmax.f32 %v838_v32, 0.0  ;;  %v152_v27 = vld [vmem:[%s8702_s2 + $0x188] sm:$0xff] }
  0xfc   :  { %1446 = vadd.xlane.f32.xlu0 %v1445_v7 }
  0xfd   :  { %v5577_v9 = vpop.f32.mrb[12].mxu0  ;;  %8873 = vst [vmem:[#allocation15_spill] sm:$0xff] %v5614_v42  ;;  %v1466_v50 = vsel %vm1121_vm1, %v1386_v41, 0.0  ;;  %v1149_v53 = vsel %vm1121_vm1, %v5614_v42, 0.0  ;;  %v1387_v54 = vmul.f32 %v5614_v42, %v5614_v42 }
  0xfe   :  { %v5579_v11 = vpop.f32.mrb[13].mxu0 }
  0xff   :  { %v5586_v15 = vpop.f32.mrb[14].mxu0  ;;  %1461 = vadd.xlane.f32.xlu1 %v1460_v12  ;;  %v1469_v4 = vsel %vm1121_vm1, %v1387_v54, 0.0 }
 0x100   :  { %v5592_v18 = vpop.f32.mrb[15].mxu0  ;;  %1144 = vadd.xlane.f32.xlu0 %v1143_v16 }
 0x103   :  { %1455 = vadd.xlane.f32.xlu1 %v1454_v21  ;;  %v275_v21 = vpop.permute.xlu1 %274 }
 0x104   :  { %1138 = vadd.xlane.f32.xlu0 %v1137_v23  ;;  %v280_v23 = vpop.permute.xlu0 %279 }
 0x105   :  { %v4725_v25 = vpop.f32.mrb[16].mxu0 }
 0x106   :  { %v866_v29 = vpop.f32.mrb[17].mxu0  ;;  %v875_v39 = vadd.f32 %v4725_v25, %v260_v38 }
 0x107   :  { %v4726_v33 = vpop.f32.mrb[18].mxu0  ;;  %1153 = vadd.xlane.f32.xlu1 %v1152_v30  ;;  %v867_v51 = vadd.f32 %v866_v29, %v250_v22 }
 0x108   :  { %v869_v37 = vpop.f32.mrb[19].mxu0  ;;  %1464 = vadd.xlane.f32.xlu0 %v1463_v34  ;;  %v5617_v47 = vmax.f32 %v875_v39, 0.0  ;;  %v878_v3 = vadd.f32 %v4726_v33, %v265_v57  ;;  %v285_v34 = vpop.permute.xlu1 %284 }
 0x109   :  { %v870_v58 = vadd.f32 %v869_v37, %v255_v45  ;;  %v5628_v0 = vmax.f32 %v867_v51, 0.0  ;;  %v290_v51 = vpop.permute.xlu0 %289 }
 0x10a   :  { %8874 = vst [vmem:[#allocation16_spill] sm:$0xff] %v5617_v47  ;;  %v1176_v60 = vsel %vm1121_vm1, %v5617_v47, 0.0  ;;  %v1396_v62 = vmul.f32 %v5617_v47, %v5617_v47  ;;  %v5634_v13 = vmax.f32 %v878_v3, 0.0 }
 0x10b   :  { %1147 = vadd.xlane.f32.xlu1 %v1146_v40  ;;  %8875 = vst [vmem:[#allocation17_spill] sm:$0xff] %v5628_v0  ;;  %v5631_v7 = vmax.f32 %v870_v58, 0.0  ;;  %v1170_v20 = vsel %vm1121_vm1, %v5628_v0, 0.0  ;;  %v1394_v29 = vmul.f32 %v5628_v0, %v5628_v0 }
 0x10c   :  { %1458 = vadd.xlane.f32.xlu0 %v1457_v43  ;;  %v1496_v12 = vsel %vm1121_vm1, %v1396_v62, 0.0  ;;  %8877 = vst [vmem:[#allocation19_spill] sm:$0xff] %v5634_v13  ;;  %v1179_v30 = vsel %vm1121_vm1, %v5634_v13, 0.0  ;;  %v1397_v32 = vmul.f32 %v5634_v13, %v5634_v13  ;;  %v162_v13 = vld [vmem:[%s8702_s2 + $0x1d8] sm:$0xff] }
 0x10d   :  { %v4729_v46 = vpop.f32.mrb[20].mxu0  ;;  %8876 = vst [vmem:[#allocation18_spill] sm:$0xff] %v5631_v7  ;;  %v1173_v25 = vsel %vm1121_vm1, %v5631_v7, 0.0  ;;  %v1490_v39 = vsel %vm1121_vm1, %v1394_v29, 0.0  ;;  %v1395_v45 = vmul.f32 %v5631_v7, %v5631_v7 }
 0x10e   :  { %v882_v48 = vpop.f32.mrb[21].mxu0  ;;  %v891_v24 = vadd.f32 %v4729_v46, %v280_v23  ;;  %v1499_v43 = vsel %vm1121_vm1, %v1397_v32, 0.0 }
 0x10f   :  { %v4730_v52 = vpop.f32.mrb[22].mxu0  ;;  %1467 = vadd.xlane.f32.xlu1 %v1466_v50  ;;  %v883_v37 = vadd.f32 %v882_v48, %v270_v63  ;;  %v1493_v54 = vsel %vm1121_vm1, %v1395_v45, 0.0 }
 0x110   :  { %v885_v55 = vpop.f32.mrb[23].mxu0  ;;  %1150 = vadd.xlane.f32.xlu0 %v1149_v53  ;;  %v5650_v36 = vmax.f32 %v891_v24, 0.0  ;;  %v894_v40 = vadd.f32 %v4730_v52, %v285_v34 }
 0x111   :  { %v5662_v50 = vmax.f32 %v883_v37, 0.0  ;;  %v886_v52 = vadd.f32 %v885_v55, %v275_v21 }
 0x112   :  { %8878 = vst [vmem:[#allocation20_spill] sm:$0xff] %v5650_v36  ;;  %v1188_v48 = vsel %vm1121_vm1, %v5650_v36, 0.0  ;;  %v5666_v53 = vmax.f32 %v894_v40, 0.0  ;;  %v1400_v62 = vmul.f32 %v5650_v36, %v5650_v36 }
 0x113   :  { %1177 = vadd.xlane.f32.xlu1 %v1176_v60  ;;  %8879 = vst [vmem:[#allocation21_spill] sm:$0xff] %v5662_v50  ;;  %v1182_v60 = vsel %vm1121_vm1, %v5662_v50, 0.0  ;;  %v5677_v63 = vmax.f32 %v886_v52, 0.0  ;;  %v1398_v24 = vmul.f32 %v5662_v50, %v5662_v50 }
 0x114   :  { %1470 = vadd.xlane.f32.xlu0 %v1469_v4  ;;  %8880 = vst [vmem:[#allocation22_spill] sm:$0xff] %v5666_v53  ;;  %v1191_v55 = vsel %vm1121_vm1, %v5666_v53, 0.0  ;;  %v295_v4 = vpop.permute.xlu1 %294  ;;  %v1508_v23 = vsel %vm1121_vm1, %v1400_v62, 0.0  ;;  %v1401_v29 = vmul.f32 %v5666_v53, %v5666_v53 }
 0x115   :  { %v4733_v6 = vpop.f32.mrb[24].mxu0  ;;  %8881 = vst [vmem:[#allocation23_spill] sm:$0xff] %v5677_v63 }
 0x116   :  { %v898_v10 = vpop.f32.mrb[25].mxu0  ;;  %v1511_v45 = vsel %vm1121_vm1, %v1401_v29, 0.0 }
 0x117   :  { %v4734_v16 = vpop.f32.mrb[26].mxu0  ;;  %1497 = vadd.xlane.f32.xlu1 %v1496_v12  ;;  %v899_v37 = vadd.f32 %v898_v10, %v290_v51 }
 0x118   :  { %v5638_v22 = vpop.f32.mrb[27].mxu0  ;;  %1171 = vadd.xlane.f32.xlu0 %v1170_v20  ;;  %v300_v20 = vpop.permute.xlu0 %299 }
 0x119   :  { %v907_v21 = vadd.f32 %v4733_v6, %v300_v20  ;;  %v305_v32 = vpop.permute.xlu1 %304 }
 0x11a   :  { %v910_v40 = vadd.f32 %v4734_v16, %v305_v32  ;;  %v902_v16 = vadd.f32 %v5638_v22, %v295_v4 }
 0x11b   :  { %1174 = vadd.xlane.f32.xlu1 %v1173_v25  ;;  %v1185_v25 = vsel %vm1121_vm1, %v5677_v63, 0.0  ;;  %v5694_v34 = vmax.f32 %v907_v21, 0.0 }
 0x11c   :  { %1180 = vadd.xlane.f32.xlu0 %v1179_v30  ;;  %v5710_v51 = vmax.f32 %v910_v40, 0.0 }
 0x11d   :  { %v5648_v33 = vpop.f32.mrb[28].mxu0  ;;  %8882 = vst [vmem:[#allocation24_spill] sm:$0xff] %v5694_v34  ;;  %v1200_v10 = vsel %vm1121_vm1, %v5694_v34, 0.0  ;;  %v5785_v2 = vpop.permute.xlu1 %314 }
 0x11e   :  { %v5652_v38 = vpop.f32.mrb[29].mxu0  ;;  %8884 = vst [vmem:[#allocation26_spill] sm:$0xff] %v5710_v51  ;;  %v1203_v22 = vsel %vm1121_vm1, %v5710_v51, 0.0 }
 0x11f   :  { %v5655_v41 = vpop.f32.mrb[30].mxu0  ;;  %1491 = vadd.xlane.f32.xlu1 %v1490_v39  ;;  %v1502_v39 = vsel %vm1121_vm1, %v1398_v24, 0.0  ;;  %v5724_v24 = vmax.f32 %v902_v16, 0.0 }
 0x120   :  { %v5660_v46 = vpop.f32.mrb[31].mxu0  ;;  %1500 = vadd.xlane.f32.xlu0 %v1499_v43 }
 0x121   :  { %8885 = vst [vmem:[#allocation27_spill] sm:$0xff] %v5724_v24  ;;  %v1403_v40 = vmul.f32 %v5724_v24, %v5724_v24 }
 0x123   :  { %1189 = vadd.xlane.f32.xlu1 %v1188_v48  ;;  %v1399_v48 = vmul.f32 %v5677_v63, %v5677_v63 }
 0x124   :  { %1494 = vadd.xlane.f32.xlu0 %v1493_v54  ;;  %v5706_v54 = vmax.f32 %v899_v37, 0.0  ;;  %v1197_v37 = vsel %vm1121_vm1, %v5724_v24, 0.0  ;;  %v5800_v24 = vpop.permute.xlu1 %324 }
 0x125   :  { %v5669_v57 = vpop.f32.mrb[32].mxu0 }
 0x126   :  { %v5671_v58 = vpop.f32.mrb[33].mxu0  ;;  %8883 = vst [vmem:[#allocation25_spill] sm:$0xff] %v5706_v54  ;;  %v1194_v20 = vsel %vm1121_vm1, %v5706_v54, 0.0  ;;  %v1402_v21 = vmul.f32 %v5706_v54, %v5706_v54  ;;  %v154_v54 = vld [vmem:[%s8702_s2 + $0x198] sm:$0xff] }
 0x127   :  { %v5679_v3 = vpop.f32.mrb[34].mxu0  ;;  %1183 = vadd.xlane.f32.xlu1 %v1182_v60  ;;  %v1505_v60 = vsel %vm1121_vm1, %v1399_v48, 0.0  ;;  %v5746_v48 = vpop.permute.xlu0 %309 }
 0x128   :  { %v5683_v12 = vpop.f32.mrb[35].mxu0  ;;  %1192 = vadd.xlane.f32.xlu0 %v1191_v55  ;;  %v1514_v29 = vsel %vm1121_vm1, %v1402_v21, 0.0  ;;  %v146_v21 = vld [vmem:[%s8702_s2 + $0x158] sm:$0xff]  ;;  %v5819_v53 = vpop.permute.xlu1 %334 }
 0x12b   :  { %1509 = vadd.xlane.f32.xlu1 %v1508_v23  ;;  %v846_v23 = vadd.f32 %v5561_v61, %v5566_v1  ;;  %v5751_v16 = vpop.permute.xlu0 %319 }
 0x12c   :  { %1186 = vadd.xlane.f32.xlu0 %v1185_v25  ;;  %v5842_v47 = vpop.permute.xlu1 %344 }
 0x12d   :  { %v5692_v30 = vpop.f32.mrb[36].mxu0  ;;  %v5733_v32 = vmax.f32 %v846_v23, 0.0 }
 0x12e   :  { %v5696_v6 = vpop.f32.mrb[37].mxu0 }
 0x12f   :  { %v5699_v43 = vpop.f32.mrb[38].mxu0  ;;  %1503 = vadd.xlane.f32.xlu1 %v1502_v39  ;;  %8886 = vst [vmem:[#allocation28_spill] sm:$0xff] %v5733_v32  ;;  %v1155_v39 = vsel %vm1121_vm1, %v5733_v32, 0.0 }
 0x130   :  { %v5704_v52 = vpop.f32.mrb[39].mxu0  ;;  %1512 = vadd.xlane.f32.xlu0 %v1511_v45  ;;  %v1517_v45 = vsel %vm1121_vm1, %v1403_v40, 0.0  ;;  %v150_v40 = vld [vmem:[%s8702_s2 + $0x178] sm:$0xff] }
 0x133   :  { %1201 = vadd.xlane.f32.xlu1 %v1200_v10  ;;  %v142_v10 = vld [vmem:[%s8702_s2 + $0x138] sm:$0xff] }
 0x134   :  { %1506 = vadd.xlane.f32.xlu0 %v1505_v60  ;;  %v144_v60 = vld [vmem:[%s8702_s2 + $0x148] sm:$0xff] }
 0x135   :  { %v5714_v62 = vpop.f32.mrb[40].mxu0 }
 0x136   :  { %v5716_v55 = vpop.f32.mrb[41].mxu0 }
 0x137   :  { %1195 = vadd.xlane.f32.xlu1 %v1194_v20  ;;  %v5728_v4 = vpop.f32.mrb[42].mxu0  ;;  %v5756_v20 = vpop.permute.xlu0 %329 }
 0x138   :  { %1204 = vadd.xlane.f32.xlu0 %v1203_v22  ;;  %v5730_v25 = vpop.f32.mrb[43].mxu0 }
 0x13b   :  { %1515 = vadd.xlane.f32.xlu1 %v1514_v29  ;;  %v148_v29 = vld [vmem:[%s8702_s2 + $0x168] sm:$0xff] }
 0x13c   :  { %1198 = vadd.xlane.f32.xlu0 %v1197_v37  ;;  %v5768_v37 = vpop.permute.xlu0 %339 }
 0x13d   :  { %v5737_v61 = vpop.f32.mrb[44].mxu0 }
 0x13e   :  { %8887 = vst [vmem:[#allocation29_spill] sm:$0xff] %v5737_v61  ;;  %v5739_v1 = vpop.f32.mrb[45].mxu0  ;;  %v166_v61 = vld [vmem:[%s8702_s2 + $0x1f8] sm:$0xff] }
 0x13f   :  { %8888 = vst [vmem:[#allocation30_spill] sm:$0xff] %v5739_v1  ;;  %v5761_v23 = vpop.f32.mrb[46].mxu0 }
 0x140   :  { %1156 = vadd.xlane.f32.xlu0 %v1155_v39  ;;  %8889 = vst [vmem:[#allocation31_spill] sm:$0xff] %v5761_v23  ;;  %v5763_v22 = vpop.f32.mrb[47].mxu0  ;;  %v149_v39 = vld [vmem:[%s8702_s2 + $0x170] sm:$0xff] }
 0x141   :  { %8890 = vst [vmem:[#allocation32_spill] sm:$0xff] %v5763_v22 }
 0x144   :  { %1518 = vadd.xlane.f32.xlu0 %v1517_v45 }
 0x145   :  { %v5776_v45 = vpop.f32.mrb[48].mxu0 }
 0x14c   :  { %364 = vperm.xlu1 %4799, %v142_v10   ;;  %v5778_v10 = vpop.f32.mrb[49].mxu0 }
 0x150   :  { %374 = vperm.xlu1 %4799, %v144_v60   ;;  %v151_v60 = vld [vmem:[%s8702_s2 + $0x180] sm:$0xff] }
 0x154   :  { %384 = vperm.xlu1 %4799, %v146_v21   ;;  %v5783_v21 = vpop.f32.mrb[50].mxu0 }
 0x155   :  { %v5787_v42 = vpop.f32.mrb[51].mxu0 }
 0x158   :  { %394 = vperm.xlu1 %4799, %v148_v29   ;;  %v5789_v29 = vpop.permute.xlu0 %349 }
 0x15a   :  { %399 = vperm.xlu0 %4798, %v149_v39   ;;  %v153_v39 = vld [vmem:[%s8702_s2 + $0x190] sm:$0xff] }
 0x15c   :  { %404 = vperm.xlu1 %4799, %v150_v40   ;;  %v5802_v40 = vpop.permute.xlu0 %359 }
 0x15e   :  { %409 = vperm.xlu0 %4798, %v151_v60   ;;  %v5807_v60 = vpop.f32.mrb[52].mxu0 }
 0x15f   :  { %v5812_v49 = vpop.f32.mrb[53].mxu0 }
 0x160   :  { %414 = vperm.xlu1 %4799, %v152_v27   ;;  %v156_v27 = vld [vmem:[%s8702_s2 + $0x1a8] sm:$0xff]  ;;  %v5817_v36 = vpop.f32.mrb[54].mxu0 }
 0x161   :  { %v5821_v14 = vpop.f32.mrb[55].mxu0 }
 0x162   :  { %419 = vperm.xlu0 %4798, %v153_v39   ;;  %v157_v39 = vld [vmem:[%s8702_s2 + $0x1b0] sm:$0xff]  ;;  %v5828_v50 = vpop.f32.mrb[56].mxu0 }
 0x163   :  { %v5833_v63 = vpop.f32.mrb[57].mxu0 }
 0x164   :  { %424 = vperm.xlu1 %4799, %v154_v54   ;;  %v5823_v54 = vpop.permute.xlu0 %369  ;;  %v5835_v35 = vpop.f32.mrb[58].mxu0 }
 0x165   :  { %v5840_v28 = vpop.f32.mrb[59].mxu0 }
 0x166   :  { %429 = vperm.xlu0 %4798, %v155_v5   ;;  %v160_v5 = vld [vmem:[%s8702_s2 + $0x1c8] sm:$0xff]  ;;  %v5852_v44 = vpop.f32.mrb[60].mxu0 }
 0x167   :  { %8891 = vst [vmem:[#allocation33_spill] sm:$0xff] %v5852_v44  ;;  %v5857_v0 = vpop.f32.mrb[61].mxu0 }
 0x168   :  { %434 = vperm.xlu1 %4799, %v156_v27   ;;  %v159_v27 = vld [vmem:[%s8702_s2 + $0x1c0] sm:$0xff]  ;;  %8892 = vst [vmem:[#allocation34_spill] sm:$0xff] %v5857_v0  ;;  %v5861_v7 = vpop.f32.mrb[62].mxu0 }
 0x169   :  { %8893 = vst [vmem:[#allocation35_spill] sm:$0xff] %v5861_v7 }
 0x16a   :  { %439 = vperm.xlu0 %4798, %v157_v39   ;;  %v5844_v39 = vpop.permute.xlu0 %379 }
 0x16c   :  { %444 = vperm.xlu1 %4799, %v158_v56   ;;  %v161_v56 = vld [vmem:[%s8702_s2 + $0x1d0] sm:$0xff] }
 0x16e   :  { %454 = vperm.xlu0 %4798, %v160_v5   ;;  %v5859_v5 = vpop.permute.xlu1 %354  ;;  %v5863_v23 = vpop.permute.xlu0 %389 }
 0x16f   :  { %8894 = vst [vmem:[#allocation36_spill] sm:$0xff] %v5863_v23 }
 0x170   :  { %449 = vperm.xlu1 %4799, %v159_v27   ;;  %v163_v27 = vld [vmem:[%s8702_s2 + $0x1e0] sm:$0xff] }
 0x172   :  { %464 = vperm.xlu0 %4798, %v162_v13   ;;  %v5868_v13 = vpop.f32.mrb[63].mxu0 }
 0x173   :  { %8895 = vst [vmem:[#allocation37_spill] sm:$0xff] %v5868_v13 }
 0x174   :  { %459 = vperm.xlu1 %4799, %v161_v56   ;;  %v165_v56 = vld [vmem:[%s8702_s2 + $0x1f0] sm:$0xff] }
 0x176   :  { %474 = vperm.xlu0 %4798, %v164_v31  }
 0x178   :  { %v5873_v44 = vpop.xlane.xlu1 %1129  ;;  %469 = vperm.xlu1 %4799, %v163_v27  }
 0x179   :  { %8896 = vst [vmem:[#allocation38_spill] sm:$0xff] %v5873_v44  ;;  %v5875_v22 = vpop.xlane.xlu0 %1123 }
 0x17a   :  { %8897 = vst [vmem:[#allocation39_spill] sm:$0xff] %v5875_v22  ;;  %484 = vperm.xlu0 %4798, %v166_v61  }
 0x17c   :  { %v5880_v7 = vpop.xlane.xlu1 %1449  ;;  %479 = vperm.xlu1 %4799, %v165_v56  }
 0x17d   :  { %8898 = vst [vmem:[#allocation40_spill] sm:$0xff] %v5880_v7  ;;  %v5882_v1 = vpop.xlane.xlu0 %1132 }
 0x17e   :  { %8899 = vst [vmem:[#allocation41_spill] sm:$0xff] %v5882_v1 }
 0x180   :  { %v5884_v31 = vpop.xlane.xlu1 %1443 }
 0x181   :  { %v5886_v23 = vpop.xlane.xlu0 %1126 }
 0x182   :  { %8900 = vst [vmem:[#allocation42_spill] sm:$0xff] %v5886_v23  ;;  %v1405_v23 = vmul.f32 %v5710_v51, %v5710_v51  ;;  %v854_v51 = vadd.f32 %v5592_v18, %v5590_v17 }
 0x184   :  { %v5888_v13 = vpop.xlane.xlu1 %1141 }
 0x185   :  { %8901 = vst [vmem:[#allocation43_spill] sm:$0xff] %v5888_v13  ;;  %v5890_v44 = vpop.xlane.xlu0 %1452 }
 0x186   :  { %8902 = vst [vmem:[#allocation44_spill] sm:$0xff] %v5890_v44 }
 0x188   :  { %v5892_v27 = vpop.xlane.xlu1 %1135 }
 0x189   :  { %8903 = vst [vmem:[#allocation45_spill] sm:$0xff] %v5892_v27  ;;  %v5894_v22 = vpop.xlane.xlu0 %1446  ;;  %v918_v27 = vadd.f32 %v5660_v46, %v5785_v2 }
 0x18c   :  { %v5896_v0 = vpop.xlane.xlu1 %1461 }
 0x18d   :  { %8904 = vst [vmem:[#allocation46_spill] sm:$0xff] %v5896_v0  ;;  %v5898_v61 = vpop.xlane.xlu0 %1144  ;;  %v1523_v0 = vsel %vm1121_vm1, %v1405_v23, 0.0 }
 0x18e   :  { %8905 = vst [vmem:[#allocation47_spill] sm:$0xff] %v5898_v61  ;;  %v1389_v61 = vmul.f32 %v5733_v32, %v5733_v32  ;;  %v1388_v32 = vmul.f32 %v5594_v19, %v5594_v19 }
 0x190   :  { %v5900_v7 = vpop.xlane.xlu1 %1455  ;;  %v1475_v2 = vsel %vm1121_vm1, %v1389_v61, 0.0  ;;  %v851_v61 = vadd.f32 %v5579_v11, %v5559_v59  ;;  %v926_v11 = vadd.f32 %v5655_v41, %v5800_v24  ;;  %v862_v41 = vadd.f32 %v5586_v15, %v5601_v26 }
 0x191   :  { %8906 = vst [vmem:[#allocation48_spill] sm:$0xff] %v5900_v7  ;;  %v5902_v56 = vpop.xlane.xlu0 %1138 }
 0x192   :  { %8907 = vst [vmem:[#allocation49_spill] sm:$0xff] %v5902_v56  ;;  %v5923_v56 = vmax.f32 %v918_v27, 0.0  ;;  %v5975_v24 = vmax.f32 %v926_v11, 0.0 }
 0x194   :  { %v5904_v1 = vpop.xlane.xlu1 %1153  ;;  %8912 = vst [vmem:[#allocation54_spill] sm:$0xff] %v5923_v56  ;;  %v1209_v18 = vsel %vm1121_vm1, %v5923_v56, 0.0  ;;  %8919 = vst [vmem:[#allocation61_spill] sm:$0xff] %v5975_v24  ;;  %v1215_v26 = vsel %vm1121_vm1, %v5975_v24, 0.0 }
 0x195   :  { %8908 = vst [vmem:[#allocation50_spill] sm:$0xff] %v5904_v1  ;;  %v5908_v13 = vpop.xlane.xlu0 %1464  ;;  %v1404_v1 = vmul.f32 %v5694_v34, %v5694_v34  ;;  %v5935_v34 = vmax.f32 %v854_v51, 0.0 }
 0x196   :  { %8909 = vst [vmem:[#allocation51_spill] sm:$0xff] %v5908_v13 }
 0x197   :  { %v1520_v23 = vsel %vm1121_vm1, %v1404_v1, 0.0  ;;  %8915 = vst [vmem:[#allocation57_spill] sm:$0xff] %v5935_v34  ;;  %v1472_v1 = vsel %vm1121_vm1, %v1388_v32, 0.0  ;;  %v1161_v51 = vsel %vm1121_vm1, %v5935_v34, 0.0 }
 0x198   :  { %v5912_v44 = vpop.xlane.xlu1 %1147 }
 0x199   :  { %8910 = vst [vmem:[#allocation52_spill] sm:$0xff] %v5912_v44  ;;  %1524 = vadd.xlane.f32.xlu0 %v1523_v0  ;;  %v5917_v7 = vpop.xlane.xlu0 %1458  ;;  %v915_v0 = vadd.f32 %v5652_v38, %v5746_v48 }
 0x19a   :  { %8911 = vst [vmem:[#allocation53_spill] sm:$0xff] %v5917_v7 }
 0x19b   :  { %v5945_v38 = vmax.f32 %v915_v0, 0.0 }
 0x19c   :  { %v5925_v13 = vpop.xlane.xlu1 %1467 }
 0x19d   :  { %8913 = vst [vmem:[#allocation55_spill] sm:$0xff] %v5925_v13  ;;  %1476 = vadd.xlane.f32.xlu0 %v1475_v2  ;;  %v5928_v46 = vpop.xlane.xlu0 %1150  ;;  %8917 = vst [vmem:[#allocation59_spill] sm:$0xff] %v5945_v38  ;;  %v1407_v2 = vmul.f32 %v5923_v56, %v5923_v56  ;;  %v1206_v59 = vsel %vm1121_vm1, %v5945_v38, 0.0  ;;  %v1406_v56 = vmul.f32 %v5945_v38, %v5945_v38 }
 0x19e   :  { %8914 = vst [vmem:[#allocation56_spill] sm:$0xff] %v5928_v46 }
 0x19f   :  { %v1529_v0 = vsel %vm1121_vm1, %v1407_v2, 0.0  ;;  %v1526_v19 = vsel %vm1121_vm1, %v1406_v56, 0.0 }
 0x1a0   :  { %1521 = vadd.xlane.f32.xlu1 %v1520_v23  ;;  %v5937_v17 = vpop.xlane.xlu1 %1177 }
 0x1a1   :  { %1210 = vadd.xlane.f32.xlu0 %v1209_v18  ;;  %v5941_v27 = vpop.xlane.xlu0 %1470  ;;  %v5956_v18 = vmax.f32 %v851_v61, 0.0 }
 0x1a2   :  { %8916 = vst [vmem:[#allocation58_spill] sm:$0xff] %v5941_v27  ;;  %v5987_v27 = vmax.f32 %v862_v41, 0.0 }
 0x1a3   :  { %8918 = vst [vmem:[#allocation60_spill] sm:$0xff] %v5956_v18  ;;  %v1158_v61 = vsel %vm1121_vm1, %v5956_v18, 0.0  ;;  %v1390_v38 = vmul.f32 %v5956_v18, %v5956_v18 }
 0x1a4   :  { %1473 = vadd.xlane.f32.xlu1 %v1472_v1  ;;  %v5948_v48 = vpop.xlane.xlu1 %1497  ;;  %v1391_v1 = vmul.f32 %v5935_v34, %v5935_v34  ;;  %v923_v34 = vadd.f32 %v5648_v33, %v5751_v16  ;;  %8920 = vst [vmem:[#allocation62_spill] sm:$0xff] %v5987_v27 }
 0x1a5   :  { %1162 = vadd.xlane.f32.xlu0 %v1161_v51  ;;  %v5954_v23 = vpop.xlane.xlu0 %1171  ;;  %v1478_v16 = vsel %vm1121_vm1, %v1390_v38, 0.0  ;;  %v1393_v38 = vmul.f32 %v5987_v27, %v5987_v27 }
 0x1a6   :  { %v1481_v2 = vsel %vm1121_vm1, %v1391_v1, 0.0  ;;  %v859_v1 = vadd.f32 %v5577_v9, %v5575_v8  ;;  %v5997_v33 = vmax.f32 %v923_v34, 0.0 }
 0x1a8   :  { %1207 = vadd.xlane.f32.xlu1 %v1206_v59  ;;  %v5962_v32 = vpop.xlane.xlu1 %1174  ;;  %8922 = vst [vmem:[#allocation64_spill] sm:$0xff] %v5997_v33  ;;  %v1212_v8 = vsel %vm1121_vm1, %v5997_v33, 0.0 }
 0x1a9   :  { %1530 = vadd.xlane.f32.xlu0 %v1529_v0  ;;  %v5967_v51 = vpop.xlane.xlu0 %1180 }
 0x1ac   :  { %1159 = vadd.xlane.f32.xlu1 %v1158_v61  ;;  %v5977_v59 = vpop.xlane.xlu1 %1491  ;;  %v1409_v61 = vmul.f32 %v5975_v24, %v5975_v24 }
 0x1ad   :  { %1482 = vadd.xlane.f32.xlu0 %v1481_v2  ;;  %v5980_v0 = vpop.xlane.xlu0 %1500  ;;  %v6008_v2 = vmax.f32 %v859_v1, 0.0  ;;  %v1408_v1 = vmul.f32 %v5997_v33, %v5997_v33 }
 0x1ae   :  { %v1535_v34 = vsel %vm1121_vm1, %v1409_v61, 0.0 }
 0x1af   :  { %8924 = vst [vmem:[#allocation66_spill] sm:$0xff] %v6008_v2  ;;  %v1532_v61 = vsel %vm1121_vm1, %v1408_v1, 0.0 }
 0x1b0   :  { %1527 = vadd.xlane.f32.xlu1 %v1526_v19  ;;  %v5989_v15 = vpop.xlane.xlu1 %1189  ;;  %v1167_v19 = vsel %vm1121_vm1, %v5987_v27, 0.0 }
 0x1b1   :  { %8921 = vst [vmem:[#allocation63_spill] sm:$0xff] %v5989_v15  ;;  %1216 = vadd.xlane.f32.xlu0 %v1215_v26  ;;  %v5993_v11 = vpop.xlane.xlu0 %1494 }
 0x1b4   :  { %1479 = vadd.xlane.f32.xlu1 %v1478_v16  ;;  %v6000_v56 = vpop.xlane.xlu1 %1183  ;;  %v1164_v16 = vsel %vm1121_vm1, %v6008_v2, 0.0 }
 0x1b5   :  { %1168 = vadd.xlane.f32.xlu0 %v1167_v19  ;;  %v6006_v41 = vpop.xlane.xlu0 %1192 }
 0x1b6   :  { %8923 = vst [vmem:[#allocation65_spill] sm:$0xff] %v6006_v41 }
 0x1b8   :  { %1213 = vadd.xlane.f32.xlu1 %v1212_v8  ;;  %v6012_v9 = vpop.xlane.xlu1 %1509  ;;  %v1487_v8 = vsel %vm1121_vm1, %v1393_v38, 0.0 }
 0x1b9   :  { %8925 = vst [vmem:[#allocation67_spill] sm:$0xff] %v6012_v9  ;;  %1536 = vadd.xlane.f32.xlu0 %v1535_v34  ;;  %v6017_v26 = vpop.xlane.xlu0 %1186  ;;  %v1392_v34 = vmul.f32 %v6008_v2, %v6008_v2 }
 0x1bb   :  { %v1484_v33 = vsel %vm1121_vm1, %v1392_v34, 0.0 }
 0x1bc   :  { %1165 = vadd.xlane.f32.xlu1 %v1164_v16  ;;  %v6023_v19 = vpop.xlane.xlu1 %1503 }
 0x1bd   :  { %1488 = vadd.xlane.f32.xlu0 %v1487_v8  ;;  %v6026_v24 = vpop.xlane.xlu0 %1512 }
 0x1be   :  { %8926 = vst [vmem:[#allocation68_spill] sm:$0xff] %v6026_v24  ;;  %v934_v24 = vadd.f32 %v5683_v12, %v5819_v53 }
 0x1c0   :  { %1533 = vadd.xlane.f32.xlu1 %v1532_v61  ;;  %v6031_v27 = vpop.xlane.xlu1 %1201  ;;  %v6074_v7 = vmax.f32 %v934_v24, 0.0 }
 0x1c1   :  { %8927 = vst [vmem:[#allocation69_spill] sm:$0xff] %v6031_v27  ;;  %v6033_v18 = vpop.xlane.xlu0 %1506 }
 0x1c2   :  { %8937 = vst [vmem:[#allocation79_spill] sm:$0xff] %v6074_v7  ;;  %v1221_v12 = vsel %vm1121_vm1, %v6074_v7, 0.0 }
 0x1c4   :  { %1485 = vadd.xlane.f32.xlu1 %v1484_v33  ;;  %v6036_v16 = vpop.xlane.xlu1 %1195 }
 0x1c5   :  { %8928 = vst [vmem:[#allocation70_spill] sm:$0xff] %v6036_v16  ;;  %v6038_v46 = vpop.xlane.xlu0 %1204 }
 0x1c6   :  { %8929 = vst [vmem:[#allocation71_spill] sm:$0xff] %v6038_v46 }
 0x1c8   :  { %v6040_v38 = vpop.xlane.xlu1 %1515 }
 0x1c9   :  { %8930 = vst [vmem:[#allocation72_spill] sm:$0xff] %v6040_v38  ;;  %v6042_v8 = vpop.xlane.xlu0 %1198  ;;  %v931_v38 = vadd.f32 %v5671_v58, %v5756_v20 }
 0x1ca   :  { %8931 = vst [vmem:[#allocation73_spill] sm:$0xff] %v6042_v8 }
 0x1cb   :  { %v6068_v41 = vmax.f32 %v931_v38, 0.0 }
 0x1cc   :  { %v6044_v1 = vpop.permute.xlu1 %364 }
 0x1cd   :  { %v6046_v13 = vpop.xlane.xlu0 %1156  ;;  %8935 = vst [vmem:[#allocation77_spill] sm:$0xff] %v6068_v41  ;;  %v1218_v20 = vsel %vm1121_vm1, %v6068_v41, 0.0  ;;  %v1410_v24 = vmul.f32 %v6068_v41, %v6068_v41 }
 0x1ce   :  { %8932 = vst [vmem:[#allocation74_spill] sm:$0xff] %v6046_v13 }
 0x1d0   :  { %v6048_v61 = vpop.permute.xlu1 %374 }
 0x1d1   :  { %v6052_v27 = vpop.xlane.xlu0 %1518 }
 0x1d2   :  { %8933 = vst [vmem:[#allocation75_spill] sm:$0xff] %v6052_v27 }
 0x1d4   :  { %v6050_v2 = vpop.permute.xlu1 %384 }
 0x1d8   :  { %v6054_v34 = vpop.permute.xlu1 %394 }
 0x1d9   :  { %v6056_v33 = vpop.permute.xlu0 %399 }
 0x1dc   :  { %v6058_v16 = vpop.permute.xlu1 %404 }
 0x1dd   :  { %v410_v46 = vpop.permute.xlu0 %409 }
 0x1de   :  { %v995_v8 = vadd.f32 %v5778_v10, %v410_v46 }
 0x1e0   :  { %v6063_v44 = vmax.f32 %v995_v8, 0.0  ;;  %v415_v13 = vpop.permute.xlu1 %414  ;;  %v1411_v8 = vmul.f32 %v6074_v7, %v6074_v7 }
 0x1e1   :  { %v998_v27 = vadd.f32 %v5787_v42, %v415_v13  ;;  %v420_v53 = vpop.permute.xlu0 %419 }
 0x1e2   :  { %8934 = vst [vmem:[#allocation76_spill] sm:$0xff] %v6063_v44  ;;  %v1266_v9 = vsel %vm1121_vm1, %v6063_v44, 0.0  ;;  %v1426_v42 = vmul.f32 %v6063_v44, %v6063_v44  ;;  %v1003_v13 = vadd.f32 %v5776_v45, %v420_v53  ;;  %v1538_v45 = vsel %vm1121_vm1, %v1410_v24, 0.0  ;;  %v6536_v44 = vld [vmem:[%s8702_s2 + $0x88] sm:$0xff] }
 0x1e3   :  { %v6072_v15 = vmax.f32 %v998_v27, 0.0  ;;  %1267 = vadd.xlane.f32.xlu1 %v1266_v9 }
 0x1e4   :  { %v425_v46 = vpop.permute.xlu1 %424  ;;  %v1586_v27 = vsel %vm1121_vm1, %v1426_v42, 0.0  ;;  %v942_v42 = vadd.f32 %v5679_v3, %v5842_v47 }
 0x1e5   :  { %8936 = vst [vmem:[#allocation78_spill] sm:$0xff] %v6072_v15  ;;  %v1269_v58 = vsel %vm1121_vm1, %v6072_v15, 0.0  ;;  %v1427_v10 = vmul.f32 %v6072_v15, %v6072_v15  ;;  %v1006_v9 = vadd.f32 %v5783_v21, %v425_v46  ;;  %v1541_v21 = vsel %vm1121_vm1, %v1411_v8, 0.0 }
 0x1e6   :  { %1270 = vadd.xlane.f32.xlu0 %v1269_v58  ;;  %v939_v58 = vadd.f32 %v5669_v57, %v5768_v37  ;;  %v6108_v57 = vmax.f32 %v942_v42, 0.0 }
 0x1e7   :  { %1219 = vadd.xlane.f32.xlu1 %v1218_v20  ;;  %v1589_v38 = vsel %vm1121_vm1, %v1427_v10, 0.0  ;;  %v6096_v20 = vmax.f32 %v1003_v13, 0.0  ;;  %v6101_v53 = vmax.f32 %v1006_v9, 0.0  ;;  %v430_v13 = vpop.permute.xlu0 %429 }
 0x1e8   :  { %8941 = vst [vmem:[#allocation83_spill] sm:$0xff] %v6108_v57  ;;  %v1227_v46 = vsel %vm1121_vm1, %v6108_v57, 0.0  ;;  %v1011_v24 = vadd.f32 %v5812_v49, %v430_v13  ;;  %v435_v9 = vpop.permute.xlu1 %434  ;;  %v1413_v42 = vmul.f32 %v6108_v57, %v6108_v57 }
 0x1e9   :  { %8938 = vst [vmem:[#allocation80_spill] sm:$0xff] %v6096_v20  ;;  %8939 = vst [vmem:[#allocation81_spill] sm:$0xff] %v6101_v53  ;;  %v1272_v10 = vsel %vm1121_vm1, %v6096_v20, 0.0  ;;  %v1275_v37 = vsel %vm1121_vm1, %v6101_v53, 0.0  ;;  %v1428_v3 = vmul.f32 %v6096_v20, %v6096_v20 }
 0x1ea   :  { %1222 = vadd.xlane.f32.xlu0 %v1221_v12  ;;  %v6104_v12 = vmax.f32 %v939_v58, 0.0  ;;  %v1014_v58 = vadd.f32 %v5821_v14, %v435_v9  ;;  %v1547_v14 = vsel %vm1121_vm1, %v1413_v42, 0.0 }
 0x1eb   :  { %1587 = vadd.xlane.f32.xlu1 %v1586_v27  ;;  %v1429_v27 = vmul.f32 %v6101_v53, %v6101_v53 }
 0x1ec   :  { %8940 = vst [vmem:[#allocation82_spill] sm:$0xff] %v6104_v12  ;;  %v1224_v47 = vsel %vm1121_vm1, %v6104_v12, 0.0  ;;  %v1412_v8 = vmul.f32 %v6104_v12, %v6104_v12 }
 0x1ee   :  { %1590 = vadd.xlane.f32.xlu0 %v1589_v38  ;;  %v1592_v38 = vsel %vm1121_vm1, %v1428_v3, 0.0  ;;  %v1544_v49 = vsel %vm1121_vm1, %v1412_v8, 0.0 }
 0x1ef   :  { %1539 = vadd.xlane.f32.xlu1 %v1538_v45  ;;  %v1595_v45 = vsel %vm1121_vm1, %v1429_v27, 0.0 }
 0x1f2   :  { %1542 = vadd.xlane.f32.xlu0 %v1541_v21  ;;  %v947_v21 = vadd.f32 %v5696_v6, %v5789_v29 }
 0x1f3   :  { %1273 = vadd.xlane.f32.xlu1 %v1272_v10  ;;  %v6130_v10 = vmax.f32 %v1011_v24, 0.0 }
 0x1f4   :  { %v6138_v3 = vmax.f32 %v947_v21, 0.0 }
 0x1f5   :  { %8942 = vst [vmem:[#allocation84_spill] sm:$0xff] %v6130_v10  ;;  %v1278_v13 = vsel %vm1121_vm1, %v6130_v10, 0.0 }
 0x1f6   :  { %1276 = vadd.xlane.f32.xlu0 %v1275_v37  ;;  %v950_v37 = vadd.f32 %v5704_v52, %v5859_v5  ;;  %8944 = vst [vmem:[#allocation86_spill] sm:$0xff] %v6138_v3  ;;  %v1230_v52 = vsel %vm1121_vm1, %v6138_v3, 0.0  ;;  %v1430_v5 = vmul.f32 %v6130_v10, %v6130_v10 }
 0x1f7   :  { %1225 = vadd.xlane.f32.xlu1 %v1224_v47  ;;  %v6135_v47 = vmax.f32 %v1014_v58, 0.0  ;;  %v1414_v58 = vmul.f32 %v6138_v3, %v6138_v3 }
 0x1f8   :  { %v6142_v6 = vmax.f32 %v950_v37, 0.0  ;;  %v1598_v8 = vsel %vm1121_vm1, %v1430_v5, 0.0 }
 0x1f9   :  { %8943 = vst [vmem:[#allocation85_spill] sm:$0xff] %v6135_v47  ;;  %v1281_v29 = vsel %vm1121_vm1, %v6135_v47, 0.0  ;;  %v1431_v24 = vmul.f32 %v6135_v47, %v6135_v47 }
 0x1fa   :  { %1228 = vadd.xlane.f32.xlu0 %v1227_v46  ;;  %8945 = vst [vmem:[#allocation87_spill] sm:$0xff] %v6142_v6  ;;  %v440_v46 = vpop.permute.xlu0 %439  ;;  %v1233_v27 = vsel %vm1121_vm1, %v6142_v6, 0.0  ;;  %v1415_v21 = vmul.f32 %v6142_v6, %v6142_v6 }
 0x1fb   :  { %1593 = vadd.xlane.f32.xlu1 %v1592_v38  ;;  %v1019_v9 = vadd.f32 %v5807_v60, %v440_v46  ;;  %v445_v38 = vpop.permute.xlu1 %444  ;;  %v1601_v42 = vsel %vm1121_vm1, %v1431_v24, 0.0  ;;  %v1550_v60 = vsel %vm1121_vm1, %v1414_v58, 0.0 }
 0x1fd   :  { %v6164_v37 = vmax.f32 %v1019_v9, 0.0 }
 0x1fe   :  { %1596 = vadd.xlane.f32.xlu0 %v1595_v45  ;;  %v1022_v45 = vadd.f32 %v5817_v36, %v445_v38  ;;  %v1553_v36 = vsel %vm1121_vm1, %v1415_v21, 0.0  ;;  %v455_v24 = vpop.permute.xlu0 %454  ;;  %v963_v21 = vadd.f32 %v5716_v55, %v5823_v54 }
 0x1ff   :  { %1545 = vadd.xlane.f32.xlu1 %v1544_v49  ;;  %v955_v49 = vadd.f32 %v5692_v30, %v5802_v40  ;;  %8946 = vst [vmem:[#allocation88_spill] sm:$0xff] %v6164_v37  ;;  %v450_v5 = vpop.permute.xlu1 %449  ;;  %v1030_v58 = vadd.f32 %v5840_v28, %v455_v24 }
 0x200   :  { %v1027_v9 = vadd.f32 %v5833_v63, %v450_v5 }
 0x202   :  { %1548 = vadd.xlane.f32.xlu0 %v1547_v14  ;;  %v958_v14 = vadd.f32 %v5699_v43, %v6044_v1  ;;  %v1432_v1 = vmul.f32 %v6164_v37, %v6164_v37 }
 0x203   :  { %1279 = vadd.xlane.f32.xlu1 %v1278_v13  ;;  %v6169_v13 = vmax.f32 %v1022_v45, 0.0 }
 0x204   :  { %v6176_v30 = vmax.f32 %v958_v14, 0.0  ;;  %v1604_v38 = vsel %vm1121_vm1, %v1432_v1, 0.0  ;;  %v6203_v14 = vmax.f32 %v1030_v58, 0.0 }
 0x205   :  { %8947 = vst [vmem:[#allocation89_spill] sm:$0xff] %v6169_v13  ;;  %v1287_v40 = vsel %vm1121_vm1, %v6169_v13, 0.0 }
 0x206   :  { %1282 = vadd.xlane.f32.xlu0 %v1281_v29  ;;  %v6172_v29 = vmax.f32 %v955_v49, 0.0  ;;  %8949 = vst [vmem:[#allocation91_spill] sm:$0xff] %v6176_v30  ;;  %v1239_v46 = vsel %vm1121_vm1, %v6176_v30, 0.0  ;;  %v6198_v49 = vmax.f32 %v1027_v9, 0.0  ;;  %8951 = vst [vmem:[#allocation93_spill] sm:$0xff] %v6203_v14  ;;  %v1293_v54 = vsel %vm1121_vm1, %v6203_v14, 0.0 }
 0x207   :  { %1231 = vadd.xlane.f32.xlu1 %v1230_v52  ;;  %v1284_v52 = vsel %vm1121_vm1, %v6164_v37, 0.0  ;;  %v1435_v5 = vmul.f32 %v6203_v14, %v6203_v14  ;;  %v8985_v37 = vld [vmem:[#allocation48_spill] sm:$0xff] }
 0x208   :  { %8948 = vst [vmem:[#allocation90_spill] sm:$0xff] %v6172_v29  ;;  %v1236_v43 = vsel %vm1121_vm1, %v6172_v29, 0.0  ;;  %8950 = vst [vmem:[#allocation92_spill] sm:$0xff] %v6198_v49 }
 0x20a   :  { %1234 = vadd.xlane.f32.xlu0 %v1233_v27  ;;  %v1433_v27 = vmul.f32 %v6169_v13, %v6169_v13  ;;  %v1638_v13 = vmul.f32 0.0625, %v8985_v37 }
 0x20b   :  { %1599 = vadd.xlane.f32.xlu1 %v1598_v8  ;;  %v1416_v8 = vmul.f32 %v6172_v29, %v6172_v29  ;;  %v1652_v29 = vmul.f32 0.0625, %v5948_v48 }
 0x20c   :  { %v1607_v45 = vsel %vm1121_vm1, %v1433_v27, 0.0 }
 0x20d   :  { %v1556_v63 = vsel %vm1121_vm1, %v1416_v8, 0.0  ;;  %v1613_v8 = vsel %vm1121_vm1, %v1435_v5, 0.0 }
 0x20e   :  { %1602 = vadd.xlane.f32.xlu0 %v1601_v42  ;;  %v1417_v42 = vmul.f32 %v6176_v30, %v6176_v30  ;;  %v1653_v30 = vmul.f32 0.0625, %v5980_v0 }
 0x20f   :  { %1551 = vadd.xlane.f32.xlu1 %v1550_v60  ;;  %v966_v60 = vadd.f32 %v5730_v25, %v6048_v61  ;;  %v1434_v61 = vmul.f32 %v6198_v49, %v6198_v49 }
 0x210   :  { %v1559_v28 = vsel %vm1121_vm1, %v1417_v42, 0.0 }
 0x211   :  { %v6210_v55 = vmax.f32 %v966_v60, 0.0  ;;  %v1610_v27 = vsel %vm1121_vm1, %v1434_v61, 0.0 }
 0x212   :  { %1554 = vadd.xlane.f32.xlu0 %v1553_v36  ;;  %v6206_v36 = vmax.f32 %v963_v21, 0.0 }
 0x213   :  { %1285 = vadd.xlane.f32.xlu1 %v1284_v52  ;;  %v1290_v52 = vsel %vm1121_vm1, %v6198_v49, 0.0  ;;  %8953 = vst [vmem:[#allocation95_spill] sm:$0xff] %v6210_v55  ;;  %v1245_v1 = vsel %vm1121_vm1, %v6210_v55, 0.0  ;;  %v1419_v58 = vmul.f32 %v6210_v55, %v6210_v55 }
 0x214   :  { %8952 = vst [vmem:[#allocation94_spill] sm:$0xff] %v6206_v36  ;;  %v1242_v25 = vsel %vm1121_vm1, %v6206_v36, 0.0  ;;  %v1418_v24 = vmul.f32 %v6206_v36, %v6206_v36 }
 0x216   :  { %1288 = vadd.xlane.f32.xlu0 %v1287_v40  ;;  %v460_v40 = vpop.permute.xlu1 %459 }
 0x217   :  { %1237 = vadd.xlane.f32.xlu1 %v1236_v43  ;;  %v465_v43 = vpop.permute.xlu0 %464 }
 0x21a   :  { %1240 = vadd.xlane.f32.xlu0 %v1239_v46  ;;  %v1035_v46 = vadd.f32 %v5828_v50, %v460_v40  ;;  %v470_v9 = vpop.permute.xlu1 %469  ;;  %v1562_v50 = vsel %vm1121_vm1, %v1418_v24, 0.0 }
 0x21b   :  { %1605 = vadd.xlane.f32.xlu1 %v1604_v38  ;;  %v1038_v38 = vadd.f32 %v5835_v35, %v465_v43  ;;  %v475_v21 = vpop.permute.xlu0 %474  ;;  %v1565_v35 = vsel %vm1121_vm1, %v1419_v58, 0.0  ;;  %v8959_v58 = vld [vmem:[#allocation37_spill] sm:$0xff] }
 0x21c   :  { %v6232_v42 = vmax.f32 %v1035_v46, 0.0  ;;  %v8958_v46 = vld [vmem:[#allocation34_spill] sm:$0xff] }
 0x21d   :  { %v6237_v60 = vmax.f32 %v1038_v38, 0.0 }
 0x21e   :  { %1608 = vadd.xlane.f32.xlu0 %v1607_v45  ;;  %v971_v45 = vadd.f32 %v5714_v62, %v5844_v39  ;;  %8954 = vst [vmem:[#allocation96_spill] sm:$0xff] %v6232_v42  ;;  %v1296_v62 = vsel %vm1121_vm1, %v6232_v42, 0.0  ;;  %v8743_v39 = vmov 1   ;;  %v1436_v61 = vmul.f32 %v6232_v42, %v6232_v42 }
 0x21f   :  { %1557 = vadd.xlane.f32.xlu1 %v1556_v63  ;;  %v974_v63 = vadd.f32 %v5728_v4, %v6050_v2  ;;  %8955 = vst [vmem:[#allocation97_spill] sm:$0xff] %v6237_v60  ;;  %v485_v40 = vpop.permute.xlu0 %484  ;;  %v1299_v4 = vsel %vm1121_vm1, %v6237_v60, 0.0  ;;  %v1437_v5 = vmul.f32 %v6237_v60, %v6237_v60 }
 0x220   :  { %4800 = vset.pattern.permute.xlu1 %v8743_v39  ;;  %v1616_v24 = vsel %vm1121_vm1, %v1436_v61, 0.0 }
 0x222   :  { %1560 = vadd.xlane.f32.xlu0 %v1559_v28  ;;  %v6240_v28 = vmax.f32 %v971_v45, 0.0  ;;  %v1046_v45 = vadd.f32 %v8959_v58, %v475_v21  ;;  %v8966_v58 = vld [vmem:[#allocation38_spill] sm:$0xff] }
 0x223   :  { %1291 = vadd.xlane.f32.xlu1 %v1290_v52  ;;  %v480_v52 = vpop.permute.xlu1 %479  ;;  %v6286_v39 = vmul.f32 0.0625, %v8966_v58 }
 0x224   :  { %8956 = vst [vmem:[#allocation98_spill] sm:$0xff] %v6240_v28  ;;  %v1420_v38 = vmul.f32 %v6240_v28, %v6240_v28  ;;  %v6280_v21 = vmax.f32 %v1046_v45, 0.0 }
 0x226   :  { %1294 = vadd.xlane.f32.xlu0 %v1293_v54  ;;  %v6245_v54 = vmax.f32 %v974_v63, 0.0  ;;  %v6255_v43 = vpop.xlane.xlu0 %1524  ;;  %8964 = vst [vmem:[#allocation37_spill] sm:$0xff] %v6280_v21  ;;  %v1305_v45 = vsel %vm1121_vm1, %v6280_v21, 0.0 }
 0x227   :  { %1243 = vadd.xlane.f32.xlu1 %v1242_v25  ;;  %v1248_v25 = vsel %vm1121_vm1, %v6240_v28, 0.0 }
 0x228   :  { %8957 = vst [vmem:[#allocation99_spill] sm:$0xff] %v6245_v54  ;;  %v1421_v63 = vmul.f32 %v6245_v54, %v6245_v54 }
 0x22a   :  { %1246 = vadd.xlane.f32.xlu0 %v1245_v1  ;;  %v1251_v1 = vsel %vm1121_vm1, %v6245_v54, 0.0  ;;  %v6276_v61 = vpop.xlane.xlu0 %1476 }
 0x22b   :  { %1611 = vadd.xlane.f32.xlu1 %v1610_v27  ;;  %v1043_v27 = vadd.f32 %v8958_v46, %v470_v9 }
 0x22d   :  { %v6249_v2 = vpop.xlane.xlu1 %1521  ;;  %v6273_v9 = vmax.f32 %v1043_v27, 0.0 }
 0x22e   :  { %1614 = vadd.xlane.f32.xlu0 %v1613_v8 }
 0x22f   :  { %1563 = vadd.xlane.f32.xlu1 %v1562_v50  ;;  %v1619_v50 = vsel %vm1121_vm1, %v1437_v5, 0.0  ;;  %8962 = vst [vmem:[#allocation34_spill] sm:$0xff] %v6273_v9  ;;  %v1571_v5 = vsel %vm1121_vm1, %v1421_v63, 0.0  ;;  %v1700_v63 = vmul.f32 %v6286_v39, %v6286_v39 }
 0x231   :  { %v6265_v8 = vpop.xlane.xlu1 %1473 }
 0x232   :  { %1566 = vadd.xlane.f32.xlu0 %v1565_v35  ;;  %v8960_v35 = vld [vmem:[#allocation36_spill] sm:$0xff] }
 0x233   :  { %1297 = vadd.xlane.f32.xlu1 %v1296_v62  ;;  %v8961_v62 = vld [vmem:[#allocation30_spill] sm:$0xff] }
 0x235   :  { %v6288_v27 = vpop.xlane.xlu1 %1207 }
 0x236   :  { %1300 = vadd.xlane.f32.xlu0 %v1299_v4  ;;  %v979_v4 = vadd.f32 %v8961_v62, %v8960_v35 }
 0x237   :  { %1249 = vadd.xlane.f32.xlu1 %v1248_v25  ;;  %v1568_v25 = vsel %vm1121_vm1, %v1420_v38, 0.0  ;;  %v1302_v38 = vsel %vm1121_vm1, %v6273_v9, 0.0 }
 0x239   :  { %v6308_v58 = vpop.xlane.xlu1 %1159 }
 0x23a   :  { %1252 = vadd.xlane.f32.xlu0 %v1251_v1  ;;  %v8963_v1 = vld [vmem:[#allocation32_spill] sm:$0xff] }
 0x23b   :  { %1617 = vadd.xlane.f32.xlu1 %v1616_v24  ;;  %v982_v46 = vadd.f32 %v8963_v1, %v6054_v34  ;;  %v6283_v24 = vmax.f32 %v979_v4, 0.0  ;;  %v6295_v34 = vpop.xlane.xlu0 %1210  ;;  %v8969_v1 = vld [vmem:[#allocation39_spill] sm:$0xff] }
 0x23d   :  { %8965 = vst [vmem:[#allocation36_spill] sm:$0xff] %v6283_v24  ;;  %v6293_v62 = vmax.f32 %v982_v46, 0.0  ;;  %v1254_v4 = vsel %vm1121_vm1, %v6283_v24, 0.0  ;;  %v6335_v60 = vpop.xlane.xlu1 %1527 }
 0x23e   :  { %1620 = vadd.xlane.f32.xlu0 %v1619_v50  ;;  %v8967_v50 = vld [vmem:[#allocation40_spill] sm:$0xff] }
 0x23f   :  { %1569 = vadd.xlane.f32.xlu1 %v1568_v25  ;;  %v1636_v35 = vmul.f32 0.0625, %v8967_v50  ;;  %8968 = vst [vmem:[#allocation30_spill] sm:$0xff] %v6293_v62  ;;  %v1438_v25 = vmul.f32 %v6273_v9, %v6273_v9  ;;  %v1439_v50 = vmul.f32 %v6280_v21, %v6280_v21 }
 0x241   :  { %v1764_v46 = vsub.f32 %v1636_v35, %v1700_v63  ;;  %v1622_v54 = vsel %vm1121_vm1, %v1438_v25, 0.0  ;;  %v6320_v35 = vmul.f32 0.0625, %v5954_v23  ;;  %v6322_v63 = vpop.xlane.xlu0 %1162  ;;  %v1625_v25 = vsel %vm1121_vm1, %v1439_v50, 0.0  ;;  %v8974_v50 = vld [vmem:[#allocation41_spill] sm:$0xff] }
 0x242   :  { %1572 = vadd.xlane.f32.xlu0 %v1571_v5  ;;  %v6306_v5 = vmul.f32 0.0625, %v8969_v1  ;;  %v1634_v1 = vmul.f32 0.0625, %v5884_v31  ;;  %v8972_v31 = vld [vmem:[#allocation29_spill] sm:$0xff] }
 0x243   :  { %1303 = vadd.xlane.f32.xlu1 %v1302_v38  ;;  %v1257_v38 = vsel %vm1121_vm1, %v6293_v62, 0.0  ;;  %v1828_v21 = vmax.f32 %v1764_v46, 0.0  ;;  %v987_v23 = vadd.f32 %v8972_v31, %v6056_v33 }
 0x244   :  { %v1698_v9 = vmul.f32 %v6306_v5, %v6306_v5 }
 0x246   :  { %1306 = vadd.xlane.f32.xlu0 %v1305_v45  ;;  %v8970_v45 = vld [vmem:[#allocation33_spill] sm:$0xff]  ;;  %v1762_v46 = vsub.f32 %v1634_v1, %v1698_v9 }
 0x247   :  { %1255 = vadd.xlane.f32.xlu1 %v1254_v4  ;;  %v1051_v28 = vadd.f32 %v8970_v45, %v480_v52  ;;  %v1422_v4 = vmul.f32 %v6283_v24, %v6283_v24  ;;  %v1650_v52 = vmul.f32 0.0625, %v5977_v59  ;;  %v1423_v24 = vmul.f32 %v6293_v62, %v6293_v62  ;;  %v8975_v62 = vld [vmem:[#allocation42_spill] sm:$0xff] }
 0x248   :  { %v1714_v59 = vmul.f32 %v6320_v35, %v6320_v35  ;;  %v6344_v36 = vmul.f32 0.0625, %v8975_v62  ;;  %v1826_v1 = vmax.f32 %v1762_v46, 0.0  ;;  %v1635_v62 = vmul.f32 0.0625, %v5894_v22 }
 0x249   :  { %v6333_v42 = vmax.f32 %v1051_v28, 0.0  ;;  %v8976_v28 = vld [vmem:[#allocation31_spill] sm:$0xff]  ;;  %v1577_v9 = vsel %vm1121_vm1, %v1423_v24, 0.0  ;;  %v1651_v22 = vmul.f32 0.0625, %v5993_v11  ;;  %v8981_v11 = vld [vmem:[#allocation44_spill] sm:$0xff] }
 0x24a   :  { %1258 = vadd.xlane.f32.xlu0 %v1257_v38  ;;  %v8971_v38 = vld [vmem:[#allocation35_spill] sm:$0xff]  ;;  %v1778_v33 = vsub.f32 %v1650_v52, %v1714_v59  ;;  %v990_v31 = vadd.f32 %v8976_v28, %v6058_v16  ;;  %v6359_v52 = vmul.f32 0.0625, %v5962_v32  ;;  %v1699_v24 = vmul.f32 %v6344_v36, %v6344_v36 }
 0x24b   :  { %1623 = vadd.xlane.f32.xlu1 %v1622_v54  ;;  %v1054_v45 = vadd.f32 %v8971_v38, %v485_v40  ;;  %8973 = vst [vmem:[#allocation32_spill] sm:$0xff] %v6333_v42  ;;  %v1574_v54 = vsel %vm1121_vm1, %v1422_v4, 0.0  ;;  %v1892_v40 = vadd.f32 1e-05, %v1828_v21  ;;  %v6341_v38 = vmul.f32 0.0625, %v8974_v50 }
 0x24c   :  { %v6353_v4 = vmax.f32 %v987_v23, 0.0  ;;  %v1308_v21 = vsel %vm1121_vm1, %v6333_v42, 0.0  ;;  %v1842_v46 = vmax.f32 %v1778_v33, 0.0  ;;  %v6373_v59 = vmax.f32 %v990_v31, 0.0 }
 0x24d   :  { %v6348_v55 = vmax.f32 %v1054_v45, 0.0  ;;  %4933 = vrsqrt.f32 %v1892_v40  ;;  %v6363_v16 = vmul.f32 %v6341_v38, %v6341_v38  ;;  %v8979_v45 = vld [vmem:[#allocation43_spill] sm:$0xff]  ;;  %v6378_v40 = vmul.f32 0.0625, %v5937_v17  ;;  %v8982_v17 = vld [vmem:[#allocation45_spill] sm:$0xff] }
 0x24e   :  { %1626 = vadd.xlane.f32.xlu0 %v1625_v25  ;;  %v6350_v25 = vpop.xlane.xlu0 %1530  ;;  %8978 = vst [vmem:[#allocation40_spill] sm:$0xff] %v6353_v4  ;;  %v6368_v23 = vmul.f32 0.0625, %v8979_v45  ;;  %8980 = vst [vmem:[#allocation39_spill] sm:$0xff] %v6373_v59  ;;  %v6381_v50 = vmul.f32 0.0625, %v5967_v51  ;;  %v1260_v28 = vsel %vm1121_vm1, %v6353_v4, 0.0  ;;  %v1440_v33 = vmul.f32 %v6333_v42, %v6333_v42 }
 0x24f   :  { %1575 = vadd.xlane.f32.xlu1 %v1574_v54  ;;  %8977 = vst [vmem:[#allocation38_spill] sm:$0xff] %v6348_v55  ;;  %v6370_v54 = vpop.xlane.xlu1 %1479  ;;  %v1311_v32 = vsel %vm1121_vm1, %v6348_v55, 0.0  ;;  %v1637_v31 = vmul.f32 0.0625, %v8981_v11  ;;  %v1715_v45 = vmul.f32 %v6359_v52, %v6359_v52  ;;  %v6393_v51 = vmul.f32 0.0625, %v8982_v17 }
 0x250   :  { %v1906_v42 = vadd.f32 1e-05, %v1842_v46  ;;  %v1717_v11 = vmul.f32 %v6381_v50, %v6381_v50  ;;  %v1628_v48 = vsel %vm1121_vm1, %v1440_v33, 0.0  ;;  %v1424_v0 = vmul.f32 %v6353_v4, %v6353_v4 }
 0x251   :  { %v1704_v46 = vmul.f32 %v6368_v23, %v6368_v23  ;;  %v1425_v10 = vmul.f32 %v6373_v59, %v6373_v59 }
 0x252   :  { %1578 = vadd.xlane.f32.xlu0 %v1577_v9  ;;  %v1890_v9 = vadd.f32 1e-05, %v1826_v1  ;;  %v6390_v49 = vpop.xlane.xlu0 %1482  ;;  %v1779_v1 = vsub.f32 %v1651_v22, %v1715_v45  ;;  %v1765_v22 = vsub.f32 %v1637_v31, %v6363_v16  ;;  %v1702_v31 = vmul.f32 %v6393_v51, %v6393_v51 }
 0x253   :  { %1309 = vadd.xlane.f32.xlu1 %v1308_v21  ;;  %v1763_v21 = vsub.f32 %v1635_v62, %v1699_v24  ;;  %v1263_v62 = vsel %vm1121_vm1, %v6373_v59, 0.0  ;;  %v1441_v24 = vmul.f32 %v6348_v55, %v6348_v55  ;;  %v6406_v17 = vpop.xlane.xlu1 %1213  ;;  %v1580_v37 = vsel %vm1121_vm1, %v1424_v0, 0.0 }
 0x254   :  { %4935 = vrsqrt.f32 %v1890_v9  ;;  %v1843_v33 = vmax.f32 %v1779_v1, 0.0  ;;  %v6428_v9 = vmul.f32 0.0625, %v6000_v56  ;;  %v1654_v56 = vmul.f32 0.0625, %v6023_v19 }
 0x255   :  { %v1827_v45 = vmax.f32 %v1763_v21, 0.0  ;;  %4937 = vrsqrt.f32 %v1906_v42  ;;  %v1631_v4 = vsel %vm1121_vm1, %v1441_v24, 0.0  ;;  %v8986_v42 = vld [vmem:[#allocation51_spill] sm:$0xff]  ;;  %v6435_v24 = vmul.f32 0.0625, %v6017_v26 }
 0x256   :  { %1312 = vadd.xlane.f32.xlu0 %v1311_v32  ;;  %v8983_v32 = vld [vmem:[#allocation46_spill] sm:$0xff]  ;;  %v6418_v6 = vpop.xlane.xlu0 %1216  ;;  %v1641_v1 = vmul.f32 0.0625, %v8986_v42  ;;  %v1829_v42 = vmax.f32 %v1765_v22, 0.0  ;;  %v1718_v26 = vmul.f32 %v6428_v9, %v6428_v9 }
 0x257   :  { %1261 = vadd.xlane.f32.xlu1 %v1260_v28  ;;  %v1640_v14 = vmul.f32 0.0625, %v8983_v32  ;;  %v1716_v28 = vmul.f32 %v6378_v40, %v6378_v40  ;;  %v8984_v32 = vld [vmem:[#allocation47_spill] sm:$0xff]  ;;  %v6423_v16 = vpop.eup %4933  ;;  %v1719_v19 = vmul.f32 %v6435_v24, %v6435_v24  ;;  %9009 = vst [vmem:[#allocation46_spill] sm:$0xff] %v6536_v44 }
 0x258   :  { %v6415_v55 = vmul.f32 0.0625, %v8984_v32  ;;  %v1583_v32 = vsel %vm1121_vm1, %v1425_v10, 0.0  ;;  %v1782_v10 = vsub.f32 %v1654_v56, %v1718_v26 }
 0x259   :  { %v1780_v3 = vsub.f32 %v1652_v29, %v1716_v28  ;;  %v1768_v21 = vsub.f32 %v1640_v14, %v1704_v46  ;;  %v1891_v29 = vadd.f32 1e-05, %v1827_v45  ;;  %v1766_v28 = vsub.f32 %v1638_v13, %v1702_v31  ;;  %v8988_v31 = vld [vmem:[#allocation53_spill] sm:$0xff] }
 0x25a   :  { %1264 = vadd.xlane.f32.xlu0 %v1263_v62  ;;  %v1781_v62 = vsub.f32 %v1653_v30, %v1717_v11  ;;  %v1705_v30 = vmul.f32 %v6415_v55, %v6415_v55  ;;  %v8987_v11 = vld [vmem:[#allocation49_spill] sm:$0xff]  ;;  %v1907_v46 = vadd.f32 1e-05, %v1843_v33  ;;  %v1655_v45 = vmul.f32 0.0625, %v6033_v18  ;;  %v8989_v18 = vld [vmem:[#allocation63_spill] sm:$0xff] }
 0x25b   :  { %1629 = vadd.xlane.f32.xlu1 %v1628_v48  ;;  %v6438_v48 = vmul.f32 0.0625, %v8987_v11  ;;  %v1844_v14 = vmax.f32 %v1780_v3, 0.0  ;;  %v1832_v59 = vmax.f32 %v1768_v21, 0.0  ;;  %4939 = vrsqrt.f32 %v1891_v29 }
 0x25c   :  { %v1845_v0 = vmax.f32 %v1781_v62, 0.0  ;;  %v1769_v13 = vsub.f32 %v1641_v1, %v1705_v30  ;;  %v1639_v3 = vmul.f32 0.0625, %v8988_v31  ;;  %v1830_v62 = vmax.f32 %v1766_v28, 0.0 }
 0x25d   :  { %v1908_v33 = vadd.f32 1e-05, %v1844_v14  ;;  %v6453_v11 = vmul.f32 0.0625, %v8989_v18  ;;  %v1703_v22 = vmul.f32 %v6438_v48, %v6438_v48  ;;  %4941 = vrsqrt.f32 %v1907_v46  ;;  %v8991_v14 = vld [vmem:[#allocation65_spill] sm:$0xff] }
 0x25e   :  { %1632 = vadd.xlane.f32.xlu0 %v1631_v4  ;;  %v6441_v4 = vpop.xlane.xlu1 %1165  ;;  %v1909_v21 = vadd.f32 1e-05, %v1845_v0  ;;  %v1783_v29 = vsub.f32 %v1655_v45, %v1719_v19  ;;  %v4936_v30 = vpop.eup %4935  ;;  %v1893_v1 = vadd.f32 1e-05, %v1829_v42  ;;  %v1833_v57 = vmax.f32 %v1769_v13, 0.0  ;;  %v8992_v45 = vld [vmem:[#allocation68_spill] sm:$0xff] }
 0x25f   :  { %1581 = vadd.xlane.f32.xlu1 %v1580_v37  ;;  %v6450_v37 = vpop.xlane.xlu0 %1168  ;;  %v4938_v12 = vpop.eup %4937  ;;  %v1767_v28 = vsub.f32 %v1639_v3, %v1703_v22  ;;  %v6461_v20 = vmul.f32 0.0625, %v8991_v14  ;;  %v1894_v18 = vadd.f32 1e-05, %v1830_v62  ;;  %4943 = vrsqrt.f32 %v1908_v33  ;;  %v6474_v62 = vld [vmem:[%s8702_s2 + $0x80] sm:$0xff] }
 0x260   :  { %v1720_v56 = vmul.f32 %v6453_v11, %v6453_v11  ;;  %v1846_v0 = vmax.f32 %v1782_v10, 0.0  ;;  %v1896_v46 = vadd.f32 1e-05, %v1832_v59  ;;  %4945 = vrsqrt.f32 %v1909_v21  ;;  %8994 = vst [vmem:[#allocation33_spill] sm:$0xff] %v6474_v62  ;;  %v6484_v21 = vld [vmem:[%s8702_s2] sm:$0xff] }
 0x261   :  { %v1657_v42 = vmul.f32 0.0625, %v8992_v45  ;;  %v1847_v26 = vmax.f32 %v1783_v29, 0.0  ;;  %4947 = vrsqrt.f32 %v1893_v1  ;;  %v6477_v33 = vmul.f32 %v6474_v62, %v4938_v12  ;;  %8996 = vst [vmem:[#allocation29_spill] sm:$0xff] %v6484_v21  ;;  %v8998_v1 = vld [vmem:[#allocation55_spill] sm:$0xff] }
 0x262   :  { %1584 = vadd.xlane.f32.xlu0 %v1583_v32  ;;  %v8990_v32 = vld [vmem:[#allocation67_spill] sm:$0xff]  ;;  %v6458_v47 = vpop.xlane.xlu1 %1533  ;;  %v1897_v59 = vadd.f32 1e-05, %v1833_v57  ;;  %v1831_v10 = vmax.f32 %v1767_v28, 0.0  ;;  %v1721_v22 = vmul.f32 %v6461_v20, %v6461_v20  ;;  %v6487_v29 = vmul.f32 %v6484_v21, %v4936_v30 }
 0x263   :  { %v1656_v31 = vmul.f32 0.0625, %v8990_v32  ;;  %v6466_v19 = vpop.xlane.xlu0 %1536  ;;  %v8993_v32 = vld [vmem:[#allocation52_spill] sm:$0xff]  ;;  %8995 = vst [vmem:[#allocation35_spill] sm:$0xff] %v6477_v33  ;;  %4949 = vrsqrt.f32 %v1894_v18  ;;  %v1910_v14 = vadd.f32 1e-05, %v1846_v0  ;;  %v6495_v45 = vld [vmem:[%s8702_s2 + $0x10] sm:$0xff] }
 0x264   :  { %v6469_v13 = vmul.f32 0.0625, %v8993_v32  ;;  %8997 = vst [vmem:[#allocation41_spill] sm:$0xff] %v6487_v29  ;;  %4951 = vrsqrt.f32 %v1896_v46  ;;  %v1785_v57 = vsub.f32 %v1657_v42, %v1721_v22  ;;  %v1911_v28 = vadd.f32 1e-05, %v1847_v26  ;;  %8999 = vst [vmem:[#allocation42_spill] sm:$0xff] %v6495_v45  ;;  %v9001_v0 = vld [vmem:[#allocation70_spill] sm:$0xff] }
 0x265   :  { %v1784_v3 = vsub.f32 %v1656_v31, %v1720_v56  ;;  %v1642_v31 = vmul.f32 0.0625, %v8998_v1  ;;  %v4940_v12 = vpop.eup %4939  ;;  %v6499_v32 = vmul.f32 %v6495_v45, %v6423_v16  ;;  %v6504_v1 = vmul.f32 0.0625, %v9001_v0  ;;  %v9002_v22 = vld [vmem:[#allocation73_spill] sm:$0xff] }
 0x266   :  { %v6490_v56 = vpop.xlane.xlu1 %1485  ;;  %v1706_v30 = vmul.f32 %v6469_v13, %v6469_v13  ;;  %v2098_v46 = vmul.f32 %v6477_v33, %v6320_v35  ;;  %4953 = vrsqrt.f32 %v1897_v59  ;;  %v1895_v26 = vadd.f32 1e-05, %v1831_v10  ;;  %v6522_v35 = vld [vmem:[%s8702_s2 + $0x8] sm:$0xff]  ;;  %v9007_v10 = vld [vmem:[#allocation56_spill] sm:$0xff] }
 0x267   :  { %9000 = vst [vmem:[#allocation31_spill] sm:$0xff] %v6499_v32  ;;  %v1848_v18 = vmax.f32 %v1784_v3, 0.0  ;;  %v4942_v42 = vpop.eup %4941  ;;  %v6509_v53 = vmul.f32 0.0625, %v9002_v22  ;;  %v6511_v41 = vpop.xlane.xlu0 %1488  ;;  %v2082_v16 = vmul.f32 %v6487_v29, %v6306_v5  ;;  %4955 = vrsqrt.f32 %v1910_v14  ;;  %v9003_v3 = vld [vmem:[#allocation72_spill] sm:$0xff]  ;;  %9005 = vst [vmem:[#allocation44_spill] sm:$0xff] %v6522_v35 }
 0x268   :  { %v1770_v7 = vsub.f32 %v1642_v31, %v1706_v30  ;;  %v1658_v15 = vmul.f32 0.0625, %v9003_v3  ;;  %v6525_v59 = vmul.f32 %v6522_v35, %v4940_v12  ;;  %v6528_v22 = vmul.f32 0.0625, %v9007_v10  ;;  %v9008_v31 = vld [vmem:[#allocation75_spill] sm:$0xff]  ;;  %v9010_v10 = vld [vmem:[#allocation50_spill] sm:$0xff] }
 0x269   :  { %v1849_v5 = vmax.f32 %v1785_v57, 0.0  ;;  %4957 = vrsqrt.f32 %v1911_v28  ;;  %v1659_v14 = vmul.f32 0.0625, %v9008_v31  ;;  %v4944_v30 = vpop.eup %4943  ;;  %v1912_v3 = vadd.f32 1e-05, %v1848_v18  ;;  %v9011_v57 = vld [vmem:[#allocation58_spill] sm:$0xff] }
 0x26a   :  { %9006 = vst [vmem:[#allocation45_spill] sm:$0xff] %v6525_v59  ;;  %v6539_v12 = vmul.f32 %v6536_v44, %v4942_v42  ;;  %v4946_v33 = vpop.eup %4945  ;;  %v6542_v45 = vmul.f32 0.0625, %v9010_v10  ;;  %4959 = vrsqrt.f32 %v1895_v26  ;;  %v1643_v28 = vmul.f32 0.0625, %v9011_v57 }
 0x26b   :  { %v1723_v18 = vmul.f32 %v6509_v53, %v6509_v53  ;;  %v8783_v35 = vmov 2   ;;  %v4948_v21 = vpop.eup %4947  ;;  %v1834_v62 = vmax.f32 %v1770_v7, 0.0  ;;  %v2083_v26 = vmul.f32 %v6525_v59, %v6344_v36  ;;  %v6564_v7 = vld [vmem:[%s8702_s2 + $0x90] sm:$0xff] }
 0x26c   :  { %4802 = vset.pattern.permute.xlu0 %v8783_v35  ;;  %v6557_v10 = vmul.f32 %v6499_v32, %v6286_v39  ;;  %v1707_v57 = vmul.f32 %v6528_v22, %v6528_v22  ;;  %v1913_v44 = vadd.f32 1e-05, %v1849_v5  ;;  %9014 = vst [vmem:[#allocation51_spill] sm:$0xff] %v6564_v7  ;;  %4961 = vrsqrt.f32 %v1912_v3  ;;  %v9016_v36 = vld [vmem:[#allocation71_spill] sm:$0xff]  ;;  %v9019_v35 = vld [vmem:[#allocation69_spill] sm:$0xff] }
 0x26d   :  { %v2099_v39 = vmul.f32 %v6539_v12, %v6359_v52  ;;  %v6577_v5 = vld [vmem:[%s8702_s2 + $0x98] sm:$0xff]  ;;  %v1660_v29 = vmul.f32 0.0625, %v6249_v2 }
 0x26e   :  { %9017 = vst [vmem:[#allocation53_spill] sm:$0xff] %v6577_v5  ;;  %v1771_v3 = vsub.f32 %v1643_v28, %v1707_v57  ;;  %v6594_v52 = vld [vmem:[%s8702_s2 + $0x18] sm:$0xff]  ;;  %v1661_v28 = vmul.f32 0.0625, %v6255_v43  ;;  %4963 = vrsqrt.f32 %v1913_v44 }
 0x26f   :  { %9021 = vst [vmem:[#allocation65_spill] sm:$0xff] %v6594_v52 }
 0x270   :  { %v6516_v0 = vpop.xlane.xlu1 %1267  ;;  %2242 = vrot.lane.b32.xlu1 %v2098_v46, %s5211_s24  ;;  %v1722_v46 = vmul.f32 %v6504_v1, %v6504_v1 }
 0x271   :  { %9004 = vst [vmem:[#allocation43_spill] sm:$0xff] %v6516_v0 }
 0x272   :  { %v1786_v0 = vsub.f32 %v1658_v15, %v1722_v46  ;;  %v6567_v15 = vmul.f32 %v6564_v7, %v4944_v30  ;;  %v6570_v46 = vmul.f32 0.0625, %v9016_v36  ;;  %v6584_v30 = vmul.f32 %v6542_v45, %v6542_v45 }
 0x273   :  { %v6547_v31 = vpop.xlane.xlu0 %1270  ;;  %v6587_v36 = vmul.f32 0.0625, %v9019_v35  ;;  %v6597_v7 = vmul.f32 %v6594_v52, %v4948_v21 }
 0x274   :  { %9012 = vst [vmem:[#allocation47_spill] sm:$0xff] %v6547_v31  ;;  %v6550_v42 = vpop.xlane.xlu1 %1219  ;;  %2210 = vrot.lane.b32.xlu1 %v2082_v16, %s5211_s24  ;;  %v1787_v31 = vsub.f32 %v1659_v14, %v1723_v18  ;;  %9015 = vst [vmem:[#allocation49_spill] sm:$0xff] %v6567_v15  ;;  %v4950_v16 = vpop.eup %4949  ;;  %v6580_v14 = vmul.f32 %v6577_v5, %v4946_v33  ;;  %v1898_v33 = vadd.f32 1e-05, %v1834_v62  ;;  %v1850_v32 = vmax.f32 %v1786_v0, 0.0  ;;  %v9023_v5 = vld [vmem:[#allocation74_spill] sm:$0xff] }
 0x275   :  { %9013 = vst [vmem:[#allocation48_spill] sm:$0xff] %v6550_v42  ;;  %v4952_v18 = vpop.eup %4951  ;;  %9022 = vst [vmem:[#allocation68_spill] sm:$0xff] %v6597_v7  ;;  %v6600_v42 = vmul.f32 0.0625, %v9023_v5  ;;  %v6611_v62 = vld [vmem:[%s8702_s2 + $0x20] sm:$0xff]  ;;  %v1725_v0 = vmul.f32 %v6570_v46, %v6570_v46  ;;  %v2100_v2 = vmul.f32 %v6567_v15, %v6378_v40  ;;  %v1724_v5 = vmul.f32 %v6587_v36, %v6587_v36 }
 0x276   :  { %9018 = vst [vmem:[#allocation63_spill] sm:$0xff] %v6580_v14  ;;  %v4954_v35 = vpop.eup %4953  ;;  %9025 = vst [vmem:[#allocation55_spill] sm:$0xff] %v6611_v62  ;;  %v6614_v21 = vmul.f32 %v6611_v62, %v4950_v16  ;;  %v2101_v44 = vmul.f32 %v6580_v14, %v6381_v50  ;;  %v1644_v16 = vmul.f32 0.0625, %v6265_v8  ;;  %v2085_v62 = vmul.f32 %v6597_v7, %v6341_v38  ;;  %v6639_v8 = vld [vmem:[%s8702_s2 + $0x30] sm:$0xff] }
 0x277   :  { %v6589_v59 = vpop.xlane.xlu0 %1222  ;;  %v4956_v43 = vpop.eup %4955  ;;  %v1789_v50 = vsub.f32 %v1661_v28, %v1725_v0  ;;  %v6642_v40 = vmul.f32 %v6639_v8, %v4952_v18  ;;  %4965 = vrsqrt.f32 %v1898_v33  ;;  %v6647_v28 = vld [vmem:[%s8702_s2 + $0xa0] sm:$0xff]  ;;  %v6658_v18 = vld [vmem:[%s8702_s2 + $0xa8] sm:$0xff] }
 0x278   :  { %9020 = vst [vmem:[#allocation67_spill] sm:$0xff] %v6589_v59  ;;  %v6603_v57 = vpop.xlane.xlu1 %1587  ;;  %2212 = vrot.lane.b32.xlu1 %v2083_v26, %s5211_s24  ;;  %2244 = vrot.lane.b32.xlu0 %v2099_v39, %s5211_s24  ;;  %v1851_v59 = vmax.f32 %v1787_v31, 0.0  ;;  %v1645_v26 = vmul.f32 0.0625, %v6276_v61  ;;  %v4958_v31 = vpop.eup %4957  ;;  %v1835_v39 = vmax.f32 %v1771_v3, 0.0  ;;  %v1709_v61 = vmul.f32 %v6600_v42, %v6600_v42  ;;  %9026 = vst [vmem:[#allocation70_spill] sm:$0xff] %v6647_v28 }
 0x279   :  { %9024 = vst [vmem:[#allocation52_spill] sm:$0xff] %v6603_v57  ;;  %v1914_v57 = vadd.f32 1e-05, %v1850_v32  ;;  %v4960_v38 = vpop.eup %4959  ;;  %v1788_v3 = vsub.f32 %v1660_v29, %v1724_v5  ;;  %v6650_v0 = vmul.f32 %v6647_v28, %v4956_v43  ;;  %v2086_v29 = vmul.f32 %v6614_v21, %v6393_v51 }
 0x27a   :  { %v1915_v32 = vadd.f32 1e-05, %v1851_v59  ;;  %v6661_v59 = vmul.f32 %v6658_v18, %v4958_v31  ;;  %v1899_v33 = vadd.f32 1e-05, %v1835_v39  ;;  %v1772_v5 = vsub.f32 %v1644_v16, %v6584_v30  ;;  %v4962_v31 = vpop.eup %4961 }
 0x27b   :  { %v6626_v52 = vpop.xlane.xlu0 %1590  ;;  %9027 = vst [vmem:[#allocation73_spill] sm:$0xff] %v6650_v0  ;;  %v6667_v43 = vmul.f32 0.0625, %v6288_v27  ;;  %4967 = vrsqrt.f32 %v1914_v57  ;;  %v1853_v7 = vmax.f32 %v1789_v50, 0.0  ;;  %v1663_v51 = vmul.f32 0.0625, %v6350_v25  ;;  %v6688_v27 = vld [vmem:[%s8702_s2 + $0x28] sm:$0xff]  ;;  %v4964_v15 = vpop.eup %4963 }
 0x27c   :  { %v6632_v14 = vpop.xlane.xlu1 %1539  ;;  %2248 = vrot.lane.b32.xlu1 %v2101_v44, %s5211_s24  ;;  %2246 = vrot.lane.b32.xlu0 %v2100_v2, %s5211_s24  ;;  %v1773_v44 = vsub.f32 %v1645_v26, %v1709_v61  ;;  %v6653_v2 = vmul.f32 0.0625, %v6295_v34  ;;  %v6674_v34 = vld [vmem:[%s8702_s2 + $0x38] sm:$0xff]  ;;  %9030 = vst [vmem:[#allocation75_spill] sm:$0xff] %v6688_v27  ;;  %v6691_v30 = vmul.f32 %v6688_v27, %v4960_v38  ;;  %4969 = vrsqrt.f32 %v1915_v32 }
 0x27d   :  { %9028 = vst [vmem:[#allocation72_spill] sm:$0xff] %v6674_v34  ;;  %v6677_v61 = vmul.f32 %v6674_v34, %v4954_v35  ;;  %v1852_v57 = vmax.f32 %v1788_v3, 0.0  ;;  %v1662_v35 = vmul.f32 0.0625, %v6335_v60  ;;  %v2102_v25 = vmul.f32 %v6650_v0, %v6428_v9  ;;  %v6713_v9 = vld [vmem:[%s8702_s2 + $0xb0] sm:$0xff] }
 0x27e   :  { %9031 = vst [vmem:[#allocation50_spill] sm:$0xff] %v6691_v30  ;;  %v1837_v16 = vmax.f32 %v1773_v44, 0.0  ;;  %v2103_v50 = vmul.f32 %v6661_v59, %v6435_v24  ;;  %v1836_v38 = vmax.f32 %v1772_v5, 0.0  ;;  %v1726_v32 = vmul.f32 %v6667_v43, %v6667_v43  ;;  %9032 = vst [vmem:[#allocation58_spill] sm:$0xff] %v6713_v9 }
 0x27f   :  { %v6669_v26 = vpop.xlane.xlu0 %1542  ;;  %9029 = vst [vmem:[#allocation56_spill] sm:$0xff] %v6677_v61  ;;  %v6706_v60 = vmul.f32 0.0625, %v6308_v58  ;;  %4971 = vrsqrt.f32 %v1899_v33  ;;  %v1917_v24 = vadd.f32 1e-05, %v1853_v7  ;;  %v1647_v5 = vmul.f32 0.0625, %v6390_v49  ;;  %v6734_v49 = vld [vmem:[%s8702_s2 + $0xb8] sm:$0xff] }
 0x280   :  { %v6680_v39 = vpop.xlane.xlu1 %1273  ;;  %2216 = vrot.lane.b32.xlu1 %v2085_v62, %s5211_s24  ;;  %2214 = vrot.lane.b32.xlu0 %v6557_v10, %s5211_s24  ;;  %v1727_v62 = vmul.f32 %v6653_v2, %v6653_v2  ;;  %v6699_v10 = vmul.f32 0.0625, %v6322_v63  ;;  %v6716_v63 = vmul.f32 %v6713_v9, %v4962_v31  ;;  %v1916_v58 = vadd.f32 1e-05, %v1852_v57 }
 0x281   :  { %v1790_v34 = vsub.f32 %v1662_v35, %v1726_v32  ;;  %v1646_v27 = vmul.f32 0.0625, %v6370_v54  ;;  %v2087_v28 = vmul.f32 %v6691_v30, %v6438_v48  ;;  %v1901_v31 = vadd.f32 1e-05, %v1837_v16  ;;  %v6739_v57 = vpop.eup %4965 }
 0x282   :  { %9033 = vst [vmem:[#allocation71_spill] sm:$0xff] %v6716_v63  ;;  %v1791_v44 = vsub.f32 %v1663_v51, %v1727_v62  ;;  %v1711_v7 = vmul.f32 %v6699_v10, %v6699_v10  ;;  %v6729_v33 = vmul.f32 0.0625, %v6418_v6  ;;  %v6737_v51 = vmul.f32 %v6734_v49, %v4964_v15 }
 0x283   :  { %v6708_v3 = vpop.xlane.xlu0 %1276  ;;  %v1900_v54 = vadd.f32 1e-05, %v1836_v38  ;;  %v1710_v48 = vmul.f32 %v6706_v60, %v6706_v60  ;;  %v6744_v35 = vmul.f32 0.0625, %v6406_v17  ;;  %v2104_v6 = vmul.f32 %v6716_v63, %v6453_v11 }
 0x284   :  { %v6719_v0 = vpop.xlane.xlu1 %1225  ;;  %2252 = vrot.lane.b32.xlu1 %v2103_v50, %s5211_s24  ;;  %2250 = vrot.lane.b32.xlu0 %v2102_v25, %s5211_s24  ;;  %4973 = vrsqrt.f32 %v1917_v24  ;;  %v1855_v16 = vmax.f32 %v1791_v44, 0.0  ;;  %v1775_v62 = vsub.f32 %v1647_v5, %v1711_v7  ;;  %v1665_v15 = vmul.f32 0.0625, %v6466_v19 }
 0x285   :  { %4975 = vrsqrt.f32 %v1916_v58  ;;  %v1854_v38 = vmax.f32 %v1790_v34, 0.0  ;;  %v1774_v17 = vsub.f32 %v1646_v27, %v1710_v48  ;;  %v1664_v32 = vmul.f32 0.0625, %v6458_v47  ;;  %v4968_v30 = vpop.eup %4967 }
 0x286   :  { %4977 = vrsqrt.f32 %v1901_v31  ;;  %v1729_v11 = vmul.f32 %v6729_v33, %v6729_v33  ;;  %v6759_v24 = vmul.f32 0.0625, %v6450_v37  ;;  %v2105_v19 = vmul.f32 %v6737_v51, %v6461_v20  ;;  %v4970_v44 = vpop.eup %4969 }
 0x287   :  { %v6746_v25 = vpop.xlane.xlu0 %1228  ;;  %4979 = vrsqrt.f32 %v1900_v54  ;;  %v2088_v34 = vmul.f32 %v6642_v40, %v6368_v23  ;;  %v1919_v27 = vadd.f32 1e-05, %v1855_v16  ;;  %v1839_v5 = vmax.f32 %v1775_v62, 0.0 }
 0x288   :  { %v6751_v50 = vpop.xlane.xlu1 %1593  ;;  %2220 = vrot.lane.b32.xlu1 %v2087_v28, %s5211_s24  ;;  %2218 = vrot.lane.b32.xlu0 %v2086_v29, %s5211_s24  ;;  %v1728_v28 = vmul.f32 %v6744_v35, %v6744_v35  ;;  %v6766_v29 = vmul.f32 0.0625, %v6441_v4  ;;  %v1793_v37 = vsub.f32 %v1665_v15, %v1729_v11  ;;  %v1649_v58 = vmul.f32 0.0625, %v6511_v41  ;;  %v6785_v41 = vld [vmem:[%s8702_s2 + $0xc8] sm:$0xff] }
 0x289   :  { %v1918_v20 = vadd.f32 1e-05, %v1854_v38  ;;  %v1838_v7 = vmax.f32 %v1774_v17, 0.0  ;;  %v1648_v54 = vmul.f32 0.0625, %v6490_v56  ;;  %v4972_v48 = vpop.eup %4971  ;;  %v1713_v23 = vmul.f32 %v6759_v24, %v6759_v24 }
 0x28a   :  { %v1792_v4 = vsub.f32 %v1664_v32, %v1728_v28  ;;  %v2089_v16 = vmul.f32 %v6677_v61, %v6415_v55  ;;  %v6788_v62 = vmul.f32 %v6785_v41, %v4970_v44  ;;  %v1712_v15 = vmul.f32 %v6766_v29, %v6766_v29 }
 0x28b   :  { %v6768_v47 = vpop.xlane.xlu0 %1596  ;;  %4981 = vrsqrt.f32 %v1919_v27  ;;  %v1903_v38 = vadd.f32 1e-05, %v1839_v5  ;;  %v1857_v17 = vmax.f32 %v1793_v37, 0.0  ;;  %v1777_v32 = vsub.f32 %v1649_v58, %v1713_v23  ;;  %v6813_v5 = vld [vmem:[%s8702_s2 + $0x48] sm:$0xff] }
 0x28c   :  { %v6773_v31 = vpop.xlane.xlu1 %1545  ;;  %2256 = vrot.lane.b32.xlu1 %v2105_v19, %s5211_s24  ;;  %2254 = vrot.lane.b32.xlu0 %v2104_v6, %s5211_s24  ;;  %9034 = vst [vmem:[#allocation69_spill] sm:$0xff] %v6788_v62  ;;  %v6793_v6 = vld [vmem:[%s8702_s2 + $0xc0] sm:$0xff]  ;;  %4983 = vrsqrt.f32 %v1918_v20  ;;  %v1902_v19 = vadd.f32 1e-05, %v1838_v7  ;;  %v1856_v44 = vmax.f32 %v1792_v4, 0.0  ;;  %v2107_v61 = vmul.f32 %v6788_v62, %v6509_v53  ;;  %9037 = vst [vmem:[#allocation101_spill] sm:$0xff] %v6813_v5 }
 0x28d   :  { %9035 = vst [vmem:[#allocation74_spill] sm:$0xff] %v6793_v6  ;;  %v6796_v56 = vmul.f32 %v6793_v6, %v4968_v30  ;;  %v1776_v30 = vsub.f32 %v1648_v54, %v1712_v15  ;;  %v6816_v37 = vmul.f32 %v6813_v5, %v4972_v48  ;;  %4985 = vrsqrt.f32 %v1903_v38  ;;  %v6840_v38 = vld [vmem:[%s8702_s2 + $0xd8] sm:$0xff] }
 0x28e   :  { %v4974_v28 = vpop.eup %4973  ;;  %v1921_v7 = vadd.f32 1e-05, %v1857_v17  ;;  %v1841_v4 = vmax.f32 %v1777_v32, 0.0  ;;  %4987 = vrsqrt.f32 %v1902_v19  ;;  %v1920_v23 = vadd.f32 1e-05, %v1856_v44 }
 0x28f   :  { %9036 = vst [vmem:[#allocation100_spill] sm:$0xff] %v6796_v56  ;;  %v6800_v55 = vpop.xlane.xlu0 %1548  ;;  %v2106_v27 = vmul.f32 %v6796_v56, %v6504_v1  ;;  %9038 = vst [vmem:[#allocation102_spill] sm:$0xff] %v6816_v37  ;;  %v4976_v53 = vpop.eup %4975  ;;  %v6843_v17 = vmul.f32 %v6840_v38, %v4974_v28 }
 0x290   :  { %v6802_v11 = vpop.xlane.xlu1 %1279  ;;  %2224 = vrot.lane.b32.xlu1 %v2089_v16, %s5211_s24  ;;  %2222 = vrot.lane.b32.xlu0 %v2088_v34, %s5211_s24  ;;  %v6821_v34 = vld [vmem:[%s8702_s2 + $0x40] sm:$0xff]  ;;  %v4978_v1 = vpop.eup %4977  ;;  %v1840_v16 = vmax.f32 %v1776_v30, 0.0  ;;  %4989 = vrsqrt.f32 %v1921_v7 }
 0x291   :  { %v6825_v58 = vmul.f32 %v6821_v34, %v6739_v57  ;;  %v4980_v48 = vpop.eup %4979  ;;  %v2091_v57 = vmul.f32 %v6816_v37, %v6528_v22  ;;  %9040 = vst [vmem:[#allocation104_spill] sm:$0xff] %v6843_v17  ;;  %4991 = vrsqrt.f32 %v1920_v23  ;;  %v2109_v28 = vmul.f32 %v6843_v17, %v6570_v46 }
 0x292   :  { %v1904_v44 = vadd.f32 1e-05, %v1840_v16 }
 0x293   :  { %9039 = vst [vmem:[#allocation103_spill] sm:$0xff] %v6825_v58  ;;  %v6827_v20 = vpop.xlane.xlu0 %1282  ;;  %v2090_v15 = vmul.f32 %v6825_v58, %v6469_v13  ;;  %v1905_v13 = vadd.f32 1e-05, %v1841_v4  ;;  %v6874_v4 = vld [vmem:[%s8702_s2 + $0x50] sm:$0xff] }
 0x294   :  { %v6829_v54 = vpop.xlane.xlu1 %1231  ;;  %2260 = vrot.lane.b32.xlu1 %v2107_v61, %s5211_s24  ;;  %2258 = vrot.lane.b32.xlu0 %v2106_v27, %s5211_s24  ;;  %v6848_v61 = vld [vmem:[%s8702_s2 + $0xd0] sm:$0xff]  ;;  %v6877_v23 = vmul.f32 %v6874_v4, %v4980_v48  ;;  %v6892_v48 = vld [vmem:[%s8702_s2 + $0xe8] sm:$0xff] }
 0x295   :  { %9041 = vst [vmem:[#allocation105_spill] sm:$0xff] %v6848_v61  ;;  %v6851_v32 = vmul.f32 %v6848_v61, %v4976_v53  ;;  %v4982_v30 = vpop.eup %4981  ;;  %v6866_v53 = vld [vmem:[%s8702_s2 + $0x58] sm:$0xff]  ;;  %4993 = vrsqrt.f32 %v1905_v13 }
 0x296   :  { %9043 = vst [vmem:[#allocation107_spill] sm:$0xff] %v6866_v53  ;;  %v6869_v7 = vmul.f32 %v6866_v53, %v4978_v1  ;;  %9045 = vst [vmem:[#allocation109_spill] sm:$0xff] %v6877_v23  ;;  %v4984_v46 = vpop.eup %4983  ;;  %4995 = vrsqrt.f32 %v1904_v44  ;;  %v6895_v13 = vmul.f32 %v6892_v48, %v4982_v30 }
 0x297   :  { %9042 = vst [vmem:[#allocation106_spill] sm:$0xff] %v6851_v32  ;;  %v6853_v22 = vpop.xlane.xlu0 %1234  ;;  %v2108_v27 = vmul.f32 %v6851_v32, %v6587_v36  ;;  %v4986_v1 = vpop.eup %4985 }
 0x298   :  { %v6855_v19 = vpop.xlane.xlu1 %1599  ;;  %2228 = vrot.lane.b32.xlu1 %v2091_v57, %s5211_s24  ;;  %2226 = vrot.lane.b32.xlu0 %v2090_v15, %s5211_s24  ;;  %9044 = vst [vmem:[#allocation108_spill] sm:$0xff] %v6869_v7  ;;  %v2093_v57 = vmul.f32 %v6869_v7, %v6600_v42  ;;  %v2092_v15 = vmul.f32 %v6877_v23, %v6542_v45  ;;  %9046 = vst [vmem:[#allocation110_spill] sm:$0xff] %v6895_v13  ;;  %v6920_v7 = vld [vmem:[%s8702_s2 + $0x60] sm:$0xff] }
 0x299   :  { %v2111_v30 = vmul.f32 %v6895_v13, %v6653_v2 }
 0x29b   :  { %v6879_v16 = vpop.xlane.xlu0 %1602 }
 0x29c   :  { %v6881_v36 = vpop.xlane.xlu1 %1551  ;;  %2264 = vrot.lane.b32.xlu1 %v2109_v28, %s5211_s24  ;;  %2262 = vrot.lane.b32.xlu0 %v2108_v27, %s5211_s24  ;;  %v5124_v28 = vld [vmem:[%s8702_s2 + $0xe0] sm:$0xff]  ;;  %v4988_v27 = vpop.eup %4987 }
 0x29d   :  { %v6900_v44 = vmul.f32 %v5124_v28, %v4984_v46  ;;  %v4990_v45 = vpop.eup %4989  ;;  %v5125_v46 = vld [vmem:[%s8702_s2 + $0x68] sm:$0xff] }
 0x29e   :  { %v6915_v28 = vmul.f32 %v5125_v46, %v4986_v1 }
 0x29f   :  { %9047 = vst [vmem:[#allocation111_spill] sm:$0xff] %v6900_v44  ;;  %v6902_v53 = vpop.xlane.xlu0 %1554  ;;  %v2110_v61 = vmul.f32 %v6900_v44, %v6667_v43  ;;  %v6943_v44 = vld [vmem:[%s8702_s2 + $0xf8] sm:$0xff] }
 0x2a0   :  { %v6904_v42 = vpop.xlane.xlu1 %1285  ;;  %2232 = vrot.lane.b32.xlu1 %v2093_v57, %s5211_s24  ;;  %2230 = vrot.lane.b32.xlu0 %v2092_v15, %s5211_s24  ;;  %9048 = vst [vmem:[#allocation112_spill] sm:$0xff] %v6915_v28  ;;  %v6923_v57 = vmul.f32 %v6920_v7, %v4988_v27  ;;  %v4992_v15 = vpop.eup %4991  ;;  %v2095_v1 = vmul.f32 %v6915_v28, %v6699_v10  ;;  %v5127_v27 = vld [vmem:[%s8702_s2 + $0xf0] sm:$0xff]  ;;  %9052 = vst [vmem:[#allocation116_spill] sm:$0xff] %v6943_v44 }
 0x2a1   :  { %v4994_v43 = vpop.eup %4993  ;;  %v6938_v13 = vmul.f32 %v5127_v27, %v4992_v15 }
 0x2a2   :  { %9049 = vst [vmem:[#allocation113_spill] sm:$0xff] %v6923_v57  ;;  %v2094_v46 = vmul.f32 %v6923_v57, %v6706_v60 }
 0x2a3   :  { %v6925_v32 = vpop.xlane.xlu0 %1288  ;;  %9051 = vst [vmem:[#allocation115_spill] sm:$0xff] %v6938_v13  ;;  %v2112_v60 = vmul.f32 %v6938_v13, %v6744_v35 }
 0x2a4   :  { %v6927_v2 = vpop.xlane.xlu1 %1237  ;;  %2268 = vrot.lane.b32.xlu1 %v2111_v30, %s5211_s24  ;;  %2266 = vrot.lane.b32.xlu0 %v2110_v61, %s5211_s24  ;;  %v6946_v61 = vmul.f32 %v6943_v44, %v4990_v45  ;;  %v4996_v30 = vpop.eup %4995  ;;  %v6961_v45 = vld [vmem:[%s8702_s2 + $0x70] sm:$0xff] }
 0x2a5   :  { %9050 = vst [vmem:[#allocation114_spill] sm:$0xff] %v6927_v2  ;;  %9055 = vst [vmem:[#allocation119_spill] sm:$0xff] %v6961_v45  ;;  %v6964_v27 = vmul.f32 %v6961_v45, %v4996_v30 }
 0x2a6   :  { %9053 = vst [vmem:[#allocation117_spill] sm:$0xff] %v6946_v61  ;;  %v2113_v15 = vmul.f32 %v6946_v61, %v6729_v33 }
 0x2a7   :  { %v6948_v23 = vpop.xlane.xlu0 %1240  ;;  %9056 = vst [vmem:[#allocation120_spill] sm:$0xff] %v6964_v27  ;;  %v2096_v33 = vmul.f32 %v6964_v27, %v6766_v29 }
 0x2a8   :  { %9054 = vst [vmem:[#allocation118_spill] sm:$0xff] %v6948_v23  ;;  %v6950_v10 = vpop.xlane.xlu1 %1605  ;;  %2236 = vrot.lane.b32.xlu1 %v2095_v1, %s5211_s24  ;;  %2234 = vrot.lane.b32.xlu0 %v2094_v46, %s5211_s24  ;;  %v5130_v1 = vld [vmem:[%s8702_s2 + $0x78] sm:$0xff]  ;;  %v7069_v23 = vmul.f32 0.0625, %v6827_v20 }
 0x2a9   :  { %v6969_v57 = vmul.f32 %v5130_v1, %v4994_v43 }
 0x2ab   :  { %9057 = vst [vmem:[#allocation121_spill] sm:$0xff] %v6969_v57  ;;  %v6971_v46 = vpop.xlane.xlu0 %1608  ;;  %v2097_v30 = vmul.f32 %v6969_v57, %v6759_v24  ;;  %v9066_v57 = vmov 2  }
 0x2ac   :  { %v6973_v35 = vpop.xlane.xlu1 %1557  ;;  %2270 = vrot.lane.b32.xlu0 %v2112_v60, %s5211_s24  ;;  %2272 = vrot.lane.b32.xlu1 %v2113_v15, %s5211_s24  ;;  %v9064_v15 = vld [vmem:[#allocation41_spill] sm:$0xff] }
 0x2ad   :  { %9058 = vst [vmem:[#allocation122_spill] sm:$0xff] %v6973_v35 }
 0x2af   :  { %v6981_v61 = vpop.xlane.xlu0 %1560 }
 0x2b0   :  { %9059 = vst [vmem:[#allocation123_spill] sm:$0xff] %v6981_v61  ;;  %v6983_v13 = vpop.xlane.xlu1 %1291  ;;  %2238 = vrot.lane.b32.xlu0 %v2096_v33, %s5211_s24  ;;  %2240 = vrot.lane.b32.xlu1 %v2097_v30, %s5211_s24  ;;  %v1666_v61 = vmul.f32 0.0625, %v6632_v14  ;;  %v1667_v14 = vmul.f32 0.0625, %v6669_v26 }
 0x2b1   :  { %9060 = vst [vmem:[#allocation124_spill] sm:$0xff] %v6983_v13 }
 0x2b3   :  { %v6987_v43 = vpop.xlane.xlu0 %1294 }
 0x2b4   :  { %v6989_v1 = vpop.xlane.xlu1 %1243  ;;  %2553 = vperm.xlu1 %4800, %v6539_v12  }
 0x2b5   :  { %9061 = vst [vmem:[#allocation125_spill] sm:$0xff] %v6989_v1 }
 0x2b7   :  { %v6992_v60 = vpop.xlane.xlu0 %1246 }
 0x2b8   :  { %9062 = vst [vmem:[#allocation126_spill] sm:$0xff] %v6992_v60  ;;  %v6994_v29 = vpop.xlane.xlu1 %1611  ;;  %2468 = vperm.xlu1 %4800, %v9064_v15  }
 0x2b9   :  { %9063 = vst [vmem:[#allocation127_spill] sm:$0xff] %v6994_v29 }
 0x2bb   :  { %v6997_v24 = vpop.xlane.xlu0 %1614 }
 0x2bc   :  { %v6999_v27 = vpop.xlane.xlu1 %1563  ;;  %4801 = vset.pattern.permute.xlu1 %v9066_v57 }
 0x2bd   :  { %9065 = vst [vmem:[#allocation41_spill] sm:$0xff] %v6999_v27 }
 0x2bf   :  { %v7002_v33 = vpop.xlane.xlu0 %1566 }
 0x2c0   :  { %9067 = vst [vmem:[#allocation128_spill] sm:$0xff] %v7002_v33  ;;  %v7004_v30 = vpop.xlane.xlu1 %1297 }
 0x2c1   :  { %9068 = vst [vmem:[#allocation129_spill] sm:$0xff] %v7004_v30  ;;  %v9076_v30 = vld [vmem:[#allocation47_spill] sm:$0xff] }
 0x2c2   :  { %v1363_v6 = vmul.f32 0.0625, %v9076_v30  ;;  %v9082_v30 = vld [vmem:[#allocation43_spill] sm:$0xff] }
 0x2c3   :  { %v7006_v28 = vpop.xlane.xlu0 %1300 }
 0x2c4   :  { %v7008_v37 = vpop.xlane.xlu1 %1249 }
 0x2c5   :  { %9069 = vst [vmem:[#allocation130_spill] sm:$0xff] %v7008_v37  ;;  %v1683_v37 = vmul.f32 0.0625, %v6626_v52  ;;  %v7044_v52 = vmul.f32 0.0625, %v9082_v30 }
 0x2c7   :  { %v7010_v12 = vpop.xlane.xlu0 %1252 }
 0x2c8   :  { %9070 = vst [vmem:[#allocation131_spill] sm:$0xff] %v7010_v12  ;;  %v7012_v17 = vpop.xlane.xlu1 %1617 }
 0x2c9   :  { %9071 = vst [vmem:[#allocation132_spill] sm:$0xff] %v7012_v17  ;;  %v1747_v17 = vmul.f32 %v1363_v6, %v1363_v6 }
 0x2cb   :  { %v7014_v56 = vpop.xlane.xlu0 %1620  ;;  %v1811_v1 = vsub.f32 %v1683_v37, %v1747_v17  ;;  %v1685_v37 = vmul.f32 0.0625, %v6768_v47 }
 0x2cc   :  { %v7016_v15 = vpop.xlane.xlu1 %1569 }
 0x2cd   :  { %9072 = vst [vmem:[#allocation133_spill] sm:$0xff] %v7016_v15 }
 0x2cf   :  { %v7018_v5 = vpop.xlane.xlu0 %1572 }
 0x2d0   :  { %9073 = vst [vmem:[#allocation134_spill] sm:$0xff] %v7018_v5  ;;  %v7020_v63 = vpop.xlane.xlu1 %1303  ;;  %v1875_v5 = vmax.f32 %v1811_v1, 0.0 }
 0x2d1   :  { %9074 = vst [vmem:[#allocation135_spill] sm:$0xff] %v7020_v63 }
 0x2d3   :  { %v7022_v60 = vpop.xlane.xlu0 %1306 }
 0x2d4   :  { %v7024_v33 = vpop.xlane.xlu1 %1255 }
 0x2d5   :  { %9075 = vst [vmem:[#allocation136_spill] sm:$0xff] %v7024_v33  ;;  %v7041_v33 = vmul.f32 0.0625, %v6708_v3 }
 0x2d7   :  { %v7028_v27 = vpop.xlane.xlu0 %1258  ;;  %v1749_v1 = vmul.f32 %v7041_v33, %v7041_v33 }
 0x2d8   :  { %9077 = vst [vmem:[#allocation47_spill] sm:$0xff] %v7028_v27  ;;  %v7030_v12 = vpop.xlane.xlu1 %1623  ;;  %v1939_v27 = vadd.f32 1e-05, %v1875_v5 }
 0x2d9   :  { %9078 = vst [vmem:[#allocation137_spill] sm:$0xff] %v7030_v12  ;;  %v9085_v12 = vld [vmem:[#allocation52_spill] sm:$0xff]  ;;  %v1813_v30 = vsub.f32 %v1685_v37, %v1749_v1  ;;  %v9091_v37 = vld [vmem:[#allocation67_spill] sm:$0xff] }
 0x2da   :  { %4997 = vrsqrt.f32 %v1939_v27  ;;  %v7074_v1 = vmul.f32 0.0625, %v9091_v37 }
 0x2db   :  { %v7032_v58 = vpop.xlane.xlu0 %1626 }
 0x2dc   :  { %v7034_v15 = vpop.xlane.xlu1 %1575  ;;  %v1731_v37 = vmul.f32 %v7074_v1, %v7074_v1 }
 0x2dd   :  { %9079 = vst [vmem:[#allocation138_spill] sm:$0xff] %v7034_v15  ;;  %v1682_v15 = vmul.f32 0.0625, %v9085_v12 }
 0x2df   :  { %v7036_v63 = vpop.xlane.xlu0 %1578 }
 0x2e0   :  { %9080 = vst [vmem:[#allocation139_spill] sm:$0xff] %v7036_v63  ;;  %v7038_v29 = vpop.xlane.xlu1 %1309  ;;  %v1746_v63 = vmul.f32 %v7044_v52, %v7044_v52 }
 0x2e1   :  { %9081 = vst [vmem:[#allocation140_spill] sm:$0xff] %v7038_v29 }
 0x2e2   :  { %v1810_v5 = vsub.f32 %v1682_v15, %v1746_v63  ;;  %v1687_v15 = vmul.f32 0.0625, %v6879_v16 }
 0x2e3   :  { %v7046_v62 = vpop.xlane.xlu0 %1312 }
 0x2e4   :  { %9083 = vst [vmem:[#allocation43_spill] sm:$0xff] %v7046_v62  ;;  %v7049_v17 = vpop.xlane.xlu1 %1261  ;;  %v9088_v62 = vld [vmem:[#allocation48_spill] sm:$0xff]  ;;  %v1874_v45 = vmax.f32 %v1810_v5, 0.0 }
 0x2e5   :  { %9084 = vst [vmem:[#allocation141_spill] sm:$0xff] %v7049_v17  ;;  %v7061_v13 = vmul.f32 0.0625, %v9088_v62  ;;  %v1877_v17 = vmax.f32 %v1813_v30, 0.0 }
 0x2e7   :  { %v7056_v3 = vpop.xlane.xlu0 %1264  ;;  %v1730_v27 = vmul.f32 %v7061_v13, %v7061_v13  ;;  %v1941_v62 = vadd.f32 1e-05, %v1877_v17 }
 0x2e8   :  { %9086 = vst [vmem:[#allocation52_spill] sm:$0xff] %v7056_v3  ;;  %v7058_v29 = vpop.xlane.xlu1 %1629  ;;  %v4998_v3 = vpop.eup %4997 }
 0x2e9   :  { %9087 = vst [vmem:[#allocation142_spill] sm:$0xff] %v7058_v29  ;;  %v1794_v5 = vsub.f32 %v1666_v61, %v1730_v27  ;;  %v1751_v29 = vmul.f32 %v7069_v23, %v7069_v23  ;;  %4999 = vrsqrt.f32 %v1941_v62  ;;  %v5131_v61 = vld [vmem:[%s8702_s2 + $0x188] sm:$0xff] }
 0x2ea   :  { %v7089_v26 = vmul.f32 %v5131_v61, %v4998_v3  ;;  %v9095_v27 = vld [vmem:[#allocation29_spill] sm:$0xff]  ;;  %v7097_v3 = vmul.f32 0.0625, %v6925_v32  ;;  %v7105_v32 = vmul.f32 0.0625, %v6680_v39 }
 0x2eb   :  { %v7063_v47 = vpop.xlane.xlu0 %1632  ;;  %v1815_v17 = vsub.f32 %v1687_v15, %v1751_v29  ;;  %v9096_v15 = vld [vmem:[#allocation44_spill] sm:$0xff] }
 0x2ec   :  { %9089 = vst [vmem:[#allocation48_spill] sm:$0xff] %v7063_v47  ;;  %v7065_v12 = vpop.xlane.xlu1 %1581  ;;  %v1938_v47 = vadd.f32 1e-05, %v1874_v45  ;;  %v1858_v45 = vmax.f32 %v1794_v5, 0.0 }
 0x2ed   :  { %9090 = vst [vmem:[#allocation143_spill] sm:$0xff] %v7065_v12  ;;  %v9093_v12 = vld [vmem:[#allocation33_spill] sm:$0xff] }
 0x2ee   :  { %5001 = vrsqrt.f32 %v1938_v47 }
 0x2ef   :  { %v7076_v63 = vpop.xlane.xlu0 %1584 }
 0x2f0   :  { %9092 = vst [vmem:[#allocation67_spill] sm:$0xff] %v7076_v63  ;;  %v2243_v30 = vpop.permute.xlu1 %2242  ;;  %v9094_v63 = vld [vmem:[#allocation46_spill] sm:$0xff] }
 0x2f1   :  { %v2418_v20 = vsub.f32 %v9093_v12, %v2243_v30  ;;  %v1795_v12 = vsub.f32 %v1667_v14, %v1731_v37  ;;  %v9097_v37 = vld [vmem:[#allocation53_spill] sm:$0xff] }
 0x2f3   :  { %2932 = vperm.xlu1 %4801, %v2418_v20   ;;  %v2245_v44 = vpop.permute.xlu0 %2244  ;;  %v1879_v20 = vmax.f32 %v1815_v17, 0.0  ;;  %v1859_v62 = vmax.f32 %v1795_v12, 0.0  ;;  %v9098_v12 = vmov 1  }
 0x2f4   :  { %v2419_v16 = vsub.f32 %v9094_v63, %v2245_v44  ;;  %v2211_v9 = vpop.permute.xlu1 %2210  ;;  %v2131_v44 = vmul.f32 %v7089_v26, %v1363_v6  ;;  %v1922_v63 = vadd.f32 1e-05, %v1858_v45  ;;  %v1753_v6 = vmul.f32 %v7097_v3, %v7097_v3 }
 0x2f5   :  { %v2402_v30 = vsub.f32 %v9095_v27, %v2211_v9  ;;  %v1943_v47 = vadd.f32 1e-05, %v1879_v20  ;;  %v1689_v9 = vmul.f32 0.0625, %v6971_v46  ;;  %v1923_v14 = vadd.f32 1e-05, %v1859_v62  ;;  %v9099_v27 = vld [vmem:[#allocation63_spill] sm:$0xff] }
 0x2f6   :  { %2937 = vperm.xlu0 %4802, %v2419_v16   ;;  %5003 = vrsqrt.f32 %v1922_v63  ;;  %v5000_v16 = vpop.eup %4999  ;;  %v9100_v20 = vld [vmem:[#allocation42_spill] sm:$0xff]  ;;  %v7121_v63 = vld [vmem:[%s8702_s2 + $0x180] sm:$0xff] }
 0x2f7   :  { %2852 = vperm.xlu1 %4801, %v2402_v30   ;;  %v7092_v35 = vpop.permute.xlu0 %2246  ;;  %5005 = vrsqrt.f32 %v1943_v47  ;;  %v1684_v30 = vmul.f32 0.0625, %v6751_v50 }
 0x2f8   :  { %v2213_v29 = vpop.permute.xlu1 %2212  ;;  %v5002_v45 = vpop.eup %5001  ;;  %5007 = vrsqrt.f32 %v1923_v14 }
 0x2f9   :  { %v2403_v2 = vsub.f32 %v9096_v15, %v2213_v29  ;;  %v7124_v62 = vmul.f32 %v7121_v63, %v5002_v45  ;;  %v1748_v15 = vmul.f32 %v7105_v32, %v7105_v32 }
 0x2fa   :  { %2308 = vrot.lane.b32.xlu0 %v2131_v44, %s5211_s24  ;;  %v5132_v44 = vld [vmem:[%s8702_s2 + $0x198] sm:$0xff] }
 0x2fb   :  { %2857 = vperm.xlu1 %4801, %v2403_v2   ;;  %v2215_v61 = vpop.permute.xlu0 %2214  ;;  %v1817_v2 = vsub.f32 %v1689_v9, %v1753_v6  ;;  %v7116_v39 = vmul.f32 %v5132_v44, %v5000_v16  ;;  %v9102_v9 = vld [vmem:[#allocation31_spill] sm:$0xff]  ;;  %v2130_v16 = vmul.f32 %v7124_v62, %v7044_v52 }
 0x2fc   :  { %v2249_v5 = vpop.permute.xlu1 %2248  ;;  %v2404_v29 = vsub.f32 %v9100_v20, %v2215_v61  ;;  %v7140_v61 = vmul.f32 0.0625, %v6719_v0  ;;  %v9103_v20 = vld [vmem:[#allocation51_spill] sm:$0xff] }
 0x2fd   :  { %v2421_v17 = vsub.f32 %v9097_v37, %v2249_v5  ;;  %9101 = vst [vmem:[#allocation33_spill] sm:$0xff] %v7116_v39  ;;  %v1881_v50 = vmax.f32 %v1817_v2, 0.0  ;;  %v1812_v5 = vsub.f32 %v1684_v30, %v1748_v15  ;;  %v2133_v14 = vmul.f32 %v7116_v39, %v7041_v33 }
 0x2fe   :  { %v7134_v37 = vmul.f32 0.0625, %v6987_v43  ;;  %v1691_v2 = vmul.f32 0.0625, %v6997_v24  ;;  %v1668_v30 = vmul.f32 0.0625, %v6773_v31  ;;  %v2420_v0 = vsub.f32 %v9103_v20, %v7092_v35  ;;  %v7154_v24 = vld [vmem:[%s8702_s2 + $0x100] sm:$0xff] }
 0x2ff   :  { %4803 = vset.pattern.permute.xlu1 %v9098_v12  ;;  %2947 = vperm.xlu0 %4802, %v2421_v17   ;;  %v7128_v47 = vpop.permute.xlu0 %2250  ;;  %v1945_v45 = vadd.f32 1e-05, %v1881_v50  ;;  %v1732_v31 = vmul.f32 %v7140_v61, %v7140_v61  ;;  %v7162_v15 = vmul.f32 0.0625, %v6746_v25  ;;  %v1669_v25 = vmul.f32 0.0625, %v6800_v55 }
 0x300   :  { %v7108_v46 = vpop.permute.xlu1 %2216  ;;  %2563 = vperm.xlu1 %4803, %v9099_v27   ;;  %v5004_v6 = vpop.eup %5003  ;;  %v1876_v27 = vmax.f32 %v1812_v5, 0.0  ;;  %v1755_v52 = vmul.f32 %v7134_v37, %v7134_v37  ;;  %v9104_v5 = vld [vmem:[#allocation55_spill] sm:$0xff]  ;;  %v7194_v20 = vmul.f32 0.0625, %v7006_v28 }
 0x301   :  { %v5006_v43 = vpop.eup %5005  ;;  %v7157_v44 = vmul.f32 %v7154_v24, %v5004_v6  ;;  %5009 = vrsqrt.f32 %v1945_v45  ;;  %v1796_v6 = vsub.f32 %v1668_v30, %v1732_v31  ;;  %v1693_v31 = vmul.f32 0.0625, %v7014_v56 }
 0x302   :  { %v1819_v50 = vsub.f32 %v1691_v2, %v1755_v52  ;;  %v7181_v2 = vld [vmem:[%s8702_s2 + $0x108] sm:$0xff]  ;;  %v1757_v28 = vmul.f32 %v7194_v20, %v7194_v20 }
 0x303   :  { %2862 = vperm.xlu0 %4802, %v2404_v29   ;;  %v2219_v29 = vpop.permute.xlu0 %2218  ;;  %v2114_v45 = vmul.f32 %v7157_v44, %v7061_v13  ;;  %v1860_v13 = vmax.f32 %v1796_v6, 0.0 }
 0x304   :  { %2478 = vperm.xlu1 %4803, %v9102_v9   ;;  %v2253_v17 = vpop.permute.xlu1 %2252  ;;  %v1940_v9 = vadd.f32 1e-05, %v1876_v27 }
 0x305   :  { %v2423_v33 = vsub.f32 %v6658_v18, %v2253_v17  ;;  %v5008_v18 = vpop.eup %5007  ;;  %v7170_v17 = vld [vmem:[%s8702_s2 + $0x1a8] sm:$0xff] }
 0x306   :  { %v7184_v27 = vmul.f32 %v7181_v2, %v5008_v18  ;;  %5011 = vrsqrt.f32 %v1940_v9 }
 0x307   :  { %2312 = vrot.lane.b32.xlu0 %v2133_v14, %s5211_s24  ;;  %v2406_v14 = vsub.f32 %v9104_v5, %v2219_v29  ;;  %v7188_v52 = vpop.permute.xlu0 %2254 }
 0x308   :  { %2306 = vrot.lane.b32.xlu1 %v2130_v16, %s5211_s24  ;;  %v7164_v35 = vpop.permute.xlu1 %2220  ;;  %v7173_v16 = vmul.f32 %v7170_v17, %v5006_v43  ;;  %v1883_v43 = vmax.f32 %v1819_v50, 0.0  ;;  %v2115_v29 = vmul.f32 %v7184_v27, %v7074_v1  ;;  %v1821_v1 = vsub.f32 %v1693_v31, %v1757_v28 }
 0x309   :  { %4804 = vset.pattern.permute.xlu1 %v9066_v57 }
 0x30a   :  { %9105 = vst [vmem:[#allocation46_spill] sm:$0xff] %v7173_v16  ;;  %v2135_v55 = vmul.f32 %v7173_v16, %v7069_v23  ;;  %v1947_v18 = vadd.f32 1e-05, %v1883_v43  ;;  %v1924_v23 = vadd.f32 1e-05, %v1860_v13  ;;  %v1885_v13 = vmax.f32 %v1821_v1, 0.0 }
 0x30b   :  { %2957 = vperm.xlu0 %4802, %v2423_v33   ;;  %v1733_v33 = vmul.f32 %v7162_v15, %v7162_v15  ;;  %v5010_v9 = vpop.eup %5009 }
 0x30c   :  { %2942 = vperm.xlu1 %4804, %v2420_v0   ;;  %v2257_v0 = vpop.permute.xlu1 %2256  ;;  %5013 = vrsqrt.f32 %v1947_v18 }
 0x30d   :  { %v1797_v30 = vsub.f32 %v1669_v25, %v1733_v33  ;;  %v2425_v50 = vsub.f32 %v6734_v49, %v2257_v0  ;;  %v2223_v25 = vpop.permute.xlu0 %2222  ;;  %v7212_v49 = vld [vmem:[%s8702_s2 + $0x1b8] sm:$0xff]  ;;  %5015 = vrsqrt.f32 %v1924_v23  ;;  %v1686_v0 = vmul.f32 0.0625, %v6855_v19 }
 0x30e   :  { %v2408_v56 = vsub.f32 %v6639_v8, %v2223_v25  ;;  %v7215_v33 = vmul.f32 %v7212_v49, %v5010_v9  ;;  %v1695_v19 = vmul.f32 0.0625, %v7032_v58  ;;  %v7251_v58 = vmul.f32 0.0625, %v6829_v54  ;;  %v9110_v54 = vld [vmem:[#allocation70_spill] sm:$0xff] }
 0x30f   :  { %2872 = vperm.xlu0 %4802, %v2406_v14   ;;  %v1861_v5 = vmax.f32 %v1797_v30, 0.0  ;;  %v9106_v14 = vld [vmem:[#allocation65_spill] sm:$0xff] }
 0x310   :  { %2274 = vrot.lane.b32.xlu1 %v2114_v45, %s5211_s24  ;;  %v2405_v6 = vsub.f32 %v9106_v14, %v7108_v46  ;;  %v7206_v45 = vpop.permute.xlu1 %2224  ;;  %9107 = vst [vmem:[#allocation29_spill] sm:$0xff] %v7215_v33  ;;  %v5012_v46 = vpop.eup %5011  ;;  %v2137_v8 = vmul.f32 %v7215_v33, %v7097_v3  ;;  %v1949_v3 = vadd.f32 1e-05, %v1885_v13  ;;  %v9166_v33 = vld [vmem:[#allocation108_spill] sm:$0xff] }
 0x311   :  { %v1925_v43 = vadd.f32 1e-05, %v1861_v5  ;;  %v7220_v30 = vpop.permute.xlu0 %2258 }
 0x313   :  { %2316 = vrot.lane.b32.xlu0 %v2135_v55, %s5211_s24  ;;  %v7218_v55 = vmul.f32 0.0625, %v6802_v11  ;;  %5017 = vrsqrt.f32 %v1925_v43  ;;  %v7234_v11 = vld [vmem:[%s8702_s2 + $0x190] sm:$0xff]  ;;  %v2422_v43 = vsub.f32 %v9110_v54, %v7128_v47 }
 0x314   :  { %2276 = vrot.lane.b32.xlu1 %v2115_v29, %s5211_s24  ;;  %v7228_v29 = vmul.f32 0.0625, %v7022_v60  ;;  %v2261_v18 = vpop.permute.xlu1 %2260  ;;  %9108 = vst [vmem:[#allocation44_spill] sm:$0xff] %v7234_v11  ;;  %v7237_v31 = vmul.f32 %v7234_v11, %v5012_v46  ;;  %5019 = vrsqrt.f32 %v1949_v3 }
 0x315   :  { %v2427_v60 = vsub.f32 %v6785_v41, %v2261_v18  ;;  %v2227_v5 = vpop.permute.xlu0 %2226  ;;  %v7258_v41 = vld [vmem:[%s8702_s2 + $0x1c8] sm:$0xff]  ;;  %v1734_v18 = vmul.f32 %v7251_v58, %v7251_v58 }
 0x316   :  { %v1759_v23 = vmul.f32 %v7228_v29, %v7228_v29  ;;  %v2132_v28 = vmul.f32 %v7237_v31, %v7105_v32 }
 0x317   :  { %2967 = vperm.xlu0 %4802, %v2425_v50   ;;  %v5014_v50 = vpop.eup %5013 }
 0x318   :  { %2867 = vperm.xlu1 %4804, %v2405_v6   ;;  %v5016_v14 = vpop.eup %5015  ;;  %v1823_v6 = vsub.f32 %v1695_v19, %v1759_v23  ;;  %v7248_v25 = vpop.permute.xlu1 %2228  ;;  %v7261_v1 = vmul.f32 %v7258_v41, %v5014_v50 }
 0x31a   :  { %9109 = vst [vmem:[#allocation53_spill] sm:$0xff] %v7261_v1  ;;  %v2139_v47 = vmul.f32 %v7261_v1, %v7134_v37 }
 0x31b   :  { %2882 = vperm.xlu0 %4802, %v2408_v56   ;;  %v1670_v56 = vmul.f32 0.0625, %v6881_v36  ;;  %v7280_v36 = vmul.f32 0.0625, %v6853_v22 }
 0x31c   :  { %4805 = vset.pattern.permute.xlu1 %v9098_v12  ;;  %v2265_v3 = vpop.permute.xlu1 %2264 }
 0x31d   :  { %2573 = vperm.xlu1 %4805, %v6661_v59   ;;  %v1750_v59 = vmul.f32 %v7218_v55, %v7218_v55  ;;  %v5018_v13 = vpop.eup %5017  ;;  %v1798_v19 = vsub.f32 %v1670_v56, %v1734_v18  ;;  %v1735_v37 = vmul.f32 %v7280_v36, %v7280_v36 }
 0x31f   :  { %2320 = vrot.lane.b32.xlu0 %v2137_v8, %s5211_s24  ;;  %v1814_v9 = vsub.f32 %v1686_v0, %v1750_v59  ;;  %v1887_v8 = vmax.f32 %v1823_v6, 0.0  ;;  %v7275_v0 = vpop.permute.xlu0 %2262 }
 0x321   :  { %2488 = vperm.xlu1 %4805, %v6614_v21   ;;  %v2410_v21 = vsub.f32 %v6821_v34, %v2227_v5  ;;  %v1878_v32 = vmax.f32 %v1814_v9, 0.0  ;;  %v7270_v34 = vld [vmem:[%s8702_s2 + $0x110] sm:$0xff]  ;;  %v7291_v9 = vld [vmem:[%s8702_s2 + $0x118] sm:$0xff]  ;;  %v1951_v23 = vadd.f32 1e-05, %v1887_v8  ;;  %v2429_v5 = vsub.f32 %v6840_v38, %v2265_v3 }
 0x322   :  { %9111 = vst [vmem:[#allocation63_spill] sm:$0xff] %v7270_v34  ;;  %v7273_v46 = vmul.f32 %v7270_v34, %v5016_v14  ;;  %9113 = vst [vmem:[#allocation31_spill] sm:$0xff] %v7291_v9  ;;  %v7294_v22 = vmul.f32 %v7291_v9, %v5018_v13  ;;  %v7309_v38 = vld [vmem:[%s8702_s2 + $0x1d8] sm:$0xff]  ;;  %v7322_v3 = vmul.f32 0.0625, %v6904_v42 }
 0x323   :  { %2977 = vperm.xlu0 %4802, %v2427_v60   ;;  %v1942_v59 = vadd.f32 1e-05, %v1878_v32  ;;  %v1671_v60 = vmul.f32 0.0625, %v6902_v53  ;;  %v5020_v53 = vpop.eup %5019  ;;  %9114 = vst [vmem:[#allocation51_spill] sm:$0xff] %v7309_v38  ;;  %v9116_v13 = vld [vmem:[#allocation75_spill] sm:$0xff] }
 0x324   :  { %9112 = vst [vmem:[#allocation42_spill] sm:$0xff] %v7273_v46  ;;  %v2116_v50 = vmul.f32 %v7273_v46, %v7140_v61  ;;  %v1862_v61 = vmax.f32 %v1798_v19, 0.0  ;;  %v2117_v6 = vmul.f32 %v7294_v22, %v7162_v15  ;;  %v7312_v56 = vmul.f32 %v7309_v38, %v5020_v53 }
 0x325   :  { %2310 = vrot.lane.b32.xlu1 %v2132_v28, %s5211_s24  ;;  %v2231_v28 = vpop.permute.xlu0 %2230  ;;  %5021 = vrsqrt.f32 %v1942_v59  ;;  %v1799_v14 = vsub.f32 %v1671_v60, %v1735_v37  ;;  %v2407_v15 = vsub.f32 %v9116_v13, %v7164_v35  ;;  %v9122_v13 = vld [vmem:[#allocation58_spill] sm:$0xff] }
 0x326   :  { %4806 = vset.pattern.permute.xlu1 %v9066_v57  ;;  %5023 = vrsqrt.f32 %v1951_v23  ;;  %v2412_v32 = vsub.f32 %v6874_v4, %v2231_v28  ;;  %9115 = vst [vmem:[#allocation55_spill] sm:$0xff] %v7312_v56  ;;  %v1926_v54 = vadd.f32 1e-05, %v1862_v61  ;;  %v2141_v4 = vmul.f32 %v7312_v56, %v7194_v20  ;;  %v7333_v23 = vld [vmem:[%s8702_s2 + $0x1a0] sm:$0xff] }
 0x327   :  { %2892 = vperm.xlu0 %4802, %v2410_v21   ;;  %v7302_v21 = vpop.permute.xlu1 %2232  ;;  %v1688_v20 = vmul.f32 0.0625, %v6950_v10  ;;  %9117 = vst [vmem:[#allocation65_spill] sm:$0xff] %v7333_v23  ;;  %v9154_v56 = vld [vmem:[#allocation101_spill] sm:$0xff] }
 0x328   :  { %5025 = vrsqrt.f32 %v1926_v54 }
 0x329   :  { %2952 = vperm.xlu1 %4806, %v2422_v43   ;;  %v1863_v43 = vmax.f32 %v1799_v14, 0.0  ;;  %v7316_v8 = vpop.permute.xlu0 %2266  ;;  %v9120_v14 = vld [vmem:[#allocation114_spill] sm:$0xff] }
 0x32b   :  { %2324 = vrot.lane.b32.xlu0 %v2139_v47, %s5211_s24  ;;  %v2269_v18 = vpop.permute.xlu1 %2268  ;;  %v1927_v47 = vadd.f32 1e-05, %v1863_v43 }
 0x32c   :  { %v2431_v19 = vsub.f32 %v6892_v48, %v2269_v18  ;;  %v1752_v48 = vmul.f32 %v7322_v3, %v7322_v3  ;;  %v9125_v18 = vld [vmem:[#allocation116_spill] sm:$0xff] }
 0x32d   :  { %2278 = vrot.lane.b32.xlu1 %v2116_v50, %s5211_s24  ;;  %v2235_v60 = vpop.permute.xlu0 %2234  ;;  %5027 = vrsqrt.f32 %v1927_v47 }
 0x32e   :  { %v2414_v37 = vsub.f32 %v6920_v7, %v2235_v60 }
 0x32f   :  { %2987 = vperm.xlu0 %4802, %v2429_v5   ;;  %v5022_v59 = vpop.eup %5021  ;;  %v7328_v50 = vpop.permute.xlu1 %2236  ;;  %v1816_v5 = vsub.f32 %v1688_v20, %v1752_v48  ;;  %v9127_v48 = vld [vmem:[#allocation123_spill] sm:$0xff] }
 0x330   :  { %v5024_v35 = vpop.eup %5023  ;;  %v7336_v42 = vmul.f32 %v7333_v23, %v5022_v59 }
 0x331   :  { %2280 = vrot.lane.b32.xlu1 %v2117_v6, %s5211_s24  ;;  %v7350_v53 = vpop.permute.xlu0 %2270  ;;  %v7357_v6 = vmul.f32 0.0625, %v9120_v14  ;;  %v1880_v54 = vmax.f32 %v1816_v5, 0.0 }
 0x332   :  { %v2134_v28 = vmul.f32 %v7336_v42, %v7218_v55  ;;  %v5026_v61 = vpop.eup %5025  ;;  %v2424_v55 = vsub.f32 %v9122_v13, %v7188_v52 }
 0x333   :  { %2902 = vperm.xlu0 %4802, %v2412_v32   ;;  %v2273_v32 = vpop.permute.xlu1 %2272  ;;  %v1736_v59 = vmul.f32 %v7357_v6, %v7357_v6  ;;  %v1944_v52 = vadd.f32 1e-05, %v1880_v54 }
 0x334   :  { %v2433_v47 = vsub.f32 %v9125_v18, %v2273_v32  ;;  %v9131_v18 = vld [vmem:[#allocation35_spill] sm:$0xff] }
 0x335   :  { %2877 = vperm.xlu1 %4806, %v2407_v15   ;;  %v2239_v60 = vpop.permute.xlu0 %2238  ;;  %5029 = vrsqrt.f32 %v1944_v52 }
 0x337   :  { %2328 = vrot.lane.b32.xlu0 %v2141_v4, %s5211_s24  ;;  %v5028_v4 = vpop.eup %5027 }
 0x339   :  { %4807 = vset.pattern.permute.xlu1 %v9098_v12 }
 0x33a   :  { %2583 = vperm.xlu1 %4807, %v6737_v51   ;;  %v7344_v51 = vld [vmem:[%s8702_s2 + $0x1e8] sm:$0xff] }
 0x33b   :  { %2997 = vperm.xlu0 %4802, %v2431_v19   ;;  %9118 = vst [vmem:[#allocation70_spill] sm:$0xff] %v7344_v51  ;;  %v7347_v10 = vmul.f32 %v7344_v51, %v5024_v35  ;;  %v9126_v19 = vld [vmem:[#allocation118_spill] sm:$0xff] }
 0x33c   :  { %v7377_v35 = vmul.f32 0.0625, %v9126_v19 }
 0x33d   :  { %9119 = vst [vmem:[#allocation75_spill] sm:$0xff] %v7347_v10  ;;  %v2143_v7 = vmul.f32 %v7347_v10, %v7228_v29  ;;  %v7368_v29 = vld [vmem:[%s8702_s2 + $0x120] sm:$0xff] }
 0x33e   :  { %2498 = vperm.xlu1 %4807, %v6642_v40   ;;  %v9121_v40 = vld [vmem:[#allocation122_spill] sm:$0xff]  ;;  %9123 = vst [vmem:[#allocation114_spill] sm:$0xff] %v7368_v29  ;;  %v7371_v15 = vmul.f32 %v7368_v29, %v5026_v61  ;;  %v1737_v32 = vmul.f32 %v7377_v35, %v7377_v35 }
 0x33f   :  { %2912 = vperm.xlu0 %4802, %v2414_v37   ;;  %v1672_v43 = vmul.f32 0.0625, %v9121_v40  ;;  %v1673_v37 = vmul.f32 0.0625, %v9127_v48  ;;  %v5030_v19 = vpop.eup %5029  ;;  %v9173_v29 = vld [vmem:[#allocation134_spill] sm:$0xff] }
 0x340   :  { %9124 = vst [vmem:[#allocation122_spill] sm:$0xff] %v7371_v15  ;;  %v2118_v5 = vmul.f32 %v7371_v15, %v7251_v58  ;;  %v1677_v23 = vmul.f32 0.0625, %v9173_v29  ;;  %v9175_v29 = vld [vmem:[#allocation112_spill] sm:$0xff] }
 0x341   :  { %v1800_v20 = vsub.f32 %v1672_v43, %v1736_v59  ;;  %v1801_v40 = vsub.f32 %v1673_v37, %v1737_v32  ;;  %v9132_v59 = vld [vmem:[#allocation45_spill] sm:$0xff] }
 0x342   :  { %2314 = vrot.lane.b32.xlu1 %v2134_v28, %s5211_s24  ;;  %v7385_v28 = vld [vmem:[%s8702_s2 + $0x128] sm:$0xff] }
 0x343   :  { %2332 = vrot.lane.b32.xlu0 %v2143_v7, %s5211_s24  ;;  %4808 = vset.pattern.permute.xlu1 %v9066_v57  ;;  %9128 = vst [vmem:[#allocation58_spill] sm:$0xff] %v7385_v28  ;;  %v7388_v61 = vmul.f32 %v7385_v28, %v5028_v4  ;;  %v9129_v7 = vld [vmem:[#allocation119_spill] sm:$0xff]  ;;  %v1864_v54 = vmax.f32 %v1800_v20, 0.0  ;;  %v1865_v13 = vmax.f32 %v1801_v40, 0.0  ;;  %v9136_v37 = vld [vmem:[#allocation49_spill] sm:$0xff] }
 0x344   :  { %v2416_v14 = vsub.f32 %v9129_v7, %v2239_v60  ;;  %v9133_v60 = vld [vmem:[#allocation124_spill] sm:$0xff]  ;;  %v9135_v20 = vld [vmem:[#allocation127_spill] sm:$0xff] }
 0x345   :  { %v2119_v58 = vmul.f32 %v7388_v61, %v7280_v36  ;;  %v1928_v43 = vadd.f32 1e-05, %v1864_v54  ;;  %v7403_v52 = vmul.f32 0.0625, %v9133_v60  ;;  %v9134_v36 = vld [vmem:[#allocation69_spill] sm:$0xff]  ;;  %v1690_v48 = vmul.f32 0.0625, %v9135_v20  ;;  %v9139_v54 = vld [vmem:[#allocation68_spill] sm:$0xff]  ;;  %v7440_v20 = vpop.permute.xlu1 %2240 }
 0x346   :  { %2962 = vperm.xlu1 %4808, %v2424_v55   ;;  %v9130_v55 = vld [vmem:[#allocation72_spill] sm:$0xff] }
 0x347   :  { %3007 = vperm.xlu0 %4802, %v2433_v47   ;;  %v2409_v4 = vsub.f32 %v9130_v55, %v7206_v45  ;;  %5031 = vrsqrt.f32 %v1928_v43  ;;  %v1929_v47 = vadd.f32 1e-05, %v1865_v13  ;;  %v7412_v45 = vld [vmem:[%s8702_s2 + $0x1b0] sm:$0xff]  ;;  %v1754_v7 = vmul.f32 %v7403_v52, %v7403_v52  ;;  %v9140_v43 = vld [vmem:[#allocation125_spill] sm:$0xff] }
 0x348   :  { %9137 = vst [vmem:[#allocation116_spill] sm:$0xff] %v7412_v45  ;;  %v7424_v13 = vmul.f32 0.0625, %v9140_v43  ;;  %v7454_v43 = vld [vmem:[%s8702_s2 + $0x138] sm:$0xff] }
 0x349   :  { %5033 = vrsqrt.f32 %v1929_v47  ;;  %v1818_v32 = vsub.f32 %v1690_v48, %v1754_v7  ;;  %9149 = vst [vmem:[#allocation119_spill] sm:$0xff] %v7454_v43 }
 0x34a   :  { %2282 = vrot.lane.b32.xlu1 %v2118_v5, %s5211_s24  ;;  %v7415_v5 = vmul.f32 %v7412_v45, %v5030_v19  ;;  %v1738_v48 = vmul.f32 %v7424_v13, %v7424_v13 }
 0x34b   :  { %2922 = vperm.xlu0 %4802, %v2416_v14   ;;  %v9138_v14 = vld [vmem:[#allocation103_spill] sm:$0xff]  ;;  %v1882_v55 = vmax.f32 %v1818_v32, 0.0 }
 0x34c   :  { %v2136_v40 = vmul.f32 %v7415_v5, %v7322_v3  ;;  %v7435_v3 = vld [vmem:[%s8702_s2 + $0x130] sm:$0xff] }
 0x34d   :  { %9144 = vst [vmem:[#allocation118_spill] sm:$0xff] %v7435_v3 }
 0x34e   :  { %2284 = vrot.lane.b32.xlu1 %v2119_v58, %s5211_s24 }
 0x34f   :  { %4817 = vset.pattern.permute.xlu0 %v9098_v12 }
 0x350   :  { %2548 = vperm.xlu0 %4817, %v9131_v18   ;;  %v9142_v18 = vld [vmem:[#allocation41_spill] sm:$0xff] }
 0x351   :  { %v5032_v58 = vpop.eup %5031  ;;  %v1674_v47 = vmul.f32 0.0625, %v9142_v18 }
 0x352   :  { %2887 = vperm.xlu1 %4808, %v2409_v4   ;;  %v9141_v4 = vld [vmem:[#allocation73_spill] sm:$0xff]  ;;  %v7438_v60 = vmul.f32 %v7435_v3, %v5032_v58 }
 0x353   :  { %v1802_v32 = vsub.f32 %v1674_v47, %v1738_v48  ;;  %v9150_v47 = vld [vmem:[#allocation71_spill] sm:$0xff]  ;;  %v9151_v48 = vld [vmem:[#allocation140_spill] sm:$0xff] }
 0x354   :  { %2473 = vperm.xlu0 %4817, %v9132_v59   ;;  %v9143_v59 = vld [vmem:[#allocation74_spill] sm:$0xff]  ;;  %9145 = vst [vmem:[#allocation123_spill] sm:$0xff] %v7438_v60  ;;  %v2120_v58 = vmul.f32 %v7438_v60, %v7357_v6 }
 0x355   :  { %v2426_v19 = vsub.f32 %v9143_v59, %v7220_v30  ;;  %v9147_v30 = vld [vmem:[#allocation50_spill] sm:$0xff]  ;;  %v1866_v59 = vmax.f32 %v1802_v32, 0.0 }
 0x356   :  { %4809 = vset.pattern.permute.xlu1 %v9098_v12 }
 0x357   :  { %2593 = vperm.xlu1 %4809, %v9134_v36   ;;  %v5034_v36 = vpop.eup %5033 }
 0x358   :  { %2558 = vperm.xlu0 %4817, %v9136_v37   ;;  %v9146_v37 = vld [vmem:[#allocation126_spill] sm:$0xff] }
 0x359   :  { %v7445_v7 = vmul.f32 0.0625, %v9146_v37  ;;  %v7468_v37 = vmul.f32 0.0625, %v9151_v48 }
 0x35b   :  { %2508 = vperm.xlu1 %4809, %v9138_v14   ;;  %v1946_v14 = vadd.f32 1e-05, %v1882_v55  ;;  %v1739_v18 = vmul.f32 %v7445_v7, %v7445_v7  ;;  %v7462_v55 = vpop.permute.xlu1 %2553  ;;  %v1760_v32 = vmul.f32 %v7468_v37, %v7468_v37 }
 0x35c   :  { %2483 = vperm.xlu0 %4817, %v9139_v54   ;;  %v9148_v54 = vld [vmem:[#allocation128_spill] sm:$0xff] }
 0x35d   :  { %5035 = vrsqrt.f32 %v1946_v14 }
 0x35f   :  { %2318 = vrot.lane.b32.xlu1 %v2136_v40, %s5211_s24  ;;  %v1675_v40 = vmul.f32 0.0625, %v9148_v54  ;;  %v7475_v14 = vpop.permute.xlu1 %2468 }
 0x360   :  { %2568 = vperm.xlu0 %4817, %v9141_v4   ;;  %4810 = vset.pattern.permute.xlu1 %v9066_v57  ;;  %v7457_v4 = vmul.f32 %v7454_v43, %v5034_v36  ;;  %v9152_v36 = vld [vmem:[#allocation56_spill] sm:$0xff] }
 0x361   :  { %v1803_v6 = vsub.f32 %v1675_v40, %v1739_v18  ;;  %v9156_v18 = vld [vmem:[#allocation100_spill] sm:$0xff] }
 0x363   :  { %2972 = vperm.xlu1 %4810, %v2426_v19   ;;  %v2121_v19 = vmul.f32 %v7457_v4, %v7377_v35  ;;  %v1867_v54 = vmax.f32 %v1803_v6, 0.0  ;;  %v9155_v35 = vld [vmem:[#allocation141_spill] sm:$0xff]  ;;  %v9157_v6 = vld [vmem:[#allocation143_spill] sm:$0xff] }
 0x364   :  { %2493 = vperm.xlu0 %4817, %v9147_v30   ;;  %v1930_v30 = vadd.f32 1e-05, %v1866_v59  ;;  %v7480_v40 = vmul.f32 0.0625, %v9155_v35  ;;  %v1680_v48 = vmul.f32 0.0625, %v9157_v6  ;;  %v9159_v35 = vld [vmem:[#allocation104_spill] sm:$0xff] }
 0x366   :  { %5037 = vrsqrt.f32 %v1930_v30  ;;  %v1744_v1 = vmul.f32 %v7480_v40, %v7480_v40  ;;  %v9161_v30 = vld [vmem:[#allocation132_spill] sm:$0xff] }
 0x367   :  { %2286 = vrot.lane.b32.xlu1 %v2120_v58, %s5211_s24  ;;  %v9153_v58 = vld [vmem:[#allocation142_spill] sm:$0xff] }
 0x368   :  { %2578 = vperm.xlu0 %4817, %v9150_v47   ;;  %v1696_v10 = vmul.f32 0.0625, %v9153_v58  ;;  %v2411_v47 = vsub.f32 %v9154_v56, %v7248_v25  ;;  %v5036_v58 = vpop.eup %5035  ;;  %v9158_v25 = vld [vmem:[#allocation129_spill] sm:$0xff] }
 0x369   :  { %v7487_v56 = vmul.f32 0.0625, %v9158_v25  ;;  %v7502_v25 = vld [vmem:[%s8702_s2 + $0x1c0] sm:$0xff] }
 0x36a   :  { %v1824_v59 = vsub.f32 %v1696_v10, %v1760_v32  ;;  %v1692_v10 = vmul.f32 0.0625, %v9161_v30  ;;  %v1808_v32 = vsub.f32 %v1680_v48, %v1744_v1  ;;  %9162 = vst [vmem:[#allocation72_spill] sm:$0xff] %v7502_v25  ;;  %v7505_v43 = vmul.f32 %v7502_v25, %v5036_v58  ;;  %v9165_v58 = vld [vmem:[#allocation130_spill] sm:$0xff] }
 0x36b   :  { %2288 = vrot.lane.b32.xlu1 %v2121_v19, %s5211_s24  ;;  %v1931_v19 = vadd.f32 1e-05, %v1867_v54  ;;  %v7518_v25 = vmul.f32 0.0625, %v9165_v58 }
 0x36c   :  { %2503 = vperm.xlu0 %4817, %v9152_v36   ;;  %v1888_v54 = vmax.f32 %v1824_v59, 0.0  ;;  %v1872_v48 = vmax.f32 %v1808_v32, 0.0  ;;  %v2138_v45 = vmul.f32 %v7505_v43, %v7403_v52  ;;  %v7531_v52 = vld [vmem:[%s8702_s2 + $0x140] sm:$0xff] }
 0x36d   :  { %5039 = vrsqrt.f32 %v1931_v19  ;;  %v9163_v19 = vld [vmem:[#allocation109_spill] sm:$0xff]  ;;  %9169 = vst [vmem:[#allocation35_spill] sm:$0xff] %v7531_v52 }
 0x36e   :  { %v1952_v59 = vadd.f32 1e-05, %v1888_v54  ;;  %v9167_v54 = vld [vmem:[#allocation133_spill] sm:$0xff] }
 0x36f   :  { %2897 = vperm.xlu1 %4810, %v2411_v47   ;;  %v9160_v47 = vld [vmem:[#allocation102_spill] sm:$0xff]  ;;  %v1676_v32 = vmul.f32 0.0625, %v9167_v54 }
 0x370   :  { %2588 = vperm.xlu0 %4817, %v9156_v18   ;;  %v5038_v60 = vpop.eup %5037  ;;  %5041 = vrsqrt.f32 %v1952_v59  ;;  %v1740_v59 = vmul.f32 %v7518_v25, %v7518_v25 }
 0x372   :  { %v7484_v36 = vpop.permute.xlu1 %2932 }
 0x373   :  { %4811 = vset.pattern.permute.xlu1 %v9098_v12 }
 0x374   :  { %2603 = vperm.xlu1 %4811, %v9159_v35   ;;  %2513 = vperm.xlu0 %4817, %v9160_v47   ;;  %v1756_v35 = vmul.f32 %v7487_v56, %v7487_v56  ;;  %v9164_v47 = vld [vmem:[#allocation106_spill] sm:$0xff] }
 0x375   :  { %v7495_v18 = vpop.permute.xlu0 %2937 }
 0x376   :  { %v7497_v6 = vpop.permute.xlu1 %2852  ;;  %v1820_v1 = vsub.f32 %v1692_v10, %v1756_v35  ;;  %v1936_v10 = vadd.f32 1e-05, %v1872_v48  ;;  %v9168_v35 = vld [vmem:[#allocation105_spill] sm:$0xff]  ;;  %v9171_v48 = vld [vmem:[#allocation131_spill] sm:$0xff] }
 0x377   :  { %v7541_v58 = vmul.f32 0.0625, %v9171_v48 }
 0x378   :  { %2518 = vperm.xlu1 %4811, %v9163_v19   ;;  %2598 = vperm.xlu0 %4817, %v9164_v47   ;;  %v1884_v19 = vmax.f32 %v1820_v1, 0.0  ;;  %v2428_v47 = vsub.f32 %v9168_v35, %v7275_v0  ;;  %v9172_v0 = vld [vmem:[#allocation111_spill] sm:$0xff]  ;;  %5043 = vrsqrt.f32 %v1936_v10  ;;  %v1804_v35 = vsub.f32 %v1676_v32, %v1740_v59 }
 0x379   :  { %v7511_v30 = vpop.permute.xlu0 %2308 }
 0x37a   :  { %v7513_v3 = vpop.permute.xlu1 %2857  ;;  %v1948_v54 = vadd.f32 1e-05, %v1884_v19  ;;  %v1741_v19 = vmul.f32 %v7541_v58, %v7541_v58  ;;  %v1868_v10 = vmax.f32 %v1804_v35, 0.0 }
 0x37c   :  { %2322 = vrot.lane.b32.xlu1 %v2138_v45, %s5211_s24  ;;  %2523 = vperm.xlu0 %4817, %v9166_v33   ;;  %v7534_v45 = vmul.f32 %v7531_v52, %v5038_v60  ;;  %v5040_v33 = vpop.eup %5039  ;;  %v7552_v52 = vld [vmem:[%s8702_s2 + $0x148] sm:$0xff]  ;;  %5045 = vrsqrt.f32 %v1948_v54 }
 0x37d   :  { %4812 = vset.pattern.permute.xlu1 %v9066_v57  ;;  %9174 = vst [vmem:[#allocation124_spill] sm:$0xff] %v7552_v52  ;;  %v7555_v48 = vmul.f32 %v7552_v52, %v5040_v33  ;;  %v9176_v52 = vld [vmem:[#allocation115_spill] sm:$0xff] }
 0x37e   :  { %v7526_v28 = vpop.permute.xlu0 %2947  ;;  %9170 = vst [vmem:[#allocation45_spill] sm:$0xff] %v7534_v45  ;;  %v2122_v60 = vmul.f32 %v7534_v45, %v7424_v13  ;;  %v1805_v13 = vsub.f32 %v1677_v23, %v1741_v19  ;;  %v1932_v45 = vadd.f32 1e-05, %v1868_v10  ;;  %v7578_v23 = vld [vmem:[%s8702_s2 + $0x1f0] sm:$0xff] }
 0x37f   :  { %v7536_v1 = vpop.permute.xlu1 %2563  ;;  %v2123_v59 = vmul.f32 %v7555_v48, %v7445_v7  ;;  %9178 = vst [vmem:[#allocation69_spill] sm:$0xff] %v7578_v23 }
 0x380   :  { %2982 = vperm.xlu1 %4812, %v2428_v47   ;;  %2608 = vperm.xlu0 %4817, %v9172_v0   ;;  %v5042_v0 = vpop.eup %5041  ;;  %v1869_v16 = vmax.f32 %v1805_v13, 0.0  ;;  %5047 = vrsqrt.f32 %v1932_v45 }
 0x381   :  { %v7581_v7 = vmul.f32 %v7578_v23, %v5042_v0  ;;  %v9182_v23 = vld [vmem:[#allocation135_spill] sm:$0xff] }
 0x382   :  { %v7545_v15 = vpop.permute.xlu0 %2862  ;;  %v5044_v35 = vpop.eup %5043  ;;  %v1933_v10 = vadd.f32 1e-05, %v1869_v16  ;;  %v9183_v16 = vld [vmem:[#allocation110_spill] sm:$0xff] }
 0x383   :  { %v7557_v47 = vpop.permute.xlu1 %2478 }
 0x384   :  { %2290 = vrot.lane.b32.xlu1 %v2122_v60, %s5211_s24  ;;  %2533 = vperm.xlu0 %4817, %v9175_v29   ;;  %v9177_v60 = vld [vmem:[#allocation107_spill] sm:$0xff]  ;;  %5049 = vrsqrt.f32 %v1933_v10 }
 0x385   :  { %v2413_v29 = vsub.f32 %v9177_v60, %v7302_v21  ;;  %v2144_v21 = vmul.f32 %v7581_v7, %v7468_v37  ;;  %v9184_v37 = vld [vmem:[#allocation137_spill] sm:$0xff] }
 0x386   :  { %v7563_v32 = vpop.permute.xlu0 %2312  ;;  %v1694_v45 = vmul.f32 0.0625, %v9184_v37 }
 0x387   :  { %v7567_v33 = vpop.permute.xlu1 %2306 }
 0x388   :  { %2292 = vrot.lane.b32.xlu1 %v2123_v59, %s5211_s24  ;;  %2618 = vperm.xlu0 %4817, %v9176_v52   ;;  %v9179_v52 = vld [vmem:[#allocation121_spill] sm:$0xff]  ;;  %v7593_v59 = vld [vmem:[%s8702_s2 + $0x170] sm:$0xff] }
 0x389   :  { %9180 = vst [vmem:[#allocation127_spill] sm:$0xff] %v7593_v59  ;;  %v7596_v0 = vmul.f32 %v7593_v59, %v5044_v35 }
 0x38a   :  { %v7573_v54 = vpop.permute.xlu0 %2957 }
 0x38b   :  { %v7583_v19 = vpop.permute.xlu1 %2942  ;;  %9181 = vst [vmem:[#allocation49_spill] sm:$0xff] %v7596_v0  ;;  %v2128_v35 = vmul.f32 %v7596_v0, %v7480_v40 }
 0x38c   :  { %2907 = vperm.xlu1 %4812, %v2413_v29   ;;  %2543 = vperm.xlu0 %4817, %v9179_v52   ;;  %v5046_v29 = vpop.eup %5045  ;;  %v7601_v52 = vmul.f32 0.0625, %v9182_v23  ;;  %v7616_v23 = vld [vmem:[%s8702_s2 + $0x1d0] sm:$0xff] }
 0x38d   :  { %9185 = vst [vmem:[#allocation103_spill] sm:$0xff] %v7616_v23  ;;  %v7619_v34 = vmul.f32 %v7616_v23, %v5046_v29  ;;  %v5048_v51 = vpop.eup %5047  ;;  %v9188_v29 = vld [vmem:[#allocation136_spill] sm:$0xff] }
 0x38e   :  { %v7586_v13 = vpop.permute.xlu0 %2872  ;;  %v1758_v10 = vmul.f32 %v7601_v52, %v7601_v52  ;;  %v7633_v23 = vmul.f32 0.0625, %v9188_v29 }
 0x38f   :  { %v7598_v60 = vpop.permute.xlu1 %2274  ;;  %v2140_v0 = vmul.f32 %v7619_v34, %v7487_v56 }
 0x390   :  { %4813 = vset.pattern.permute.xlu1 %v9098_v12  ;;  %2334 = vrot.lane.b32.xlu0 %v2144_v21, %s5211_s24  ;;  %v9186_v21 = vld [vmem:[#allocation113_spill] sm:$0xff] }
 0x391   :  { %2613 = vperm.xlu1 %4813, %v9183_v16   ;;  %v1822_v16 = vsub.f32 %v1694_v45, %v1758_v10  ;;  %v9190_v45 = vld [vmem:[#allocation138_spill] sm:$0xff] }
 0x392   :  { %v7607_v9 = vpop.permute.xlu0 %2316  ;;  %v1678_v10 = vmul.f32 0.0625, %v9190_v45  ;;  %v1742_v45 = vmul.f32 %v7633_v23, %v7633_v23 }
 0x393   :  { %v7611_v59 = vpop.permute.xlu1 %2276  ;;  %v1886_v11 = vmax.f32 %v1822_v16, 0.0  ;;  %v5050_v16 = vpop.eup %5049 }
 0x394   :  { %2302 = vrot.lane.b32.xlu0 %v2128_v35, %s5211_s24  ;;  %v1806_v38 = vsub.f32 %v1678_v10, %v1742_v45 }
 0x395   :  { %2528 = vperm.xlu1 %4813, %v9186_v21   ;;  %v5156_v21 = vld [vmem:[%s8702_s2 + $0xe0] sm:$0xff] }
 0x396   :  { %v7625_v37 = vpop.permute.xlu0 %2967  ;;  %v2430_v56 = vsub.f32 %v5156_v21, %v7316_v8  ;;  %v1950_v8 = vadd.f32 1e-05, %v1886_v11 }
 0x397   :  { %9187 = vst [vmem:[#allocation68_spill] sm:$0xff] %v7625_v37  ;;  %v7627_v40 = vpop.permute.xlu1 %2867  ;;  %v9194_v37 = vld [vmem:[#allocation139_spill] sm:$0xff] }
 0x398   :  { %2708 = vperm.xlu0 %4817, %v7124_v62   ;;  %v7647_v62 = vld [vmem:[%s8702_s2 + $0x150] sm:$0xff]  ;;  %v1679_v39 = vmul.f32 0.0625, %v9194_v37  ;;  %5051 = vrsqrt.f32 %v1950_v8 }
 0x399   :  { %2326 = vrot.lane.b32.xlu1 %v2140_v0, %s5211_s24  ;;  %9191 = vst [vmem:[#allocation73_spill] sm:$0xff] %v7647_v62  ;;  %v7650_v0 = vmul.f32 %v7647_v62, %v5048_v51 }
 0x39a   :  { %v7636_v35 = vpop.permute.xlu0 %2882  ;;  %4814 = vset.pattern.permute.xlu1 %v9066_v57 }
 0x39b   :  { %9189 = vst [vmem:[#allocation125_spill] sm:$0xff] %v7636_v35  ;;  %9192 = vst [vmem:[#allocation41_spill] sm:$0xff] %v7650_v0  ;;  %v9193_v35 = vld [vmem:[#allocation47_spill] sm:$0xff]  ;;  %v2124_v51 = vmul.f32 %v7650_v0, %v7518_v25  ;;  %v1870_v25 = vmax.f32 %v1806_v38, 0.0 }
 0x39c   :  { %v7652_v29 = vpop.permute.xlu1 %2573  ;;  %2633 = vperm.xlu0 %4817, %v7184_v27   ;;  %v7658_v46 = vmul.f32 0.0625, %v9193_v35  ;;  %v7668_v27 = vld [vmem:[%s8702_s2 + $0x158] sm:$0xff] }
 0x39d   :  { %2992 = vperm.xlu1 %4814, %v2430_v56   ;;  %9195 = vst [vmem:[#allocation74_spill] sm:$0xff] %v7668_v27  ;;  %v7671_v62 = vmul.f32 %v7668_v27, %v5050_v16  ;;  %v9198_v16 = vld [vmem:[#allocation43_spill] sm:$0xff] }
 0x39e   :  { %v7660_v21 = vpop.permute.xlu0 %2320  ;;  %v1743_v11 = vmul.f32 %v7658_v46, %v7658_v46  ;;  %v7687_v27 = vmul.f32 0.0625, %v9198_v16  ;;  %v9202_v16 = vld [vmem:[#allocation67_spill] sm:$0xff] }
 0x39f   :  { %v2125_v56 = vmul.f32 %v7671_v62, %v7541_v58 }
 0x3a0   :  { %v7673_v35 = vpop.permute.xlu1 %2488  ;;  %2718 = vperm.xlu0 %4817, %v7237_v31   ;;  %v1807_v10 = vsub.f32 %v1679_v39, %v1743_v11  ;;  %v5159_v39 = vld [vmem:[%s8702_s2 + $0x68] sm:$0xff]  ;;  %v9201_v11 = vld [vmem:[#allocation52_spill] sm:$0xff] }
 0x3a1   :  { %2294 = vrot.lane.b32.xlu1 %v2124_v51, %s5211_s24  ;;  %v1934_v51 = vadd.f32 1e-05, %v1870_v25  ;;  %v2415_v38 = vsub.f32 %v5159_v39, %v7328_v50  ;;  %v9203_v39 = vld [vmem:[#allocation117_spill] sm:$0xff] }
 0x3a2   :  { %v7679_v37 = vpop.permute.xlu0 %2977  ;;  %v1871_v0 = vmax.f32 %v1807_v10, 0.0  ;;  %v5052_v50 = vpop.eup %5051 }
 0x3a3   :  { %9196 = vst [vmem:[#allocation126_spill] sm:$0xff] %v7679_v37  ;;  %v9200_v37 = vld [vmem:[#allocation48_spill] sm:$0xff]  ;;  %5053 = vrsqrt.f32 %v1934_v51 }
 0x3a4   :  { %v7683_v45 = vpop.permute.xlu1 %2310  ;;  %2643 = vperm.xlu0 %4817, %v7294_v22   ;;  %v1697_v8 = vmul.f32 0.0625, %v9200_v37  ;;  %v1761_v22 = vmul.f32 %v7687_v27, %v7687_v27  ;;  %v1935_v37 = vadd.f32 1e-05, %v1871_v0 }
 0x3a5   :  { %9197 = vst [vmem:[#allocation50_spill] sm:$0xff] %v7683_v45  ;;  %2296 = vrot.lane.b32.xlu1 %v2125_v56, %s5211_s24  ;;  %v7703_v56 = vmul.f32 0.0625, %v9201_v11  ;;  %v9206_v11 = vld [vmem:[#allocation120_spill] sm:$0xff] }
 0x3a6   :  { %v7690_v31 = vpop.permute.xlu0 %2892  ;;  %v1825_v10 = vsub.f32 %v1697_v8, %v1761_v22  ;;  %5055 = vrsqrt.f32 %v1935_v37 }
 0x3a7   :  { %9199 = vst [vmem:[#allocation128_spill] sm:$0xff] %v7690_v31  ;;  %v1681_v31 = vmul.f32 0.0625, %v9202_v16 }
 0x3a8   :  { %v7697_v58 = vpop.permute.xlu1 %2952  ;;  %2728 = vperm.xlu0 %4817, %v7336_v42   ;;  %v1745_v42 = vmul.f32 %v7703_v56, %v7703_v56  ;;  %v1889_v51 = vmax.f32 %v1825_v10, 0.0 }
 0x3a9   :  { %2917 = vperm.xlu1 %4814, %v2415_v38  }
 0x3aa   :  { %v7705_v25 = vpop.permute.xlu0 %2324  ;;  %v1809_v0 = vsub.f32 %v1681_v31, %v1745_v42 }
 0x3ac   :  { %v7708_v45 = vpop.permute.xlu1 %2278  ;;  %2653 = vperm.xlu0 %4817, %v7388_v61   ;;  %v7723_v61 = vld [vmem:[%s8702_s2 + $0x1e0] sm:$0xff] }
 0x3ad   :  { %4815 = vset.pattern.permute.xlu1 %v9098_v12  ;;  %9205 = vst [vmem:[#allocation140_spill] sm:$0xff] %v7723_v61  ;;  %v2078_v22 = vmul.f32 %v7723_v61, %v5052_v50  ;;  %v5161_v50 = vld [vmem:[%s8702_s2 + $0xf0] sm:$0xff] }
 0x3ae   :  { %2623 = vperm.xlu1 %4815, %v9203_v39   ;;  %v7715_v38 = vpop.permute.xlu0 %2987  ;;  %v1953_v39 = vadd.f32 1e-05, %v1889_v51  ;;  %v2432_v51 = vsub.f32 %v5161_v50, %v7350_v53 }
 0x3af   :  { %9204 = vst [vmem:[#allocation71_spill] sm:$0xff] %v7715_v38  ;;  %v1873_v38 = vmax.f32 %v1809_v0, 0.0  ;;  %v2142_v31 = vmul.f32 %v2078_v22, %v7601_v52 }
 0x3b0   :  { %v7717_v8 = vpop.permute.xlu1 %2280  ;;  %2738 = vperm.xlu0 %4817, %v7415_v5   ;;  %v5054_v5 = vpop.eup %5053  ;;  %5057 = vrsqrt.f32 %v1953_v39 }
 0x3b1   :  { %v1937_v42 = vadd.f32 1e-05, %v1873_v38  ;;  %v5056_v0 = vpop.eup %5055 }
 0x3b2   :  { %2538 = vperm.xlu1 %4815, %v9206_v11   ;;  %v7727_v16 = vpop.permute.xlu0 %2902 }
 0x3b3   :  { %5059 = vrsqrt.f32 %v1937_v42 }
 0x3b4   :  { %v7729_v37 = vpop.permute.xlu1 %2877  ;;  %2663 = vperm.xlu0 %4817, %v7457_v4   ;;  %v7745_v4 = vld [vmem:[%s8702_s2 + $0x160] sm:$0xff] }
 0x3b5   :  { %9207 = vst [vmem:[#allocation56_spill] sm:$0xff] %v7745_v4  ;;  %v7748_v52 = vmul.f32 %v7745_v4, %v5054_v5 }
 0x3b6   :  { %2330 = vrot.lane.b32.xlu1 %v2142_v31, %s5211_s24  ;;  %v7734_v10 = vpop.permute.xlu0 %2328 }
 0x3b7   :  { %4816 = vset.pattern.permute.xlu1 %v9066_v57  ;;  %9208 = vst [vmem:[#allocation142_spill] sm:$0xff] %v7748_v52  ;;  %v2126_v53 = vmul.f32 %v7748_v52, %v7633_v23 }
 0x3b8   :  { %2748 = vperm.xlu0 %4817, %v7505_v43   ;;  %v7760_v43 = vld [vmem:[%s8702_s2 + $0x168] sm:$0xff] }
 0x3b9   :  { %v7750_v38 = vpop.permute.xlu1 %2583  ;;  %9209 = vst [vmem:[#allocation101_spill] sm:$0xff] %v7760_v43  ;;  %v2063_v39 = vmul.f32 %v7760_v43, %v5056_v0 }
 0x3ba   :  { %3002 = vperm.xlu1 %4816, %v2432_v51   ;;  %v7752_v11 = vpop.permute.xlu0 %2997  ;;  %v5058_v42 = vpop.eup %5057  ;;  %v5164_v51 = vld [vmem:[%s8702_s2 + $0x78] sm:$0xff] }
 0x3bb   :  { %v2417_v0 = vsub.f32 %v5164_v51, %v7440_v20 }
 0x3bc   :  { %2673 = vperm.xlu0 %4817, %v7555_v48   ;;  %v2127_v48 = vmul.f32 %v2063_v39, %v7658_v46 }
 0x3bd   :  { %v7763_v31 = vpop.permute.xlu1 %2498 }
 0x3be   :  { %2298 = vrot.lane.b32.xlu1 %v2126_v53, %s5211_s24  ;;  %v7766_v5 = vpop.permute.xlu0 %2912  ;;  %v5060_v53 = vpop.eup %5059 }
 0x3c0   :  { %2758 = vperm.xlu0 %4817, %v7619_v34   ;;  %v7783_v34 = vld [vmem:[%s8702_s2 + $0x1f8] sm:$0xff] }
 0x3c1   :  { %v7770_v50 = vpop.permute.xlu1 %2314  ;;  %9210 = vst [vmem:[#allocation141_spill] sm:$0xff] %v7783_v34  ;;  %v7786_v46 = vmul.f32 %v7783_v34, %v5058_v42  ;;  %v9217_v34 = vld [vmem:[#allocation6_spill] sm:$0xff] }
 0x3c2   :  { %2300 = vrot.lane.b32.xlu1 %v2127_v48, %s5211_s24  ;;  %v7773_v23 = vpop.permute.xlu0 %2332 }
 0x3c3   :  { %9211 = vst [vmem:[#allocation100_spill] sm:$0xff] %v7786_v46  ;;  %v2145_v20 = vmul.f32 %v7786_v46, %v7687_v27  ;;  %v9215_v46 = vld [vmem:[#allocation18_spill] sm:$0xff] }
 0x3c4   :  { %2683 = vperm.xlu0 %4817, %v7671_v62   ;;  %v7797_v62 = vld [vmem:[%s8702_s2 + $0x178] sm:$0xff]  ;;  %v2803_v61 = vmul.f32 %v7462_v55, %v9215_v46 }
 0x3c5   :  { %v7788_v48 = vpop.permute.xlu1 %2962  ;;  %9213 = vst [vmem:[#allocation129_spill] sm:$0xff] %v7797_v62  ;;  %v2065_v51 = vmul.f32 %v7797_v62, %v5060_v53  ;;  %v9216_v53 = vld [vmem:[#allocation17_spill] sm:$0xff] }
 0x3c6   :  { %2927 = vperm.xlu1 %4816, %v2417_v0   ;;  %v7790_v43 = vpop.permute.xlu0 %3007  ;;  %v3187_v52 = vadd.f32 %v7495_v18, %v2803_v61  ;;  %v9220_v61 = vld [vmem:[#allocation16_spill] sm:$0xff] }
 0x3c7   :  { %9212 = vst [vmem:[#allocation143_spill] sm:$0xff] %v7790_v43 }
 0x3c8   :  { %2768 = vperm.xlu0 %4817, %v2078_v22   ;;  %v2129_v22 = vmul.f32 %v2065_v51, %v7703_v56 }
 0x3c9   :  { %v7800_v4 = vpop.permute.xlu1 %2282 }
 0x3ca   :  { %2336 = vrot.lane.b32.xlu1 %v2145_v20, %s5211_s24  ;;  %v7803_v42 = vpop.permute.xlu0 %2922 }
 0x3cb   :  { %9214 = vst [vmem:[#allocation104_spill] sm:$0xff] %v7803_v42  ;;  %4818 = vset.pattern.permute.xlu1 %v9098_v12  ;;  %v9218_v42 = vld [vmem:[#allocation8_spill] sm:$0xff] }
 0x3cc   :  { %2693 = vperm.xlu0 %4817, %v2063_v39  }
 0x3cd   :  { %v7807_v0 = vpop.permute.xlu1 %2284 }
 0x3ce   :  { %2304 = vrot.lane.b32.xlu1 %v2129_v22, %s5211_s24  ;;  %v2786_v22 = vmul.f32 %v7475_v14, %v9217_v34  ;;  %v5167_v14 = vld [vmem:[%s8702_s2 + $0x188] sm:$0xff] }
 0x3cf   :  { %v2549_v27 = vpop.permute.xlu0 %2548  ;;  %v9221_v34 = vld [vmem:[#allocation5_spill] sm:$0xff] }
 0x3d0   :  { %v2802_v62 = vmul.f32 %v2549_v27, %v9216_v53  ;;  %2778 = vperm.xlu0 %4817, %v7581_v7   ;;  %v3170_v46 = vadd.f32 %v7497_v6, %v2786_v22  ;;  %v9219_v27 = vld [vmem:[#allocation19_spill] sm:$0xff] }
 0x3d1   :  { %v7814_v20 = vpop.permute.xlu1 %2887  ;;  %v2805_v7 = vmul.f32 %v7536_v1, %v9219_v27  ;;  %v2450_v1 = vsub.f32 %v7121_v63, %v7567_v33  ;;  %v9222_v33 = vld [vmem:[#allocation7_spill] sm:$0xff]  ;;  %v9224_v27 = vld [vmem:[#allocation21_spill] sm:$0xff] }
 0x3d2   :  { %2713 = vperm.xlu1 %4818, %v7089_v26   ;;  %v3186_v56 = vadd.f32 %v7484_v36, %v2802_v62  ;;  %v2451_v36 = vsub.f32 %v5167_v14, %v7511_v30  ;;  %v5168_v30 = vld [vmem:[%s8702_s2 + $0x198] sm:$0xff] }
 0x3d3   :  { %v2474_v39 = vpop.permute.xlu0 %2473 }
 0x3d4   :  { %v2787_v43 = vmul.f32 %v2474_v39, %v9218_v42  ;;  %2703 = vperm.xlu0 %4817, %v2065_v51   ;;  %v3274_v55 = vpack.c.bf16 %v3187_v52, %v3186_v56  ;;  %v2453_v51 = vsub.f32 %v5168_v30, %v7563_v32  ;;  %v9223_v56 = vld [vmem:[#allocation23_spill] sm:$0xff]  ;;  %v2455_v32 = vsub.f32 %v7170_v17, %v7607_v9 }
 0x3d5   :  { %v2807_v39 = vmul.f32 %v7652_v29, %v9223_v56  ;;  %v2457_v17 = vsub.f32 %v7212_v49, %v7660_v21  ;;  %v2459_v49 = vsub.f32 %v7258_v41, %v7705_v25  ;;  %v9232_v41 = vld [vmem:[#allocation51_spill] sm:$0xff] }
 0x3d6   :  { %v7825_v53 = vpop.permute.xlu1 %2593  ;;  %2628 = vperm.xlu1 %4818, %v7157_v44   ;;  %4562 = vmatprep.subr.bf16.mxu1 %v3274_v55  ;;  %v3171_v26 = vadd.f32 %v7513_v3, %v2787_v43  ;;  %v3189_v44 = vadd.f32 %v7526_v28, %v2805_v7  ;;  %v2788_v3 = vmul.f32 %v7557_v47, %v9221_v34  ;;  %v9230_v34 = vld [vmem:[#allocation68_spill] sm:$0xff]  ;;  %v9236_v56 = vld [vmem:[#allocation27_spill] sm:$0xff] }
 0x3d7   :  { %v2559_v18 = vpop.permute.xlu0 %2558  ;;  %v2434_v47 = vsub.f32 %v7154_v24, %v7598_v60  ;;  %v2435_v24 = vsub.f32 %v7181_v2, %v7611_v59  ;;  %v9225_v60 = vld [vmem:[#allocation10_spill] sm:$0xff]  ;;  %v4887_v2 = vld [vmem:[%s8703_s3 + $0x4] ss:$16 sps:$4 sm:$0xff]   ;;  %v2461_v25 = vsub.f32 %v9232_v41, %v7734_v10 }
 0x3d8   :  { %v2804_v52 = vmul.f32 %v2559_v18, %v9220_v61  ;;  %4833 = vset.pattern.permute.xlu0 %v9066_v57  ;;  %v3266_v6 = vpack.c.bf16 %v3171_v26, %v3170_v46  ;;  %v9227_v59 = vld [vmem:[#allocation22_spill] sm:$0xff]  ;;  %3586 = vmatprep.mubr.bf16.mxu1 %v4887_v2 }
 0x3d9   :  { %3097 = vperm.xlu0 %4833, %v2451_v36   ;;  %v9226_v36 = vld [vmem:[#allocation12_spill] sm:$0xff]  ;;  %v9239_v10 = vld [vmem:[#allocation70_spill] sm:$0xff] }
 0x3da   :  { %v3188_v43 = vadd.f32 %v7583_v19, %v2804_v52  ;;  %v7841_v62 = vpop.permute.xlu1 %2508  ;;  %4819 = vset.pattern.permute.xlu1 %v9066_v57  ;;  %4563 = vmatpush3.bf16.msra.mxu1 %v3266_v6  ;;  %v3172_v19 = vadd.f32 %v7545_v15, %v2788_v3  ;;  %v3191_v15 = vadd.f32 %v7573_v54, %v2807_v39  ;;  %v9228_v6 = vld [vmem:[#allocation20_spill] sm:$0xff]  ;;  %v9231_v3 = vld [vmem:[#allocation9_spill] sm:$0xff] }
 0x3db   :  { %3092 = vperm.xlu1 %4819, %v2450_v1   ;;  %v2484_v63 = vpop.permute.xlu0 %2483 }
 0x3dc   :  { %v2789_v28 = vmul.f32 %v2484_v63, %v9222_v33  ;;  %v3275_v42 = vpack.c.bf16 %v3189_v44, %v3188_v43  ;;  %v9229_v44 = vld [vmem:[#allocation33_spill] sm:$0xff]  ;;  %v9233_v63 = vld [vmem:[#allocation11_spill] sm:$0xff] }
 0x3dd   :  { %3107 = vperm.xlu0 %4833, %v2453_v51  }
 0x3de   :  { %v3173_v22 = vadd.f32 %v7627_v40, %v2789_v28  ;;  %v7855_v55 = vpop.permute.xlu1 %2318  ;;  %4564 = vmatprep.subr.bf16.mxu1 %v3275_v42  ;;  %v2790_v40 = vmul.f32 %v7673_v35, %v9225_v60  ;;  %v2809_v35 = vmul.f32 %v7750_v38, %v9227_v59  ;;  %v9234_v28 = vld [vmem:[#allocation42_spill] sm:$0xff] }
 0x3df   :  { %3012 = vperm.xlu1 %4819, %v2434_v47   ;;  %v2569_v46 = vpop.permute.xlu0 %2568  ;;  %v9235_v47 = vld [vmem:[#allocation125_spill] sm:$0xff]  ;;  %v9241_v60 = vld [vmem:[#allocation126_spill] sm:$0xff] }
 0x3e0   :  { %v2806_v7 = vmul.f32 %v2569_v46, %v9224_v27  ;;  %v3267_v26 = vpack.c.bf16 %v3173_v22, %v3172_v19  ;;  %v3174_v54 = vadd.f32 %v7586_v13, %v2790_v40  ;;  %v3193_v38 = vadd.f32 %v9230_v34, %v2809_v35  ;;  %v9237_v22 = vld [vmem:[#allocation50_spill] sm:$0xff] }
 0x3e1   :  { %3117 = vperm.xlu0 %4833, %v2455_v32   ;;  %v9238_v32 = vld [vmem:[#allocation44_spill] sm:$0xff]  ;;  %v2463_v27 = vsub.f32 %v9239_v10, %v7773_v23  ;;  %v9242_v40 = vld [vmem:[#allocation14_spill] sm:$0xff] }
 0x3e2   :  { %v3190_v29 = vadd.f32 %v7697_v58, %v2806_v7  ;;  %v2973_v14 = vpop.permute.xlu1 %2972  ;;  %4565 = vmatpush3.bf16.msra.mxu1 %v3267_v26  ;;  %v2452_v46 = vsub.f32 %v9238_v32, %v9237_v22  ;;  %v9240_v26 = vld [vmem:[#allocation25_spill] sm:$0xff]  ;;  %v9255_v22 = vld [vmem:[#allocation28_spill] sm:$0xff] }
 0x3e3   :  { %3017 = vperm.xlu1 %4819, %v2435_v24   ;;  %v2494_v9 = vpop.permute.xlu0 %2493 }
 0x3e4   :  { %v2791_v18 = vmul.f32 %v2494_v9, %v9226_v36  ;;  %v3276_v61 = vpack.c.bf16 %v3191_v15, %v3190_v29 }
 0x3e5   :  { %3127 = vperm.xlu0 %4833, %v2457_v17   ;;  %v9243_v17 = vld [vmem:[#allocation63_spill] sm:$0xff] }
 0x3e6   :  { %v3175_v58 = vadd.f32 %v7729_v37, %v2791_v18  ;;  %v7876_v52 = vpop.permute.xlu1 %2286  ;;  %4566 = vmatprep.subr.bf16.mxu1 %v3276_v61  ;;  %v2792_v37 = vmul.f32 %v7763_v31, %v9231_v3  ;;  %v2811_v31 = vmul.f32 %v7825_v53, %v9236_v56  ;;  %v2436_v9 = vsub.f32 %v9243_v17, %v7708_v45  ;;  %v9244_v18 = vld [vmem:[#allocation15_spill] sm:$0xff]  ;;  %v9253_v56 = vld [vmem:[#allocation13_spill] sm:$0xff] }
 0x3e7   :  { %4820 = vset.pattern.permute.xlu1 %v9098_v12  ;;  %v2579_v21 = vpop.permute.xlu0 %2578 }
 0x3e8   :  { %v2808_v1 = vmul.f32 %v2579_v21, %v9228_v6  ;;  %2723 = vperm.xlu1 %4820, %v9229_v44   ;;  %v3268_v13 = vpack.c.bf16 %v3175_v58, %v3174_v54  ;;  %v3176_v19 = vadd.f32 %v9235_v47, %v2792_v37  ;;  %v3195_v53 = vadd.f32 %v9241_v60, %v2811_v31  ;;  %v9245_v54 = vld [vmem:[#allocation128_spill] sm:$0xff]  ;;  %v9246_v58 = vld [vmem:[#allocation31_spill] sm:$0xff] }
 0x3e9   :  { %3137 = vperm.xlu0 %4833, %v2459_v49   ;;  %v2437_v49 = vsub.f32 %v9246_v58, %v7717_v8 }
 0x3ea   :  { %v3192_v43 = vadd.f32 %v7788_v48, %v2808_v1  ;;  %v7887_v30 = vpop.permute.xlu1 %2288  ;;  %4567 = vmatpush3.bf16.msra.mxu1 %v3268_v13  ;;  %v9247_v1 = vld [vmem:[#allocation26_spill] sm:$0xff]  ;;  %v9248_v13 = vld [vmem:[#allocation24_spill] sm:$0xff] }
 0x3eb   :  { %v2504_v51 = vpop.permute.xlu0 %2503 }
 0x3ec   :  { %v2793_v33 = vmul.f32 %v2504_v51, %v9233_v63  ;;  %2638 = vperm.xlu1 %4820, %v9234_v28   ;;  %v3277_v42 = vpack.c.bf16 %v3193_v38, %v3192_v43  ;;  %v9249_v38 = vld [vmem:[#allocation46_spill] sm:$0xff]  ;;  %v9250_v43 = vld [vmem:[#allocation71_spill] sm:$0xff]  ;;  %v9252_v28 = vld [vmem:[#allocation65_spill] sm:$0xff] }
 0x3ed   :  { %3147 = vperm.xlu0 %4833, %v2461_v25   ;;  %v9251_v51 = vld [vmem:[#allocation122_spill] sm:$0xff] }
 0x3ee   :  { %v3177_v48 = vadd.f32 %v7814_v20, %v2793_v33  ;;  %v2898_v39 = vpop.permute.xlu1 %2897  ;;  %4568 = vmatprep.subr.bf16.mxu1 %v3277_v42  ;;  %v2794_v20 = vmul.f32 %v7841_v62, %v9242_v40  ;;  %v2454_v42 = vsub.f32 %v9252_v28, %v7770_v50  ;;  %v9257_v40 = vld [vmem:[#allocation29_spill] sm:$0xff] }
 0x3ef   :  { %v2589_v7 = vpop.permute.xlu0 %2588 }
 0x3f0   :  { %v2810_v24 = vmul.f32 %v2589_v7, %v9240_v26  ;;  %4821 = vset.pattern.permute.xlu1 %v9066_v57  ;;  %v3269_v15 = vpack.c.bf16 %v3177_v48, %v3176_v19  ;;  %v3178_v59 = vadd.f32 %v9245_v54, %v2794_v20  ;;  %v9254_v48 = vld [vmem:[#allocation114_spill] sm:$0xff] }
 0x3f1   :  { %3102 = vperm.xlu1 %4821, %v2452_v46   ;;  %3157 = vperm.xlu0 %4833, %v2463_v27   ;;  %v9256_v7 = vld [vmem:[#allocation58_spill] sm:$0xff] }
 0x3f2   :  { %v3194_v29 = vadd.f32 %v2973_v14, %v2810_v24  ;;  %4569 = vmatpush3.bf16.msra.mxu1 %v3269_v15  ;;  %v2439_v26 = vsub.f32 %v9256_v7, %v7807_v0  ;;  %v9259_v0 = vld [vmem:[#allocation54_spill] sm:$0xff] }
 0x3f3   :  { %v2604_v36 = vpop.permute.xlu1 %2603  ;;  %v2514_v23 = vpop.permute.xlu0 %2513 }
 0x3f4   :  { %v2795_v61 = vmul.f32 %v2514_v23, %v9244_v18  ;;  %v3278_v2 = vpack.c.bf16 %v3195_v53, %v3194_v29  ;;  %v2813_v44 = vmul.f32 %v2604_v36, %v9247_v1  ;;  %v9258_v29 = vld [vmem:[#allocation123_spill] sm:$0xff] }
 0x3f5   :  { %3022 = vperm.xlu1 %4821, %v2436_v9   ;;  %v9260_v9 = vld [vmem:[#allocation116_spill] sm:$0xff]  ;;  %v9261_v23 = vld [vmem:[#allocation59_spill] sm:$0xff] }
 0x3f6   :  { %v3179_v35 = vadd.f32 %v2898_v39, %v2795_v61  ;;  %4570 = vmatprep.subr.bf16.mxu1 %v3278_v2  ;;  %v3197_v8 = vadd.f32 %v9250_v43, %v2813_v44  ;;  %v2438_v39 = vsub.f32 %v9254_v48, %v7800_v4  ;;  %v2456_v36 = vsub.f32 %v9260_v9, %v7855_v55  ;;  %v9263_v55 = vld [vmem:[#allocation119_spill] sm:$0xff]  ;;  %v9266_v43 = vld [vmem:[#allocation53_spill] sm:$0xff] }
 0x3f7   :  { %v2519_v21 = vpop.permute.xlu1 %2518  ;;  %v2599_v62 = vpop.permute.xlu0 %2598 }
 0x3f8   :  { %v3270_v14 = vpack.c.bf16 %v3179_v35, %v3178_v59  ;;  %v2812_v34 = vmul.f32 %v2599_v62, %v9248_v13  ;;  %v2796_v31 = vmul.f32 %v2519_v21, %v9253_v56  ;;  %v9262_v35 = vld [vmem:[#allocation118_spill] sm:$0xff]  ;;  %v9265_v13 = vld [vmem:[#allocation57_spill] sm:$0xff]  ;;  %v9269_v56 = vld [vmem:[#allocation35_spill] sm:$0xff] }
 0x3f9   :  { %3027 = vperm.xlu1 %4821, %v2437_v49   ;;  %v2440_v58 = vsub.f32 %v9262_v35, %v7876_v52 }
 0x3fa   :  { %4571 = vmatpush3.bf16.msra.mxu1 %v3270_v14  ;;  %v3180_v50 = vadd.f32 %v7727_v16, %v2796_v31  ;;  %v2441_v14 = vsub.f32 %v9263_v55, %v7887_v30 }
 0x3fb   :  { %v7912_v6 = vpop.permute.xlu1 %2322  ;;  %v2524_v45 = vpop.permute.xlu0 %2523 }
 0x3fc   :  { %v2797_v32 = vmul.f32 %v2524_v45, %v9255_v22 }
 0x3fd   :  { %4822 = vset.pattern.permute.xlu1 %v9098_v12 }
 0x3fe   :  { %2733 = vperm.xlu1 %4822, %v9249_v38  }
 0x3ff   :  { %v2983_v3 = vpop.permute.xlu1 %2982  ;;  %v2609_v37 = vpop.permute.xlu0 %2608 }
 0x400   :  { %v3196_v41 = vadd.f32 %v2983_v3, %v2812_v34  ;;  %v2814_v18 = vmul.f32 %v2609_v37, %v9261_v23 }
 0x402   :  { %v3279_v25 = vpack.c.bf16 %v3197_v8, %v3196_v41  ;;  %2648 = vperm.xlu1 %4822, %v9251_v51  }
 0x403   :  { %v7920_v63 = vpop.permute.xlu1 %2290  ;;  %v2534_v33 = vpop.permute.xlu0 %2533 }
 0x404   :  { %4572 = vmatprep.subr.bf16.mxu1 %v3279_v25  ;;  %v2799_v34 = vmul.f32 %v2534_v33, %v9265_v13  ;;  %v9267_v25 = vld [vmem:[#allocation45_spill] sm:$0xff]  ;;  %v9268_v33 = vld [vmem:[#allocation72_spill] sm:$0xff]  ;;  %v2442_v31 = vsub.f32 %v9269_v56, %v7920_v63 }
 0x405   :  { %v2458_v28 = vsub.f32 %v9268_v33, %v7912_v6  ;;  %v9272_v6 = vld [vmem:[#allocation124_spill] sm:$0xff] }
 0x406   :  { %4823 = vset.pattern.permute.xlu1 %v9066_v57 }
 0x407   :  { %v7925_v47 = vpop.permute.xlu1 %2292  ;;  %3112 = vperm.xlu1 %4823, %v2454_v42   ;;  %v7927_v19 = vpop.permute.xlu0 %2618 }
 0x40b   :  { %v2908_v46 = vpop.permute.xlu1 %2907  ;;  %3032 = vperm.xlu1 %4823, %v2438_v39   ;;  %v7933_v10 = vpop.permute.xlu0 %2543  ;;  %v9270_v39 = vld [vmem:[#allocation61_spill] sm:$0xff] }
 0x40c   :  { %v3181_v27 = vadd.f32 %v2908_v46, %v2797_v32  ;;  %v9271_v46 = vld [vmem:[#allocation64_spill] sm:$0xff] }
 0x40e   :  { %v3271_v24 = vpack.c.bf16 %v3181_v27, %v3180_v50  ;;  %v2816_v50 = vmul.f32 %v7927_v19, %v9271_v46  ;;  %v2443_v27 = vsub.f32 %v9272_v6, %v7925_v47  ;;  %v9275_v47 = vld [vmem:[#allocation66_spill] sm:$0xff] }
 0x40f   :  { %3037 = vperm.xlu1 %4823, %v2439_v26   ;;  %v7938_v15 = vpop.permute.xlu0 %2334  ;;  %v9273_v26 = vld [vmem:[#allocation143_spill] sm:$0xff]  ;;  %v9286_v46 = vld [vmem:[#allocation78_spill] sm:$0xff] }
 0x410   :  { %v2614_v60 = vpop.permute.xlu1 %2613  ;;  %4573 = vmatpush3.bf16.msra.mxu1 %v3271_v24  ;;  %v4893_v6 = vld [vmem:[%s8703_s3 + $0x40] ss:$16 sps:$4 sm:$0xff]  }
 0x411   :  { %v2815_v17 = vmul.f32 %v2614_v60, %v9259_v0  ;;  %v9274_v0 = vld [vmem:[#allocation55_spill] sm:$0xff] }
 0x413   :  { %4824 = vset.pattern.permute.xlu1 %v9098_v12  ;;  %v7941_v4 = vpop.permute.xlu0 %2302  ;;  %v3199_v54 = vadd.f32 %v7752_v11, %v2815_v17  ;;  %v9264_v11 = vld [vmem:[#allocation60_spill] sm:$0xff] }
 0x414   :  { %v2529_v53 = vpop.permute.xlu1 %2528  ;;  %2743 = vperm.xlu1 %4824, %v9257_v40  }
 0x415   :  { %v2798_v44 = vmul.f32 %v2529_v53, %v9264_v11 }
 0x417   :  { %v7944_v20 = vpop.permute.xlu0 %2708  ;;  %v3182_v3 = vadd.f32 %v7766_v5, %v2798_v44  ;;  %v9280_v44 = vld [vmem:[#allocation141_spill] sm:$0xff] }
 0x418   :  { %v7946_v16 = vpop.permute.xlu1 %2326  ;;  %2658 = vperm.xlu1 %4824, %v9258_v29  }
 0x41b   :  { %v7953_v61 = vpop.permute.xlu0 %2633 }
 0x41c   :  { %v2993_v2 = vpop.permute.xlu1 %2992  ;;  %4825 = vset.pattern.permute.xlu1 %v9066_v57 }
 0x41d   :  { %v3198_v59 = vadd.f32 %v2993_v2, %v2814_v18  ;;  %3122 = vperm.xlu1 %4825, %v2456_v36   ;;  %v9276_v36 = vld [vmem:[#allocation62_spill] sm:$0xff]  ;;  %v9277_v18 = vld [vmem:[#allocation41_spill] sm:$0xff] }
 0x41e   :  { %v2801_v23 = vmul.f32 %v7933_v10, %v9276_v36  ;;  %v4885_v10 = vld [vmem:[%s8703_s3] ss:$16 sps:$4 sm:$0xff]  }
 0x41f   :  { %v3280_v49 = vpack.c.bf16 %v3199_v54, %v3198_v59  ;;  %v7959_v21 = vpop.permute.xlu0 %2718  ;;  %v9278_v54 = vld [vmem:[#allocation104_spill] sm:$0xff] }
 0x420   :  { %v7961_v62 = vpop.permute.xlu1 %2294 }
 0x421   :  { %3042 = vperm.xlu1 %4825, %v2440_v58   ;;  %4574 = vmatprep.subr.bf16.mxu1 %v3280_v49  ;;  %v9279_v58 = vld [vmem:[#allocation103_spill] sm:$0xff] }
 0x422   :  { %v2460_v49 = vsub.f32 %v9279_v58, %v7946_v16  ;;  %v9281_v16 = vld [vmem:[#allocation73_spill] sm:$0xff] }
 0x423   :  { %v7965_v45 = vpop.permute.xlu0 %2643 }
 0x424   :  { %v7967_v1 = vpop.permute.xlu1 %2296 }
 0x425   :  { %3047 = vperm.xlu1 %4825, %v2441_v14  }
 0x427   :  { %v7971_v52 = vpop.permute.xlu0 %2728 }
 0x428   :  { %v2918_v38 = vpop.permute.xlu1 %2917 }
 0x429   :  { %v3183_v37 = vadd.f32 %v2918_v38, %v2799_v34  ;;  %4826 = vset.pattern.permute.xlu1 %v9098_v12  ;;  %v4888_v34 = vld [vmem:[%s8703_s3 + $0x24] ss:$16 sps:$4 sm:$0xff]   ;;  %v2444_v38 = vsub.f32 %v9281_v16, %v7961_v62  ;;  %v4890_v62 = vld [vmem:[%s8703_s3 + $0x20] ss:$16 sps:$4 sm:$0xff]  }
 0x42a   :  { %2753 = vperm.xlu1 %4826, %v9266_v43   ;;  %v9282_v43 = vld [vmem:[#allocation74_spill] sm:$0xff] }
 0x42b   :  { %v3272_v30 = vpack.c.bf16 %v3183_v37, %v3182_v3  ;;  %v7976_v8 = vpop.permute.xlu0 %2653 }
 0x42d   :  { %v2624_v41 = vpop.permute.xlu1 %2623  ;;  %4575 = vmatpush3.bf16.msra.mxu1 %v3272_v30  ;;  %v2445_v30 = vsub.f32 %v9282_v43, %v7967_v1  ;;  %v9284_v1 = vld [vmem:[#allocation75_spill] sm:$0xff] }
 0x42e   :  { %2668 = vperm.xlu1 %4826, %v9267_v25   ;;  %v2817_v22 = vmul.f32 %v2624_v41, %v9270_v39  ;;  %v9283_v25 = vmov 0   ;;  %v9285_v39 = vld [vmem:[#allocation76_spill] sm:$0xff] }
 0x42f   :  { %v7979_v51 = vpop.permute.xlu0 %2738 }
 0x430   :  { %v3201_v24 = vadd.f32 %v9273_v26, %v2817_v22  ;;  %v2834_v22 = vmul.f32 %v7944_v20, %v9285_v39  ;;  %v4894_v26 = vld [vmem:[%s8703_s3 + $0x64] ss:$16 sps:$4 sm:$0xff]  }
 0x431   :  { %v2539_v42 = vpop.permute.xlu1 %2538 }
 0x432   :  { %4827 = vset.pattern.permute.xlu1 %v9066_v57  ;;  %v2800_v17 = vmul.f32 %v2539_v42, %v9275_v47 }
 0x433   :  { %3132 = vperm.xlu1 %4827, %v2458_v28   ;;  %v7984_v5 = vpop.permute.xlu0 %2663  ;;  %v4891_v28 = vld [vmem:[%s8703_s3 + $0x44] ss:$16 sps:$4 sm:$0xff]  }
 0x434   :  { %v3184_v59 = vadd.f32 %v9278_v54, %v2800_v17  ;;  %v9289_v17 = vld [vmem:[#allocation79_spill] sm:$0xff] }
 0x435   :  { %v7988_v48 = vpop.permute.xlu1 %2330  ;;  %v2819_v36 = vmul.f32 %v7953_v61, %v9289_v17 }
 0x437   :  { %3052 = vperm.xlu1 %4827, %v2442_v31   ;;  %v7991_v32 = vpop.permute.xlu0 %2748 }
 0x439   :  { %v3003_v7 = vpop.permute.xlu1 %3002 }
 0x43a   :  { %v3200_v60 = vadd.f32 %v3003_v7, %v2816_v50 }
 0x43b   :  { %3057 = vperm.xlu1 %4827, %v2443_v27   ;;  %v7998_v53 = vpop.permute.xlu0 %2673  ;;  %v9287_v27 = vld [vmem:[#allocation142_spill] sm:$0xff] }
 0x43c   :  { %v3281_v63 = vpack.c.bf16 %v3201_v24, %v3200_v60 }
 0x43d   :  { %v8000_v40 = vpop.permute.xlu1 %2298 }
 0x43e   :  { %4576 = vmatprep.subr.bf16.mxu1 %v3281_v63  ;;  %v9288_v63 = vld [vmem:[#allocation140_spill] sm:$0xff] }
 0x43f   :  { %4828 = vset.pattern.permute.xlu1 %v9098_v12  ;;  %v8003_v29 = vpop.permute.xlu0 %2758 }
 0x440   :  { %2763 = vperm.xlu1 %4828, %v9274_v0   ;;  %v2462_v0 = vsub.f32 %v9288_v63, %v7988_v48  ;;  %v4896_v48 = vld [vmem:[%s8703_s3 + $0x60] ss:$16 sps:$4 sm:$0xff]  }
 0x441   :  { %v8006_v19 = vpop.permute.xlu1 %2300 }
 0x443   :  { %v8009_v9 = vpop.permute.xlu0 %2683 }
 0x444   :  { %2678 = vperm.xlu1 %4828, %v9277_v18  }
 0x445   :  { %v2928_v2 = vpop.permute.xlu1 %2927 }
 0x446   :  { %v3185_v35 = vadd.f32 %v2928_v2, %v2801_v23  ;;  %v9290_v23 = vld [vmem:[#allocation56_spill] sm:$0xff]  ;;  %v9291_v2 = vld [vmem:[#allocation77_spill] sm:$0xff] }
 0x447   :  { %v8017_v55 = vpop.permute.xlu0 %2768  ;;  %v2446_v18 = vsub.f32 %v9290_v23, %v8000_v40  ;;  %v4908_v23 = vld [vmem:[%s8703_s3 + $0xe0] ss:$16 sps:$4 sm:$0xff]  }
 0x448   :  { %v3273_v14 = vpack.c.bf16 %v3185_v35, %v3184_v59  ;;  %4829 = vset.pattern.permute.xlu1 %v9066_v57  ;;  %v4897_v35 = vld [vmem:[%s8703_s3 + $0x84] ss:$16 sps:$4 sm:$0xff]  }
 0x449   :  { %3142 = vperm.xlu1 %4829, %v2460_v49   ;;  %v2337_v11 = vpop.permute.xlu1 %2336 }
 0x44a   :  { %v2465_v13 = vsub.f32 %v9280_v44, %v2337_v11  ;;  %4577 = vmatpush3.bf16.msra.mxu1 %v3273_v14  ;;  %v9292_v14 = vld [vmem:[#allocation101_spill] sm:$0xff] }
 0x44b   :  { %v8029_v3 = vpop.permute.xlu0 %2693  ;;  %v2447_v61 = vsub.f32 %v9292_v14, %v8006_v19  ;;  %v4900_v44 = vld [vmem:[%s8703_s3 + $0xa4] ss:$16 sps:$4 sm:$0xff]  }
 0x44c   :  { %3167 = vperm.xlu0 %4833, %v2465_v13   ;;  %v9294_v19 = vld [vmem:[#allocation81_spill] sm:$0xff] }
 0x44d   :  { %3062 = vperm.xlu1 %4829, %v2444_v38   ;;  %v8031_v37 = vpop.permute.xlu1 %2304  ;;  %3587 = vmatmul.mubr.bf16.vlgmr.msra.gmra.mrb[0].mxu1 %v4885_v10  ;;  %v4899_v10 = vld [vmem:[%s8703_s3 + $0x80] ss:$16 sps:$4 sm:$0xff]  }
 0x44e   :  { %3594 = vmatprep.mubr.bf16.mxu1 %v4888_v34  ;;  %v9293_v34 = vld [vmem:[#allocation100_spill] sm:$0xff] }
 0x44f   :  { %v8035_v41 = vpop.permute.xlu0 %2778  ;;  %v9295_v38 = vld [vmem:[#allocation80_spill] sm:$0xff] }
 0x450   :  { %4835 = vset.pattern.permute.xlu0 %v9283_v25  ;;  %v2836_v43 = vmul.f32 %v7959_v21, %v9295_v38 }
 0x451   :  { %3067 = vperm.xlu1 %4829, %v2445_v30   ;;  %v2714_v33 = vpop.permute.xlu1 %2713 }
 0x452   :  { %v2835_v50 = vmul.f32 %v2714_v33, %v9286_v46  ;;  %v9296_v33 = vld [vmem:[#allocation49_spill] sm:$0xff] }
 0x453   :  { %v8044_v42 = vpop.permute.xlu0 %2703  ;;  %v4903_v46 = vld [vmem:[%s8703_s3 + $0xc4] ss:$16 sps:$4 sm:$0xff]  }
 0x455   :  { %4830 = vset.pattern.permute.xlu1 %v9098_v12  ;;  %v2629_v56 = vpop.permute.xlu1 %2628  ;;  %3595 = vmatmul.mubr.bf16.gmra.mrb[4].mxu1 %v4890_v62 }
 0x456   :  { %2773 = vperm.xlu1 %4830, %v9284_v1   ;;  %3602 = vmatprep.mubr.bf16.mxu1 %v4891_v28  ;;  %v2818_v54 = vmul.f32 %v2629_v56, %v9291_v2  ;;  %v4902_v1 = vld [vmem:[%s8703_s3 + $0xa0] ss:$16 sps:$4 sm:$0xff]  }
 0x458   :  { %v3098_v31 = vpop.permute.xlu0 %3097 }
 0x459   :  { %v3219_v24 = vadd.f32 %v3098_v31, %v2835_v50  ;;  %v9297_v31 = vld [vmem:[#allocation69_spill] sm:$0xff]  ;;  %v9298_v50 = vld [vmem:[#allocation127_spill] sm:$0xff] }
 0x45a   :  { %2688 = vperm.xlu1 %4830, %v9287_v27   ;;  %v3093_v7 = vpop.permute.xlu1 %3092  ;;  %v2464_v39 = vsub.f32 %v9297_v31, %v7938_v15  ;;  %v9299_v27 = vld [vmem:[#allocation83_spill] sm:$0xff] }
 0x45b   :  { %v3218_v60 = vadd.f32 %v3093_v7, %v2834_v22  ;;  %v2821_v7 = vmul.f32 %v7965_v45, %v9299_v27  ;;  %v8139_v31 = vld [vmem:[%s8704_s4 + $0x18] sm:$0xff]  ;;  %v9309_v27 = vld [vmem:[#allocation90_spill] sm:$0xff] }
 0x45c   :  { %v3108_v30 = vpop.permute.xlu0 %3107 }
 0x45d   :  { %v3290_v47 = vpack.c.bf16 %v3219_v24, %v3218_v60  ;;  %3603 = vmatmul.mubr.bf16.gmra.mrb[8].mxu1 %v4893_v6  ;;  %v2448_v6 = vsub.f32 %v9298_v50, %v7941_v4  ;;  %v4906_v4 = vld [vmem:[%s8703_s3 + $0xe4] ss:$16 sps:$4 sm:$0xff]  }
 0x45e   :  { %4831 = vset.pattern.permute.xlu1 %v9066_v57  ;;  %v3013_v20 = vpop.permute.xlu1 %3012  ;;  %3610 = vmatprep.mubr.bf16.mxu1 %v4894_v26  ;;  %v9300_v26 = vld [vmem:[#allocation82_spill] sm:$0xff]  ;;  %v9308_v50 = vld [vmem:[#allocation91_spill] sm:$0xff] }
 0x45f   :  { %3152 = vperm.xlu1 %4831, %v2462_v0   ;;  %4626 = vmatprep.subr.bf16.mxu1 %v3290_v47  ;;  %v3202_v58 = vadd.f32 %v3013_v20, %v2818_v54  ;;  %v4905_v0 = vld [vmem:[%s8703_s3 + $0xc0] ss:$16 sps:$4 sm:$0xff]  }
 0x460   :  { %v9301_v47 = vld [vmem:[#allocation129_spill] sm:$0xff]  ;;  %v9303_v54 = vld [vmem:[#allocation84_spill] sm:$0xff] }
 0x461   :  { %v2449_v20 = vsub.f32 %v9301_v47, %v8031_v37  ;;  %v4911_v37 = vld [vmem:[%s8703_s3 + $0xc] ss:$16 sps:$4 sm:$0xff]  }
 0x462   :  { %v3018_v59 = vpop.permute.xlu1 %3017  ;;  %v8166_v47 = vld [vmem:[%s8704_s4 + $0x38] sm:$0xff] }
 0x463   :  { %v3203_v49 = vadd.f32 %v3018_v59, %v2819_v36  ;;  %3072 = vperm.xlu1 %4831, %v2446_v18   ;;  %v9302_v18 = vld [vmem:[#allocation85_spill] sm:$0xff]  ;;  %v3118_v59 = vpop.permute.xlu0 %3117 }
 0x465   :  { %v3282_v11 = vpack.c.bf16 %v3203_v49, %v3202_v58  ;;  %3611 = vmatmul.mubr.bf16.gmra.mrb[12].mxu1 %v4896_v48  ;;  %v2838_v48 = vmul.f32 %v7971_v52, %v9303_v54  ;;  %v8124_v52 = vld [vmem:[%s8704_s4] sm:$0xff] }
 0x466   :  { %3618 = vmatprep.mubr.bf16.mxu1 %v4897_v35  ;;  %3316 = vperm.xlu0 %4835, %v8124_v52  }
 0x467   :  { %3077 = vperm.xlu1 %4831, %v2447_v61   ;;  %v2724_v40 = vpop.permute.xlu1 %2723  ;;  %4627 = vmatpush3.bf16.msra.mxu1 %v3282_v11  ;;  %v9304_v11 = vld [vmem:[#allocation87_spill] sm:$0xff] }
 0x468   :  { %v2837_v16 = vmul.f32 %v2724_v40, %v9294_v19  ;;  %v2823_v40 = vmul.f32 %v7976_v8, %v9304_v11 }
 0x46a   :  { %v3221_v28 = vadd.f32 %v3108_v30, %v2837_v16  ;;  %v9306_v30 = vld [vmem:[#allocation89_spill] sm:$0xff]  ;;  %3331 = vperm.xlu0 %4835, %v8139_v31  }
 0x46b   :  { %4832 = vset.pattern.permute.xlu1 %v9098_v12  ;;  %v2639_v13 = vpop.permute.xlu1 %2638 }
 0x46c   :  { %2783 = vperm.xlu1 %4832, %v9293_v34   ;;  %v2820_v24 = vmul.f32 %v2639_v13, %v9300_v26 }
 0x46d   :  { %3619 = vmatmul.mubr.bf16.gmra.mrb[16].mxu1 %v4899_v10  ;;  %v9305_v10 = vld [vmem:[#allocation86_spill] sm:$0xff] }
 0x46e   :  { %3626 = vmatprep.mubr.bf16.mxu1 %v4900_v44 }
 0x470   :  { %2698 = vperm.xlu1 %4832, %v9296_v33   ;;  %v3103_v62 = vpop.permute.xlu1 %3102 }
 0x471   :  { %v3220_v56 = vadd.f32 %v3103_v62, %v2836_v43  ;;  %v8129_v43 = vld [vmem:[%s8704_s4 + $0x8] sm:$0xff]  ;;  %v9307_v62 = vld [vmem:[#allocation88_spill] sm:$0xff] }
 0x473   :  { %v3291_v22 = vpack.c.bf16 %v3221_v28, %v3220_v56  ;;  %v2840_v28 = vmul.f32 %v7979_v51, %v9307_v62  ;;  %v3128_v56 = vpop.permute.xlu0 %3127 }
 0x474   :  { %4834 = vset.pattern.permute.xlu1 %v9066_v57  ;;  %v3023_v21 = vpop.permute.xlu1 %3022 }
 0x475   :  { %3162 = vperm.xlu1 %4834, %v2464_v39   ;;  %4628 = vmatprep.subr.bf16.mxu1 %v3291_v22  ;;  %v3204_v60 = vadd.f32 %v3023_v21, %v2820_v24  ;;  %v8144_v39 = vld [vmem:[%s8704_s4 + $0x10] sm:$0xff]  ;;  %v8154_v24 = vld [vmem:[%s8704_s4 + $0x28] sm:$0xff] }
 0x476   :  { %3627 = vmatmul.mubr.bf16.gmra.mrb[20].mxu1 %v4902_v1  ;;  %3341 = vperm.xlu0 %4835, %v8154_v24  }
 0x477   :  { %3634 = vmatprep.mubr.bf16.mxu1 %v4903_v46 }
 0x478   :  { %v3028_v15 = vpop.permute.xlu1 %3027 }
 0x479   :  { %v3205_v63 = vadd.f32 %v3028_v15, %v2821_v7  ;;  %3082 = vperm.xlu1 %4834, %v2448_v6   ;;  %v2825_v6 = vmul.f32 %v7984_v5, %v9308_v50  ;;  %v8159_v15 = vld [vmem:[%s8704_s4 + $0x20] sm:$0xff] }
 0x47a   :  { %3351 = vperm.xlu0 %4835, %v8166_v47  }
 0x47b   :  { %v3283_v17 = vpack.c.bf16 %v3205_v63, %v3204_v60 }
 0x47d   :  { %v2734_v45 = vpop.permute.xlu1 %2733  ;;  %3087 = vperm.xlu1 %4834, %v2449_v20   ;;  %4629 = vmatpush3.bf16.msra.mxu1 %v3283_v17  ;;  %v8171_v20 = vld [vmem:[%s8704_s4 + $0x30] sm:$0xff] }
 0x47e   :  { %3635 = vmatmul.mubr.bf16.gmra.mrb[24].mxu1 %v4905_v0  ;;  %v2839_v2 = vmul.f32 %v2734_v45, %v9302_v18  ;;  %v3138_v18 = vpop.permute.xlu0 %3137 }
 0x47f   :  { %3642 = vmatprep.mubr.bf16.mxu1 %v4906_v4  ;;  %v9310_v4 = vld [vmem:[#allocation93_spill] sm:$0xff] }
 0x480   :  { %v3223_v58 = vadd.f32 %v3118_v59, %v2839_v2  ;;  %v3306_v59 = vld [vmem:[%s8704_s4 + $0x40] sm:$0xff] }
 0x481   :  { %v2649_v36 = vpop.permute.xlu1 %2648  ;;  %4836 = vset.pattern.permute.xlu1 %v9283_v25 }
 0x482   :  { %v2822_v44 = vmul.f32 %v2649_v36, %v9305_v10  ;;  %3321 = vperm.xlu1 %4836, %v8129_v43   ;;  %v9311_v36 = vld [vmem:[#allocation92_spill] sm:$0xff] }
 0x486   :  { %v3113_v35 = vpop.permute.xlu1 %3112  ;;  %3643 = vmatmul.mubr.bf16.gmra.mrb[28].mxu1 %v4908_v23  ;;  %3326 = vperm.xlu1 %4836, %v8144_v39   ;;  %v2842_v23 = vmul.f32 %v7991_v32, %v9311_v36  ;;  %v9312_v32 = vld [vmem:[#allocation95_spill] sm:$0xff]  ;;  %v9319_v36 = vld [vmem:[#allocation34_spill] sm:$0xff] }
 0x487   :  { %v3222_v49 = vadd.f32 %v3113_v35, %v2838_v48  ;;  %3683 = vmatprep.mubr.bf16.mxu1 %v4911_v37  ;;  %v8181_v48 = vld [vmem:[%s8704_s4 + $0x48] sm:$0xff] }
 0x488   :  { %3361 = vperm.xlu0 %4835, %v8181_v48  }
 0x489   :  { %v3292_v14 = vpack.c.bf16 %v3223_v58, %v3222_v49  ;;  %v2827_v49 = vmul.f32 %v7998_v53, %v9312_v32  ;;  %v3311_v53 = vld [vmem:[%s8704_s4 + $0x68] sm:$0xff]  ;;  %v9321_v32 = vld [vmem:[#allocation36_spill] sm:$0xff] }
 0x48a   :  { %v3033_v61 = vpop.permute.xlu1 %3032  ;;  %3336 = vperm.xlu1 %4836, %v8159_v15  }
 0x48b   :  { %4630 = vmatprep.subr.bf16.mxu1 %v3292_v14  ;;  %v3206_v34 = vadd.f32 %v3033_v61, %v2822_v44  ;;  %v9313_v14 = vld [vmem:[#allocation94_spill] sm:$0xff]  ;;  %v3309_v44 = vld [vmem:[%s8704_s4 + $0x58] sm:$0xff] }
 0x48c   :  { %3371 = vperm.xlu0 %4835, %v3309_v44  }
 0x48e   :  { %v3038_v13 = vpop.permute.xlu1 %3037  ;;  %3346 = vperm.xlu1 %4836, %v8171_v20  }
 0x48f   :  { %v3207_v19 = vadd.f32 %v3038_v13, %v2823_v40  ;;  %v3308_v13 = vld [vmem:[%s8704_s4 + $0x50] sm:$0xff] }
 0x490   :  { %3381 = vperm.xlu0 %4835, %v3311_v53  }
 0x491   :  { %v3284_v16 = vpack.c.bf16 %v3207_v19, %v3206_v34  ;;  %v3310_v19 = vld [vmem:[%s8704_s4 + $0x60] sm:$0xff] }
 0x492   :  { %3356 = vperm.xlu1 %4836, %v3306_v59  }
 0x493   :  { %v2744_v38 = vpop.permute.xlu1 %2743  ;;  %4631 = vmatpush3.bf16.msra.mxu1 %v3284_v16 }
 0x494   :  { %v2841_v33 = vmul.f32 %v2744_v38, %v9306_v30  ;;  %v3313_v38 = vld [vmem:[%s8704_s4 + $0x78] sm:$0xff] }
 0x495   :  { %3391 = vperm.xlu0 %4835, %v3313_v38  }
 0x496   :  { %v3225_v22 = vadd.f32 %v3128_v56, %v2841_v33  ;;  %3366 = vperm.xlu1 %4836, %v3308_v13   ;;  %v9314_v33 = vld [vmem:[#allocation97_spill] sm:$0xff] }
 0x497   :  { %v2659_v8 = vpop.permute.xlu1 %2658 }
 0x498   :  { %v2824_v7 = vmul.f32 %v2659_v8, %v9309_v27  ;;  %v3312_v8 = vld [vmem:[%s8704_s4 + $0x70] sm:$0xff] }
 0x499   :  { %4838 = vset.pattern.permute.xlu0 %v9098_v12 }
 0x49a   :  { %3376 = vperm.xlu1 %4836, %v3310_v19  }
 0x49c   :  { %v3123_v1 = vpop.permute.xlu1 %3122 }
 0x49d   :  { %v3224_v46 = vadd.f32 %v3123_v1, %v2840_v28  ;;  %v9315_v28 = vld [vmem:[#allocation96_spill] sm:$0xff]  ;;  %v3148_v1 = vpop.permute.xlu0 %3147 }
 0x49e   :  { %3386 = vperm.xlu1 %4836, %v3312_v8   ;;  %v2844_v56 = vmul.f32 %v8003_v29, %v9315_v28  ;;  %v9325_v28 = vld [vmem:[#allocation40_spill] sm:$0xff] }
 0x49f   :  { %v3293_v21 = vpack.c.bf16 %v3225_v22, %v3224_v46 }
 0x4a0   :  { %v3043_v51 = vpop.permute.xlu1 %3042 }
 0x4a1   :  { %4632 = vmatprep.subr.bf16.mxu1 %v3293_v21  ;;  %v3208_v60 = vadd.f32 %v3043_v51, %v2824_v7  ;;  %v9317_v7 = vld [vmem:[#allocation98_spill] sm:$0xff] }
 0x4a2   :  { %4837 = vset.pattern.permute.xlu1 %v9098_v12 }
 0x4a4   :  { %v3048_v26 = vpop.permute.xlu1 %3047 }
 0x4a5   :  { %v3209_v63 = vadd.f32 %v3048_v26, %v2825_v6  ;;  %v9316_v6 = vld [vmem:[#allocation99_spill] sm:$0xff] }
 0x4a6   :  { %v2829_v27 = vmul.f32 %v8009_v9, %v9316_v6  ;;  %v4917_v6 = vld [vmem:[%s8703_s3 + $0x48] ss:$16 sps:$4 sm:$0xff]  }
 0x4a7   :  { %v3285_v5 = vpack.c.bf16 %v3209_v63, %v3208_v60 }
 0x4a9   :  { %v2754_v0 = vpop.permute.xlu1 %2753  ;;  %4633 = vmatpush3.bf16.msra.mxu1 %v3285_v5 }
 0x4aa   :  { %v2843_v45 = vmul.f32 %v2754_v0, %v9310_v4  ;;  %v9318_v4 = vld [vmem:[#allocation37_spill] sm:$0xff] }
 0x4ac   :  { %v3227_v37 = vadd.f32 %v3138_v18, %v2843_v45  ;;  %v3158_v18 = vpop.permute.xlu0 %3157 }
 0x4ad   :  { %v2669_v17 = vpop.permute.xlu1 %2668 }
 0x4ae   :  { %v2826_v61 = vmul.f32 %v2669_v17, %v9313_v14 }
 0x4b2   :  { %v3133_v2 = vpop.permute.xlu1 %3132 }
 0x4b3   :  { %v3226_v54 = vadd.f32 %v3133_v2, %v2842_v23  ;;  %v2846_v23 = vmul.f32 %v8017_v55, %v9319_v36  ;;  %v9322_v55 = vld [vmem:[#allocation38_spill] sm:$0xff] }
 0x4b4   :  { %v4926_v36 = vld [vmem:[%s8703_s3 + $0xa8] ss:$16 sps:$4 sm:$0xff]  }
 0x4b5   :  { %v3294_v35 = vpack.c.bf16 %v3227_v37, %v3226_v54 }
 0x4b6   :  { %v3053_v58 = vpop.permute.xlu1 %3052 }
 0x4b7   :  { %4634 = vmatprep.subr.bf16.mxu1 %v3294_v35  ;;  %v3210_v40 = vadd.f32 %v3053_v58, %v2826_v61  ;;  %v9320_v35 = vld [vmem:[#allocation30_spill] sm:$0xff] }
 0x4b8   :  { %v2831_v58 = vmul.f32 %v8029_v3, %v9320_v35  ;;  %v4929_v35 = vld [vmem:[%s8703_s3 + $0xc8] ss:$16 sps:$4 sm:$0xff]  }
 0x4ba   :  { %v3058_v11 = vpop.permute.xlu1 %3057 }
 0x4bb   :  { %v3211_v10 = vadd.f32 %v3058_v11, %v2827_v49 }
 0x4bd   :  { %v3286_v34 = vpack.c.bf16 %v3211_v10, %v3210_v40 }
 0x4bf   :  { %v2764_v16 = vpop.permute.xlu1 %2763  ;;  %4635 = vmatpush3.bf16.msra.mxu1 %v3286_v34  ;;  %v9323_v34 = vld [vmem:[#allocation32_spill] sm:$0xff] }
 0x4c0   :  { %v2845_v62 = vmul.f32 %v2764_v16, %v9314_v33  ;;  %v2848_v53 = vmul.f32 %v8035_v41, %v9323_v34  ;;  %v9324_v33 = vld [vmem:[#allocation39_spill] sm:$0xff] }
 0x4c1   :  { %v4909_v41 = vld [vmem:[%s8703_s3 + $0x8] ss:$16 sps:$4 sm:$0xff]  }
 0x4c2   :  { %v3229_v46 = vadd.f32 %v3148_v1, %v2845_v62  ;;  %v2833_v62 = vmul.f32 %v8044_v42, %v9324_v33  ;;  %v4914_v42 = vld [vmem:[%s8703_s3 + $0x28] ss:$16 sps:$4 sm:$0xff]  }
 0x4c3   :  { %v2679_v30 = vpop.permute.xlu1 %2678 }
 0x4c4   :  { %v2828_v26 = vmul.f32 %v2679_v30, %v9317_v7  ;;  %v4920_v7 = vld [vmem:[%s8703_s3 + $0x68] ss:$16 sps:$4 sm:$0xff]  }
 0x4c8   :  { %v3143_v22 = vpop.permute.xlu1 %3142 }
 0x4c9   :  { %v3228_v21 = vadd.f32 %v3143_v22, %v2844_v56 }
 0x4cb   :  { %v3295_v51 = vpack.c.bf16 %v3229_v46, %v3228_v21  ;;  %v3168_v19 = vpop.permute.xlu0 %3167 }
 0x4cc   :  { %v3063_v50 = vpop.permute.xlu1 %3062 }
 0x4cd   :  { %4636 = vmatprep.subr.bf16.mxu1 %v3295_v51  ;;  %v3212_v63 = vadd.f32 %v3063_v50, %v2828_v26  ;;  %v4912_v51 = vld [vmem:[%s8703_s3 + $0x2c] ss:$16 sps:$4 sm:$0xff]  }
 0x4ce   :  { %v4915_v50 = vld [vmem:[%s8703_s3 + $0x4c] ss:$16 sps:$4 sm:$0xff]  }
 0x4cf   :  { %v4921_v26 = vld [vmem:[%s8703_s3 + $0x8c] ss:$16 sps:$4 sm:$0xff]  }
 0x4d0   :  { %v3068_v60 = vpop.permute.xlu1 %3067 }
 0x4d1   :  { %v3213_v5 = vadd.f32 %v3068_v60, %v2829_v27  ;;  %v4918_v27 = vld [vmem:[%s8703_s3 + $0x6c] ss:$16 sps:$4 sm:$0xff]   ;;  %v4923_v60 = vld [vmem:[%s8703_s3 + $0x88] ss:$16 sps:$4 sm:$0xff]  }
 0x4d3   :  { %v3287_v29 = vpack.c.bf16 %v3213_v5, %v3212_v63  ;;  %v4924_v5 = vld [vmem:[%s8703_s3 + $0xac] ss:$16 sps:$4 sm:$0xff]  }
 0x4d5   :  { %v2774_v0 = vpop.permute.xlu1 %2773  ;;  %4637 = vmatpush3.bf16.msra.mxu1 %v3287_v29 }
 0x4d6   :  { %v2847_v45 = vmul.f32 %v2774_v0, %v9318_v4 }
 0x4d8   :  { %v3231_v37 = vadd.f32 %v3158_v18, %v2847_v45  ;;  %v4927_v18 = vld [vmem:[%s8703_s3 + $0xcc] ss:$16 sps:$4 sm:$0xff]  }
 0x4d9   :  { %v2689_v17 = vpop.permute.xlu1 %2688 }
 0x4da   :  { %v2830_v49 = vmul.f32 %v2689_v17, %v9321_v32  ;;  %v4930_v32 = vld [vmem:[%s8703_s3 + $0xec] ss:$16 sps:$4 sm:$0xff]  }
 0x4de   :  { %v3153_v2 = vpop.permute.xlu1 %3152 }
 0x4df   :  { %v3230_v54 = vadd.f32 %v3153_v2, %v2846_v23 }
 0x4e1   :  { %v3296_v59 = vpack.c.bf16 %v3231_v37, %v3230_v54 }
 0x4e2   :  { %v3073_v9 = vpop.permute.xlu1 %3072 }
 0x4e3   :  { %4638 = vmatprep.subr.bf16.mxu1 %v3296_v59  ;;  %v3214_v61 = vadd.f32 %v3073_v9, %v2830_v49 }
 0x4e6   :  { %v3078_v14 = vpop.permute.xlu1 %3077 }
 0x4e7   :  { %v3215_v11 = vadd.f32 %v3078_v14, %v2831_v58 }
 0x4e9   :  { %v3288_v40 = vpack.c.bf16 %v3215_v11, %v3214_v61 }
 0x4eb   :  { %v2784_v10 = vpop.permute.xlu1 %2783  ;;  %4639 = vmatpush3.bf16.msra.mxu1 %v3288_v40 }
 0x4ec   :  { %v2849_v13 = vmul.f32 %v2784_v10, %v9322_v55  ;;  %v4932_v10 = vld [vmem:[%s8703_s3 + $0xe8] ss:$16 sps:$4 sm:$0xff]  }
 0x4ee   :  { %v3233_v38 = vadd.f32 %v3168_v19, %v2849_v13 }
 0x4ef   :  { %v2699_v44 = vpop.permute.xlu1 %2698 }
 0x4f0   :  { %v2832_v56 = vmul.f32 %v2699_v44, %v9325_v28 }
 0x4f4   :  { %v3163_v16 = vpop.permute.xlu1 %3162 }
 0x4f5   :  { %v3232_v8 = vadd.f32 %v3163_v16, %v2848_v53 }
 0x4f7   :  { %v3297_v30 = vpack.c.bf16 %v3233_v38, %v3232_v8 }
 0x4f8   :  { %v3083_v3 = vpop.permute.xlu1 %3082 }
 0x4f9   :  { %4640 = vmatprep.subr.bf16.mxu1 %v3297_v30  ;;  %v3216_v22 = vadd.f32 %v3083_v3, %v2832_v56 }
 0x4fc   :  { %v3088_v1 = vpop.permute.xlu1 %3087 }
 0x4fd   :  { %v3217_v46 = vadd.f32 %v3088_v1, %v2833_v62 }
 0x4ff   :  { %v3289_v21 = vpack.c.bf16 %v3217_v46, %v3216_v22 }
 0x501   :  { %4641 = vmatpush3.bf16.msra.mxu1 %v3289_v21 }
 0x504   :  { %3684 = vmatmul.mubr.bf16.vlgmr.msra.gmra.mrb[32].mxu1 %v4909_v41 }
 0x505   :  { %3691 = vmatprep.mubr.bf16.mxu1 %v4912_v51 }
 0x50c   :  { %3692 = vmatmul.mubr.bf16.gmra.mrb[36].mxu1 %v4914_v42 }
 0x50d   :  { %3699 = vmatprep.mubr.bf16.mxu1 %v4915_v50 }
 0x514   :  { %3700 = vmatmul.mubr.bf16.gmra.mrb[40].mxu1 %v4917_v6 }
 0x515   :  { %3707 = vmatprep.mubr.bf16.mxu1 %v4918_v27 }
 0x51c   :  { %3708 = vmatmul.mubr.bf16.gmra.mrb[44].mxu1 %v4920_v7 }
 0x51d   :  { %3715 = vmatprep.mubr.bf16.mxu1 %v4921_v26 }
 0x520   :  { %v4578_v63 = vpop.f32.mrb[0].mxu1 }
 0x521   :  { %v4579_v29 = vpop.f32.mrb[1].mxu1 }
 0x522   :  { %v4580_v0 = vadd.f32 %v4579_v29, %v4578_v63  ;;  %v4581_v17 = vpop.f32.mrb[2].mxu1  ;;  %v3317_v29 = vpop.permute.xlu0 %3316 }
 0x523   :  { %v4582_v4 = vpop.f32.mrb[3].mxu1 }
 0x524   :  { %3716 = vmatmul.mubr.bf16.gmra.mrb[48].mxu1 %v4923_v60  ;;  %v4583_v45 = vadd.f32 %v4582_v4, %v4581_v17  ;;  %v3322_v4 = vpop.permute.xlu1 %3321 }
 0x525   :  { %3723 = vmatprep.mubr.bf16.mxu1 %v4924_v5 }
 0x528   :  { %v4584_v23 = vpop.f32.mrb[4].mxu1 }
 0x529   :  { %v4585_v2 = vpop.f32.mrb[5].mxu1 }
 0x52a   :  { %v8264_v37 = vadd.f32 %v4585_v2, %v4584_v23  ;;  %v4587_v54 = vpop.f32.mrb[6].mxu1  ;;  %v3589_v23 = vadd.f32 %v4580_v0, %v3317_v29 }
 0x52b   :  { %v4588_v59 = vpop.f32.mrb[7].mxu1 }
 0x52c   :  { %3724 = vmatmul.mubr.bf16.gmra.mrb[52].mxu1 %v4926_v36  ;;  %v8266_v9 = vadd.f32 %v4588_v59, %v4587_v54  ;;  %v3592_v59 = vadd.f32 %v4583_v45, %v3322_v4 }
 0x52d   :  { %3731 = vmatprep.mubr.bf16.mxu1 %v4927_v18 }
 0x530   :  { %v4590_v58 = vpop.f32.mrb[8].mxu1 }
 0x531   :  { %v4591_v49 = vpop.f32.mrb[9].mxu1 }
 0x532   :  { %v8274_v14 = vadd.f32 %v4591_v49, %v4590_v58  ;;  %v4593_v61 = vpop.f32.mrb[10].mxu1 }
 0x533   :  { %v4594_v11 = vpop.f32.mrb[11].mxu1 }
 0x534   :  { %3732 = vmatmul.mubr.bf16.gmra.mrb[56].mxu1 %v4929_v35  ;;  %v8276_v40 = vadd.f32 %v4594_v11, %v4593_v61 }
 0x535   :  { %3739 = vmatprep.mubr.bf16.mxu1 %v4930_v32  ;;  %v3327_v32 = vpop.permute.xlu1 %3326 }
 0x538   :  { %v4596_v44 = vpop.f32.mrb[12].mxu1 }
 0x539   :  { %v4597_v55 = vpop.f32.mrb[13].mxu1 }
 0x53a   :  { %v8281_v13 = vadd.f32 %v4597_v55, %v4596_v44  ;;  %v4599_v34 = vpop.f32.mrb[14].mxu1  ;;  %v3597_v55 = vadd.f32 %v8264_v37, %v3327_v32 }
 0x53b   :  { %v4600_v53 = vpop.f32.mrb[15].mxu1 }
 0x53c   :  { %3740 = vmatmul.mubr.bf16.gmra.mrb[60].mxu1 %v4932_v10  ;;  %v8283_v19 = vadd.f32 %v4600_v53, %v4599_v34  ;;  %v3332_v34 = vpop.permute.xlu0 %3331 }
 0x540   :  { %v4602_v16 = vpop.f32.mrb[16].mxu1 }
 0x541   :  { %v4603_v38 = vpop.f32.mrb[17].mxu1 }
 0x542   :  { %v8285_v8 = vadd.f32 %v4603_v38, %v4602_v16  ;;  %v4605_v30 = vpop.f32.mrb[18].mxu1 }
 0x543   :  { %v4606_v3 = vpop.f32.mrb[19].mxu1 }
 0x544   :  { %v8287_v33 = vadd.f32 %v4606_v3, %v4605_v30 }
 0x549   :  { %v4608_v62 = vpop.f32.mrb[20].mxu1 }
 0x54a   :  { %v4609_v28 = vpop.f32.mrb[21].mxu1 }
 0x54b   :  { %v8289_v56 = vadd.f32 %v4609_v28, %v4608_v62  ;;  %v4611_v1 = vpop.f32.mrb[22].mxu1  ;;  %v3600_v62 = vadd.f32 %v8266_v9, %v3332_v34 }
 0x54c   :  { %v4612_v22 = vpop.f32.mrb[23].mxu1 }
 0x54d   :  { %v8291_v46 = vadd.f32 %v4612_v22, %v4611_v1  ;;  %v3337_v22 = vpop.permute.xlu1 %3336 }
 0x551   :  { %v4614_v21 = vpop.f32.mrb[24].mxu1 }
 0x552   :  { %v4615_v41 = vpop.f32.mrb[25].mxu1 }
 0x553   :  { %v8293_v51 = vadd.f32 %v4615_v41, %v4614_v21  ;;  %v4617_v42 = vpop.f32.mrb[26].mxu1 }
 0x554   :  { %v4618_v50 = vpop.f32.mrb[27].mxu1 }
 0x555   :  { %v8295_v6 = vadd.f32 %v4618_v50, %v4617_v42 }
 0x559   :  { %v4620_v27 = vpop.f32.mrb[28].mxu1 }
 0x55a   :  { %v4621_v7 = vpop.f32.mrb[29].mxu1 }
 0x55b   :  { %v8297_v26 = vadd.f32 %v4621_v7, %v4620_v27  ;;  %v4623_v60 = vpop.f32.mrb[30].mxu1  ;;  %v3605_v7 = vadd.f32 %v8274_v14, %v3337_v22 }
 0x55c   :  { %v4624_v63 = vpop.f32.mrb[31].mxu1 }
 0x55d   :  { %v8299_v5 = vadd.f32 %v4624_v63, %v4623_v60  ;;  %v3342_v60 = vpop.permute.xlu0 %3341 }
 0x55e   :  { %v3608_v14 = vadd.f32 %v8276_v40, %v3342_v60 }
 0x561   :  { %v3352_v34 = vpop.permute.xlu0 %3351 }
 0x5d7   :  { %v4642_v17 = vpop.f32.mrb[32].mxu1 }
 0x5d8   :  { %v4643_v36 = vpop.f32.mrb[33].mxu1 }
 0x5d9   :  { %v4644_v18 = vadd.f32 %v4643_v36, %v4642_v17  ;;  %v4645_v2 = vpop.f32.mrb[34].mxu1 }
 0x5da   :  { %v4646_v54 = vpop.f32.mrb[35].mxu1 }
 0x5db   :  { %v3686_v35 = vadd.f32 %v4644_v18, %v3589_v23  ;;  %v4647_v58 = vadd.f32 %v4646_v54, %v4645_v2 }
 0x5dd   :  { %v8301_v49 = vmax.f32 %v3686_v35, 0.0  ;;  %v3689_v61 = vadd.f32 %v4647_v58, %v3592_v59  ;;  %v3347_v59 = vpop.permute.xlu1 %3346 }
 0x5df   :  { %v8303_v11 = vmax.f32 %v3689_v61, 0.0  ;;  %v4648_v10 = vpop.f32.mrb[36].mxu1  ;;  %v3764_v44 = vsel %vm1121_vm1, %v8301_v49, 0.0  ;;  %v3828_v30 = vmul.f32 %v8301_v49, %v8301_v49 }
 0x5e0   :  { %v4649_v0 = vpop.f32.mrb[37].mxu1  ;;  %3765 = vadd.xlane.f32.xlu1 %v3764_v44 }
 0x5e1   :  { %v4650_v53 = vadd.f32 %v4649_v0, %v4648_v10  ;;  %v4651_v16 = vpop.f32.mrb[38].mxu1  ;;  %v3767_v45 = vsel %vm1121_vm1, %v8303_v11, 0.0  ;;  %v3829_v38 = vmul.f32 %v8303_v11, %v8303_v11  ;;  %v3844_v42 = vsel %vm1121_vm1, %v3828_v30, 0.0 }
 0x5e2   :  { %v4652_v3 = vpop.f32.mrb[39].mxu1  ;;  %3768 = vadd.xlane.f32.xlu0 %v3767_v45 }
 0x5e3   :  { %v3694_v28 = vadd.f32 %v4650_v53, %v3597_v55  ;;  %v4653_v37 = vadd.f32 %v4652_v3, %v4651_v16  ;;  %v3847_v1 = vsel %vm1121_vm1, %v3829_v38, 0.0  ;;  %v3613_v55 = vadd.f32 %v8281_v13, %v3347_v59 }
 0x5e4   :  { %3848 = vadd.xlane.f32.xlu1 %v3847_v1  ;;  %v3616_v13 = vadd.f32 %v8283_v19, %v3352_v34 }
 0x5e5   :  { %v8316_v21 = vmax.f32 %v3694_v28, 0.0  ;;  %v3697_v41 = vadd.f32 %v4653_v37, %v3600_v62  ;;  %v3357_v37 = vpop.permute.xlu1 %3356 }
 0x5e6   :  { %3845 = vadd.xlane.f32.xlu0 %v3844_v42  ;;  %v3621_v60 = vadd.f32 %v8285_v8, %v3357_v37 }
 0x5e7   :  { %v8319_v50 = vmax.f32 %v3697_v41, 0.0  ;;  %v4654_v27 = vpop.f32.mrb[40].mxu1  ;;  %v3770_v9 = vsel %vm1121_vm1, %v8316_v21, 0.0  ;;  %v3830_v36 = vmul.f32 %v8316_v21, %v8316_v21 }
 0x5e8   :  { %v4655_v63 = vpop.f32.mrb[41].mxu1 }
 0x5e9   :  { %v4656_v29 = vadd.f32 %v4655_v63, %v4654_v27  ;;  %v4657_v17 = vpop.f32.mrb[42].mxu1  ;;  %v3773_v4 = vsel %vm1121_vm1, %v8319_v50, 0.0  ;;  %v3831_v23 = vmul.f32 %v8319_v50, %v8319_v50  ;;  %v3850_v32 = vsel %vm1121_vm1, %v3830_v36, 0.0  ;;  %v3362_v63 = vpop.permute.xlu0 %3361 }
 0x5ea   :  { %v4658_v18 = vpop.f32.mrb[43].mxu1  ;;  %3771 = vadd.xlane.f32.xlu0 %v3770_v9  ;;  %3774 = vadd.xlane.f32.xlu1 %v3773_v4  ;;  %v3624_v8 = vadd.f32 %v8287_v33, %v3362_v63 }
 0x5eb   :  { %v3702_v2 = vadd.f32 %v4656_v29, %v3605_v7  ;;  %v4659_v54 = vadd.f32 %v4658_v18, %v4657_v17  ;;  %v3853_v61 = vsel %vm1121_vm1, %v3831_v23, 0.0 }
 0x5ed   :  { %v8331_v35 = vmax.f32 %v3702_v2, 0.0  ;;  %v3705_v58 = vadd.f32 %v4659_v54, %v3608_v14  ;;  %v3367_v54 = vpop.permute.xlu1 %3366 }
 0x5ee   :  { %3851 = vadd.xlane.f32.xlu0 %v3850_v32  ;;  %3854 = vadd.xlane.f32.xlu1 %v3853_v61  ;;  %v3629_v34 = vadd.f32 %v8289_v56, %v3367_v54 }
 0x5ef   :  { %v8335_v10 = vmax.f32 %v3705_v58, 0.0  ;;  %v4660_v44 = vpop.f32.mrb[44].mxu1  ;;  %v3776_v40 = vsel %vm1121_vm1, %v8331_v35, 0.0  ;;  %v3832_v38 = vmul.f32 %v8331_v35, %v8331_v35 }
 0x5f0   :  { %v4661_v0 = vpop.f32.mrb[45].mxu1 }
 0x5f1   :  { %v4662_v53 = vadd.f32 %v4661_v0, %v4660_v44  ;;  %v4663_v16 = vpop.f32.mrb[46].mxu1  ;;  %v3779_v45 = vsel %vm1121_vm1, %v8335_v10, 0.0  ;;  %v3833_v30 = vmul.f32 %v8335_v10, %v8335_v10  ;;  %v3856_v41 = vsel %vm1121_vm1, %v3832_v38, 0.0  ;;  %v3372_v0 = vpop.permute.xlu0 %3371 }
 0x5f2   :  { %v4664_v3 = vpop.f32.mrb[47].mxu1  ;;  %3777 = vadd.xlane.f32.xlu0 %v3776_v40  ;;  %3780 = vadd.xlane.f32.xlu1 %v3779_v45  ;;  %v3632_v56 = vadd.f32 %v8291_v46, %v3372_v0 }
 0x5f3   :  { %v3710_v62 = vadd.f32 %v4662_v53, %v3613_v55  ;;  %v4665_v28 = vadd.f32 %v4664_v3, %v4663_v16  ;;  %v3859_v42 = vsel %vm1121_vm1, %v3833_v30, 0.0 }
 0x5f5   :  { %v8347_v1 = vmax.f32 %v3710_v62, 0.0  ;;  %v3713_v22 = vadd.f32 %v4665_v28, %v3616_v13  ;;  %v3377_v28 = vpop.permute.xlu1 %3376 }
 0x5f6   :  { %3857 = vadd.xlane.f32.xlu0 %v3856_v41  ;;  %3860 = vadd.xlane.f32.xlu1 %v3859_v42  ;;  %v3637_v63 = vadd.f32 %v8293_v51, %v3377_v28 }
 0x5f7   :  { %v8351_v27 = vmax.f32 %v3713_v22, 0.0  ;;  %v4666_v7 = vpop.f32.mrb[48].mxu1  ;;  %v3782_v19 = vsel %vm1121_vm1, %v8347_v1, 0.0  ;;  %v3834_v36 = vmul.f32 %v8347_v1, %v8347_v1 }
 0x5f8   :  { %v4667_v9 = vpop.f32.mrb[49].mxu1 }
 0x5f9   :  { %v4668_v29 = vadd.f32 %v4667_v9, %v4666_v7  ;;  %v4669_v17 = vpop.f32.mrb[50].mxu1  ;;  %v3785_v4 = vsel %vm1121_vm1, %v8351_v27, 0.0  ;;  %v3835_v23 = vmul.f32 %v8351_v27, %v8351_v27  ;;  %v3862_v32 = vsel %vm1121_vm1, %v3834_v36, 0.0  ;;  %v3382_v9 = vpop.permute.xlu0 %3381 }
 0x5fa   :  { %v4670_v18 = vpop.f32.mrb[51].mxu1  ;;  %3783 = vadd.xlane.f32.xlu0 %v3782_v19  ;;  %3786 = vadd.xlane.f32.xlu1 %v3785_v4  ;;  %v3640_v51 = vadd.f32 %v8295_v6, %v3382_v9 }
 0x5fb   :  { %v3718_v14 = vadd.f32 %v4668_v29, %v3621_v60  ;;  %v4671_v2 = vadd.f32 %v4670_v18, %v4669_v17  ;;  %v3865_v61 = vsel %vm1121_vm1, %v3835_v23, 0.0 }
 0x5fd   :  { %v8363_v59 = vmax.f32 %v3718_v14, 0.0  ;;  %v3721_v58 = vadd.f32 %v4671_v2, %v3624_v8  ;;  %v3387_v2 = vpop.permute.xlu1 %3386 }
 0x5fe   :  { %3863 = vadd.xlane.f32.xlu0 %v3862_v32  ;;  %3866 = vadd.xlane.f32.xlu1 %v3865_v61  ;;  %v3645_v0 = vadd.f32 %v8297_v26, %v3387_v2 }
 0x5ff   :  { %v8367_v44 = vmax.f32 %v3721_v58, 0.0  ;;  %v4672_v55 = vpop.f32.mrb[52].mxu1  ;;  %v3788_v33 = vsel %vm1121_vm1, %v8363_v59, 0.0  ;;  %v3836_v38 = vmul.f32 %v8363_v59, %v8363_v59 }
 0x600   :  { %v4673_v40 = vpop.f32.mrb[53].mxu1 }
 0x601   :  { %v4674_v53 = vadd.f32 %v4673_v40, %v4672_v55  ;;  %v4675_v16 = vpop.f32.mrb[54].mxu1  ;;  %v3791_v45 = vsel %vm1121_vm1, %v8367_v44, 0.0  ;;  %v3837_v30 = vmul.f32 %v8367_v44, %v8367_v44  ;;  %v3868_v41 = vsel %vm1121_vm1, %v3836_v38, 0.0  ;;  %v3392_v40 = vpop.permute.xlu0 %3391 }
 0x602   :  { %v4676_v3 = vpop.f32.mrb[55].mxu1  ;;  %3789 = vadd.xlane.f32.xlu0 %v3788_v33  ;;  %3792 = vadd.xlane.f32.xlu1 %v3791_v45  ;;  %v3648_v26 = vadd.f32 %v8299_v5, %v3392_v40 }
 0x603   :  { %v3726_v13 = vadd.f32 %v4674_v53, %v3629_v34  ;;  %v4677_v62 = vadd.f32 %v4676_v3, %v4675_v16  ;;  %v3871_v42 = vsel %vm1121_vm1, %v3837_v30, 0.0 }
 0x605   :  { %v8379_v37 = vmax.f32 %v3726_v13, 0.0  ;;  %v3729_v22 = vadd.f32 %v4677_v62, %v3632_v56 }
 0x606   :  { %3869 = vadd.xlane.f32.xlu0 %v3868_v41  ;;  %3872 = vadd.xlane.f32.xlu1 %v3871_v42 }
 0x607   :  { %v8383_v7 = vmax.f32 %v3729_v22, 0.0  ;;  %v4678_v60 = vpop.f32.mrb[56].mxu1  ;;  %v3794_v46 = vsel %vm1121_vm1, %v8379_v37, 0.0  ;;  %v3838_v36 = vmul.f32 %v8379_v37, %v8379_v37 }
 0x608   :  { %v4679_v19 = vpop.f32.mrb[57].mxu1 }
 0x609   :  { %v4680_v29 = vadd.f32 %v4679_v19, %v4678_v60  ;;  %v4681_v17 = vpop.f32.mrb[58].mxu1  ;;  %v3797_v4 = vsel %vm1121_vm1, %v8383_v7, 0.0  ;;  %v3839_v23 = vmul.f32 %v8383_v7, %v8383_v7  ;;  %v3874_v32 = vsel %vm1121_vm1, %v3838_v36, 0.0 }
 0x60a   :  { %v4682_v18 = vpop.f32.mrb[59].mxu1  ;;  %3795 = vadd.xlane.f32.xlu0 %v3794_v46  ;;  %3798 = vadd.xlane.f32.xlu1 %v3797_v4 }
 0x60b   :  { %v3734_v8 = vadd.f32 %v4680_v29, %v3637_v63  ;;  %v4683_v14 = vadd.f32 %v4682_v18, %v4681_v17  ;;  %v3877_v61 = vsel %vm1121_vm1, %v3839_v23, 0.0 }
 0x60d   :  { %v8395_v54 = vmax.f32 %v3734_v8, 0.0  ;;  %v3737_v58 = vadd.f32 %v4683_v14, %v3640_v51 }
 0x60e   :  { %3875 = vadd.xlane.f32.xlu0 %v3874_v32  ;;  %3878 = vadd.xlane.f32.xlu1 %v3877_v61 }
 0x60f   :  { %v8399_v55 = vmax.f32 %v3737_v58, 0.0  ;;  %v4684_v34 = vpop.f32.mrb[60].mxu1  ;;  %v3800_v6 = vsel %vm1121_vm1, %v8395_v54, 0.0  ;;  %v3840_v38 = vmul.f32 %v8395_v54, %v8395_v54 }
 0x610   :  { %v4685_v33 = vpop.f32.mrb[61].mxu1 }
 0x611   :  { %v4686_v53 = vadd.f32 %v4685_v33, %v4684_v34  ;;  %v4687_v16 = vpop.f32.mrb[62].mxu1  ;;  %v3803_v45 = vsel %vm1121_vm1, %v8399_v55, 0.0  ;;  %v3841_v30 = vmul.f32 %v8399_v55, %v8399_v55  ;;  %v3880_v22 = vsel %vm1121_vm1, %v3840_v38, 0.0 }
 0x612   :  { %v4688_v3 = vpop.f32.mrb[63].mxu1  ;;  %3801 = vadd.xlane.f32.xlu0 %v3800_v6  ;;  %3804 = vadd.xlane.f32.xlu1 %v3803_v45 }
 0x613   :  { %v3742_v56 = vadd.f32 %v4686_v53, %v3645_v0  ;;  %v4689_v13 = vadd.f32 %v4688_v3, %v4687_v16  ;;  %v3883_v41 = vsel %vm1121_vm1, %v3841_v30, 0.0 }
 0x615   :  { %v8411_v62 = vmax.f32 %v3742_v56, 0.0  ;;  %v3745_v28 = vadd.f32 %v4689_v13, %v3648_v26 }
 0x616   :  { %3881 = vadd.xlane.f32.xlu0 %v3880_v22  ;;  %3884 = vadd.xlane.f32.xlu1 %v3883_v41 }
 0x617   :  { %v8415_v42 = vmax.f32 %v3745_v28, 0.0  ;;  %v3806_v60 = vsel %vm1121_vm1, %v8411_v62, 0.0  ;;  %v3842_v5 = vmul.f32 %v8411_v62, %v8411_v62 }
 0x619   :  { %v3809_v63 = vsel %vm1121_vm1, %v8415_v42, 0.0  ;;  %v3843_v9 = vmul.f32 %v8415_v42, %v8415_v42  ;;  %v3886_v19 = vsel %vm1121_vm1, %v3842_v5, 0.0 }
 0x61a   :  { %3807 = vadd.xlane.f32.xlu0 %v3806_v60  ;;  %3810 = vadd.xlane.f32.xlu1 %v3809_v63 }
 0x61b   :  { %v3889_v46 = vsel %vm1121_vm1, %v3843_v9, 0.0 }
 0x61e   :  { %3887 = vadd.xlane.f32.xlu0 %v3886_v19  ;;  %3890 = vadd.xlane.f32.xlu1 %v3889_v46 }
 0x66d   :  { %v3766_v29 = vpop.xlane.xlu1 %3765 }
 0x66e   :  { %v3812_v4 = vmul.f32 0.0625, %v3766_v29 }
 0x66f   :  { %v3769_v17 = vpop.xlane.xlu0 %3768 }
 0x670   :  { %v3813_v36 = vmul.f32 0.0625, %v3769_v17  ;;  %v3908_v14 = vmul.f32 %v3812_v4, %v3812_v4 }
 0x671   :  { %v3849_v23 = vpop.xlane.xlu1 %3848 }
 0x672   :  { %v3909_v18 = vmul.f32 %v3813_v36, %v3813_v36  ;;  %v3893_v51 = vmul.f32 0.0625, %v3849_v23 }
 0x673   :  { %v3846_v8 = vpop.xlane.xlu0 %3845 }
 0x674   :  { %v3925_v2 = vsub.f32 %v3893_v51, %v3909_v18  ;;  %v3892_v58 = vmul.f32 0.0625, %v3846_v8 }
 0x676   :  { %v3941_v32 = vmax.f32 %v3925_v2, 0.0  ;;  %v3924_v61 = vsub.f32 %v3892_v58, %v3908_v14 }
 0x677   :  { %v3775_v34 = vpop.xlane.xlu1 %3774  ;;  %v3772_v0 = vpop.xlane.xlu0 %3771 }
 0x678   :  { %v3957_v40 = vadd.f32 1e-05, %v3941_v32  ;;  %v3940_v33 = vmax.f32 %v3924_v61, 0.0  ;;  %v8427_v6 = vmul.f32 0.0625, %v3775_v34  ;;  %v8429_v53 = vmul.f32 0.0625, %v3772_v0 }
 0x67a   :  { %5061 = vrsqrt.f32 %v3957_v40  ;;  %v3956_v16 = vadd.f32 1e-05, %v3940_v33  ;;  %v3911_v45 = vmul.f32 %v8427_v6, %v8427_v6  ;;  %v3910_v3 = vmul.f32 %v8429_v53, %v8429_v53 }
 0x67b   :  { %v3855_v38 = vpop.xlane.xlu1 %3854  ;;  %v3852_v30 = vpop.xlane.xlu0 %3851 }
 0x67c   :  { %5063 = vrsqrt.f32 %v3956_v16  ;;  %v3895_v26 = vmul.f32 0.0625, %v3855_v38  ;;  %v3894_v56 = vmul.f32 0.0625, %v3852_v30 }
 0x67e   :  { %v3927_v13 = vsub.f32 %v3895_v26, %v3911_v45  ;;  %v3926_v28 = vsub.f32 %v3894_v56, %v3910_v3 }
 0x67f   :  { %v3781_v22 = vpop.xlane.xlu1 %3780  ;;  %v3778_v41 = vpop.xlane.xlu0 %3777 }
 0x680   :  { %v3943_v60 = vmax.f32 %v3927_v13, 0.0  ;;  %v3942_v63 = vmax.f32 %v3926_v28, 0.0  ;;  %v8435_v5 = vmul.f32 0.0625, %v3781_v22  ;;  %v8437_v9 = vmul.f32 0.0625, %v3778_v41 }
 0x682   :  { %v3959_v19 = vadd.f32 1e-05, %v3943_v60  ;;  %v3958_v46 = vadd.f32 1e-05, %v3942_v63  ;;  %v3913_v29 = vmul.f32 %v8435_v5, %v8435_v5  ;;  %v3912_v51 = vmul.f32 %v8437_v9, %v8437_v9 }
 0x683   :  { %v3861_v17 = vpop.xlane.xlu1 %3860  ;;  %v3858_v23 = vpop.xlane.xlu0 %3857 }
 0x684   :  { %v5062_v18 = vpop.eup %5061  ;;  %5065 = vrsqrt.f32 %v3959_v19  ;;  %v3897_v8 = vmul.f32 0.0625, %v3861_v17  ;;  %v3896_v14 = vmul.f32 0.0625, %v3858_v23 }
 0x685   :  { %5067 = vrsqrt.f32 %v3958_v46  ;;  %v8444_v2 = vmul.f32 %v5062_v18, %v8129_v43 }
 0x686   :  { %v5064_v58 = vpop.eup %5063  ;;  %v3929_v32 = vsub.f32 %v3897_v8, %v3913_v29  ;;  %v3928_v61 = vsub.f32 %v3896_v14, %v3912_v51 }
 0x687   :  { %v3787_v34 = vpop.xlane.xlu1 %3786  ;;  %v3784_v0 = vpop.xlane.xlu0 %3783  ;;  %v4005_v40 = vmul.f32 %v8444_v2, %v3813_v36  ;;  %v8448_v33 = vmul.f32 %v5064_v58, %v8124_v52 }
 0x688   :  { %v3945_v16 = vmax.f32 %v3929_v32, 0.0  ;;  %v3944_v45 = vmax.f32 %v3928_v61, 0.0  ;;  %v8450_v38 = vmul.f32 0.0625, %v3787_v34  ;;  %v8452_v30 = vmul.f32 0.0625, %v3784_v0 }
 0x689   :  { %4038 = vrot.lane.b32.xlu1 %v4005_v40, %s5211_s24  ;;  %v4004_v43 = vmul.f32 %v8448_v33, %v3812_v4 }
 0x68a   :  { %v3961_v3 = vadd.f32 1e-05, %v3945_v16  ;;  %v3960_v26 = vadd.f32 1e-05, %v3944_v45  ;;  %v3915_v56 = vmul.f32 %v8450_v38, %v8450_v38  ;;  %v3914_v36 = vmul.f32 %v8452_v30, %v8452_v30 }
 0x68b   :  { %v3867_v13 = vpop.xlane.xlu1 %3866  ;;  %4036 = vrot.lane.b32.xlu0 %v4004_v43, %s5211_s24  ;;  %v3864_v52 = vpop.xlane.xlu0 %3863 }
 0x68c   :  { %5069 = vrsqrt.f32 %v3961_v3  ;;  %v3899_v28 = vmul.f32 0.0625, %v3867_v13  ;;  %v3898_v22 = vmul.f32 0.0625, %v3864_v52 }
 0x68d   :  { %5071 = vrsqrt.f32 %v3960_v26 }
 0x68e   :  { %v5066_v41 = vpop.eup %5065  ;;  %v3931_v60 = vsub.f32 %v3899_v28, %v3915_v56  ;;  %v3930_v63 = vsub.f32 %v3898_v22, %v3914_v36 }
 0x68f   :  { %v5068_v4 = vpop.eup %5067  ;;  %v3793_v19 = vpop.xlane.xlu1 %3792  ;;  %v8462_v29 = vmul.f32 %v5066_v41, %v8139_v31 }
 0x690   :  { %v3790_v46 = vpop.xlane.xlu0 %3789  ;;  %v3947_v17 = vmax.f32 %v3931_v60, 0.0  ;;  %v3946_v23 = vmax.f32 %v3930_v63, 0.0  ;;  %v8464_v18 = vmul.f32 0.0625, %v3793_v19  ;;  %v8471_v14 = vmul.f32 %v5068_v4, %v8144_v39 }
 0x691   :  { %v8466_v51 = vmul.f32 0.0625, %v3790_v46  ;;  %v4007_v8 = vmul.f32 %v8462_v29, %v8427_v6 }
 0x692   :  { %v3963_v58 = vadd.f32 1e-05, %v3947_v17  ;;  %v3962_v32 = vadd.f32 1e-05, %v3946_v23  ;;  %v3917_v61 = vmul.f32 %v8464_v18, %v8464_v18  ;;  %v4006_v31 = vmul.f32 %v8471_v14, %v8429_v53 }
 0x693   :  { %v3873_v34 = vpop.xlane.xlu1 %3872  ;;  %4042 = vrot.lane.b32.xlu0 %v4007_v8, %s5211_s24  ;;  %v3916_v40 = vmul.f32 %v8466_v51, %v8466_v51 }
 0x694   :  { %v3870_v0 = vpop.xlane.xlu0 %3869  ;;  %5073 = vrsqrt.f32 %v3963_v58  ;;  %v3901_v6 = vmul.f32 0.0625, %v3873_v34  ;;  %4040 = vrot.lane.b32.xlu1 %v4006_v31, %s5211_s24 }
 0x695   :  { %v3900_v16 = vmul.f32 0.0625, %v3870_v0  ;;  %5075 = vrsqrt.f32 %v3962_v32 }
 0x696   :  { %v5070_v39 = vpop.eup %5069  ;;  %v3933_v45 = vsub.f32 %v3901_v6, %v3917_v61 }
 0x697   :  { %v3932_v43 = vsub.f32 %v3900_v16, %v3916_v40  ;;  %v5072_v3 = vpop.eup %5071  ;;  %v3799_v26 = vpop.xlane.xlu1 %3798  ;;  %v8482_v13 = vmul.f32 %v5070_v39, %v8154_v24 }
 0x698   :  { %v3796_v56 = vpop.xlane.xlu0 %3795  ;;  %v3949_v53 = vmax.f32 %v3933_v45, 0.0  ;;  %v8484_v36 = vmul.f32 0.0625, %v3799_v26  ;;  %v8491_v41 = vmul.f32 %v5072_v3, %v8159_v15 }
 0x699   :  { %v3948_v52 = vmax.f32 %v3932_v43, 0.0  ;;  %v8486_v28 = vmul.f32 0.0625, %v3796_v56  ;;  %v4009_v22 = vmul.f32 %v8482_v13, %v8435_v5 }
 0x69a   :  { %v3965_v60 = vadd.f32 1e-05, %v3949_v53  ;;  %v3919_v4 = vmul.f32 %v8484_v36, %v8484_v36  ;;  %v4008_v24 = vmul.f32 %v8491_v41, %v8437_v9 }
 0x69b   :  { %v3964_v63 = vadd.f32 1e-05, %v3948_v52  ;;  %v3879_v19 = vpop.xlane.xlu1 %3878  ;;  %4046 = vrot.lane.b32.xlu0 %v4009_v22, %s5211_s24  ;;  %v3918_v17 = vmul.f32 %v8486_v28, %v8486_v28 }
 0x69c   :  { %v3876_v46 = vpop.xlane.xlu0 %3875  ;;  %5077 = vrsqrt.f32 %v3965_v60  ;;  %v3903_v5 = vmul.f32 0.0625, %v3879_v19  ;;  %4044 = vrot.lane.b32.xlu1 %v4008_v24, %s5211_s24 }
 0x69d   :  { %v3902_v23 = vmul.f32 0.0625, %v3876_v46  ;;  %5079 = vrsqrt.f32 %v3964_v63 }
 0x69e   :  { %v5074_v15 = vpop.eup %5073  ;;  %v3935_v8 = vsub.f32 %v3903_v5, %v3919_v4 }
 0x69f   :  { %v3934_v58 = vsub.f32 %v3902_v23, %v3918_v17  ;;  %v5076_v32 = vpop.eup %5075  ;;  %v3805_v61 = vpop.xlane.xlu1 %3804  ;;  %v8502_v31 = vmul.f32 %v5074_v15, %v8166_v47  ;;  %v8529_v15 = vld [vmem:[%s8704_s4 + $0x40] sm:$0xff] }
 0x6a0   :  { %v3802_v34 = vpop.xlane.xlu0 %3801  ;;  %v3951_v9 = vmax.f32 %v3935_v8, 0.0  ;;  %v8504_v40 = vmul.f32 0.0625, %v3805_v61  ;;  %v8511_v39 = vmul.f32 %v5076_v32, %v8171_v20 }
 0x6a1   :  { %v3950_v0 = vmax.f32 %v3934_v58, 0.0  ;;  %v8506_v6 = vmul.f32 0.0625, %v3802_v34  ;;  %v4011_v16 = vmul.f32 %v8502_v31, %v8450_v38 }
 0x6a2   :  { %v3967_v45 = vadd.f32 1e-05, %v3951_v9  ;;  %v3921_v3 = vmul.f32 %v8504_v40, %v8504_v40  ;;  %v4010_v47 = vmul.f32 %v8511_v39, %v8452_v30 }
 0x6a3   :  { %v3966_v43 = vadd.f32 1e-05, %v3950_v0  ;;  %v3885_v26 = vpop.xlane.xlu1 %3884  ;;  %4050 = vrot.lane.b32.xlu0 %v4011_v16, %s5211_s24  ;;  %v3920_v53 = vmul.f32 %v8506_v6, %v8506_v6 }
 0x6a4   :  { %v3882_v56 = vpop.xlane.xlu0 %3881  ;;  %5081 = vrsqrt.f32 %v3967_v45  ;;  %v3905_v38 = vmul.f32 0.0625, %v3885_v26  ;;  %4048 = vrot.lane.b32.xlu1 %v4010_v47, %s5211_s24  ;;  %v8538_v47 = vld [vmem:[%s8704_s4 + $0x58] sm:$0xff] }
 0x6a5   :  { %v3904_v52 = vmul.f32 0.0625, %v3882_v56  ;;  %5083 = vrsqrt.f32 %v3966_v43 }
 0x6a6   :  { %v5078_v20 = vpop.eup %5077  ;;  %v3937_v22 = vsub.f32 %v3905_v38, %v3921_v3  ;;  %v8544_v38 = vld [vmem:[%s8704_s4 + $0x50] sm:$0xff] }
 0x6a7   :  { %v3936_v60 = vsub.f32 %v3904_v52, %v3920_v53  ;;  %v5080_v63 = vpop.eup %5079  ;;  %v3811_v4 = vpop.xlane.xlu1 %3810  ;;  %v8522_v24 = vmul.f32 %v5078_v20, %v8181_v48 }
 0x6a8   :  { %v3808_v19 = vpop.xlane.xlu0 %3807  ;;  %v3953_v30 = vmax.f32 %v3937_v22, 0.0  ;;  %v3827_v17 = vmul.f32 0.0625, %v3811_v4  ;;  %v3996_v8 = vmul.f32 %v8529_v15, %v5080_v63 }
 0x6a9   :  { %v3952_v46 = vmax.f32 %v3936_v60, 0.0  ;;  %v3826_v5 = vmul.f32 0.0625, %v3808_v19  ;;  %v4013_v23 = vmul.f32 %v8522_v24, %v8464_v18 }
 0x6aa   :  { %v3969_v58 = vadd.f32 1e-05, %v3953_v30  ;;  %v3923_v61 = vmul.f32 %v3827_v17, %v3827_v17  ;;  %v4012_v48 = vmul.f32 %v3996_v8, %v8466_v51  ;;  %v8554_v30 = vld [vmem:[%s8704_s4 + $0x68] sm:$0xff] }
 0x6ab   :  { %v3968_v32 = vadd.f32 1e-05, %v3952_v46  ;;  %v3891_v34 = vpop.xlane.xlu1 %3890  ;;  %4054 = vrot.lane.b32.xlu0 %v4013_v23, %s5211_s24  ;;  %v3922_v0 = vmul.f32 %v3826_v5, %v3826_v5 }
 0x6ac   :  { %v3888_v9 = vpop.xlane.xlu0 %3887  ;;  %5085 = vrsqrt.f32 %v3969_v58  ;;  %v3907_v16 = vmul.f32 0.0625, %v3891_v34  ;;  %4052 = vrot.lane.b32.xlu1 %v4012_v48, %s5211_s24  ;;  %v8570_v34 = vld [vmem:[%s8704_s4 + $0x78] sm:$0xff] }
 0x6ad   :  { %v3906_v18 = vmul.f32 0.0625, %v3888_v9  ;;  %5087 = vrsqrt.f32 %v3968_v32 }
 0x6ae   :  { %v5082_v45 = vpop.eup %5081  ;;  %v3939_v43 = vsub.f32 %v3907_v16, %v3923_v61 }
 0x6af   :  { %v3938_v3 = vsub.f32 %v3906_v18, %v3922_v0  ;;  %v5084_v26 = vpop.eup %5083  ;;  %v3999_v56 = vmul.f32 %v8538_v47, %v5082_v45  ;;  %v5180_v45 = vld [vmem:[%s8704_s4 + $0x20] sm:$0xff] }
 0x6b0   :  { %v3955_v51 = vmax.f32 %v3939_v43, 0.0  ;;  %v3998_v52 = vmul.f32 %v8544_v38, %v5084_v26  ;;  %v5181_v26 = vld [vmem:[%s8704_s4 + $0x28] sm:$0xff] }
 0x6b1   :  { %v3954_v53 = vmax.f32 %v3938_v3, 0.0  ;;  %v4015_v20 = vmul.f32 %v3999_v56, %v8484_v36  ;;  %v8560_v36 = vld [vmem:[%s8704_s4 + $0x60] sm:$0xff] }
 0x6b2   :  { %v3971_v22 = vadd.f32 1e-05, %v3955_v51  ;;  %v4014_v63 = vmul.f32 %v3998_v52, %v8486_v28 }
 0x6b3   :  { %v3970_v60 = vadd.f32 1e-05, %v3954_v53  ;;  %4058 = vrot.lane.b32.xlu0 %v4015_v20, %s5211_s24  ;;  %v5182_v53 = vld [vmem:[%s8704_s4 + $0x38] sm:$0xff] }
 0x6b4   :  { %5089 = vrsqrt.f32 %v3971_v22  ;;  %4056 = vrot.lane.b32.xlu1 %v4014_v63, %s5211_s24  ;;  %v5183_v22 = vld [vmem:[%s8704_s4 + $0x30] sm:$0xff] }
 0x6b5   :  { %5091 = vrsqrt.f32 %v3970_v60 }
 0x6b6   :  { %v5086_v4 = vpop.eup %5085 }
 0x6b7   :  { %v5088_v19 = vpop.eup %5087  ;;  %v4001_v46 = vmul.f32 %v8554_v30, %v5086_v4 }
 0x6b8   :  { %v4000_v28 = vmul.f32 %v8560_v36, %v5088_v19 }
 0x6b9   :  { %v4017_v23 = vmul.f32 %v4001_v46, %v8504_v40  ;;  %v8578_v40 = vld [vmem:[%s8704_s4 + $0x70] sm:$0xff] }
 0x6ba   :  { %v4016_v58 = vmul.f32 %v4000_v28, %v8506_v6 }
 0x6bb   :  { %4062 = vrot.lane.b32.xlu0 %v4017_v23, %s5211_s24 }
 0x6bc   :  { %4060 = vrot.lane.b32.xlu1 %v4016_v58, %s5211_s24 }
 0x6be   :  { %v5090_v32 = vpop.eup %5089 }
 0x6bf   :  { %v5092_v61 = vpop.eup %5091  ;;  %v8573_v48 = vmul.f32 %v8570_v34, %v5090_v32 }
 0x6c0   :  { %v8581_v6 = vmul.f32 %v8578_v40, %v5092_v61 }
 0x6c1   :  { %v4019_v9 = vmul.f32 %v8573_v48, %v3827_v17 }
 0x6c2   :  { %v4018_v0 = vmul.f32 %v8581_v6, %v3826_v5  ;;  %v5213_v5 = vmov 0.0  }
 0x6c3   :  { %4066 = vrot.lane.b32.xlu0 %v4019_v9, %s5211_s24  ;;  %4771 = vmatprep.subr.bf16.mxu0 %v5213_v5 }
 0x6c4   :  { %4064 = vrot.lane.b32.xlu1 %v4018_v0, %s5211_s24  ;;  %4787 = vmatprep.mubr.msk.bf16.mxu0 %vm5214_vm2, %v5213_v5 }
 0x6c7   :  { %4107 = vperm.xlu0 %4838, %v8444_v2  }
 0x6c8   :  { %4102 = vperm.xlu1 %4837, %v8448_v33   ;;  %v5176_v33 = vld [vmem:[%s8704_s4] sm:$0xff] }
 0x6cb   :  { %4112 = vperm.xlu0 %4838, %v8471_v14  }
 0x6cc   :  { %4117 = vperm.xlu1 %4837, %v8462_v29  }
 0x6cf   :  { %4127 = vperm.xlu0 %4838, %v8482_v13   ;;  %v5177_v13 = vld [vmem:[%s8704_s4 + $0x8] sm:$0xff] }
 0x6d0   :  { %4122 = vperm.xlu1 %4837, %v8491_v41  }
 0x6d3   :  { %4132 = vperm.xlu0 %4838, %v8511_v39   ;;  %v5178_v39 = vld [vmem:[%s8704_s4 + $0x18] sm:$0xff] }
 0x6d4   :  { %4137 = vperm.xlu1 %4837, %v8502_v31  }
 0x6d7   :  { %4147 = vperm.xlu0 %4838, %v8522_v24  }
 0x6d8   :  { %4142 = vperm.xlu1 %4837, %v3996_v8   ;;  %v5179_v8 = vld [vmem:[%s8704_s4 + $0x10] sm:$0xff] }
 0x6db   :  { %4152 = vperm.xlu0 %4838, %v3998_v52  }
 0x6dc   :  { %4157 = vperm.xlu1 %4837, %v3999_v56  }
 0x6df   :  { %4167 = vperm.xlu0 %4838, %v4001_v46   ;;  %v5184_v46 = vld [vmem:[%s8704_s4 + $0x48] sm:$0xff] }
 0x6e0   :  { %4162 = vperm.xlu1 %4837, %v4000_v28  }
 0x6e3   :  { %4840 = vset.pattern.permute.xlu0 %v9066_v57 }
 0x6e4   :  { %4839 = vset.pattern.permute.xlu1 %v9066_v57 }
 0x6fb   :  { %v4039_v14 = vpop.permute.xlu1 %4038 }
 0x6fc   :  { %v4085_v41 = vsub.f32 %v5177_v13, %v4039_v14 }
 0x6fd   :  { %v4037_v2 = vpop.permute.xlu0 %4036 }
 0x6fe   :  { %v4084_v29 = vsub.f32 %v5176_v33, %v4037_v2 }
 0x700   :  { %4198 = vperm.xlu1 %4839, %v4084_v29  }
 0x704   :  { %4203 = vperm.xlu1 %4839, %v4085_v41  }
 0x705   :  { %v4043_v31 = vpop.permute.xlu0 %4042 }
 0x706   :  { %v4087_v24 = vsub.f32 %v5178_v39, %v4043_v31  ;;  %v4041_v17 = vpop.permute.xlu1 %4040 }
 0x707   :  { %v4086_v16 = vsub.f32 %v5179_v8, %v4041_v17 }
 0x708   :  { %4213 = vperm.xlu1 %4839, %v4087_v24  }
 0x709   :  { %4208 = vperm.xlu0 %4840, %v4086_v16  }
 0x70d   :  { %v4047_v3 = vpop.permute.xlu0 %4046 }
 0x70e   :  { %v4045_v18 = vpop.permute.xlu1 %4044  ;;  %v4089_v56 = vsub.f32 %v5181_v26, %v4047_v3 }
 0x70f   :  { %v4088_v43 = vsub.f32 %v5180_v45, %v4045_v18 }
 0x711   :  { %4218 = vperm.xlu1 %4839, %v4088_v43  }
 0x715   :  { %v4051_v51 = vpop.permute.xlu0 %4050  ;;  %4223 = vperm.xlu1 %4839, %v4089_v56  }
 0x716   :  { %v4091_v52 = vsub.f32 %v5182_v53, %v4051_v51  ;;  %v4049_v20 = vpop.permute.xlu1 %4048 }
 0x717   :  { %v4090_v60 = vsub.f32 %v5183_v22, %v4049_v20 }
 0x719   :  { %4228 = vperm.xlu0 %4840, %v4090_v60   ;;  %4233 = vperm.xlu1 %4839, %v4091_v52  }
 0x71d   :  { %v4055_v19 = vpop.permute.xlu0 %4054 }
 0x71e   :  { %v4053_v63 = vpop.permute.xlu1 %4052  ;;  %v4093_v28 = vsub.f32 %v5184_v46, %v4055_v19 }
 0x71f   :  { %v4092_v4 = vsub.f32 %v8529_v15, %v4053_v63 }
 0x721   :  { %4238 = vperm.xlu1 %4839, %v4092_v4  }
 0x725   :  { %4243 = vperm.xlu1 %4839, %v4093_v28   ;;  %v4059_v32 = vpop.permute.xlu0 %4058 }
 0x726   :  { %v4057_v23 = vpop.permute.xlu1 %4056  ;;  %v4095_v15 = vsub.f32 %v8538_v47, %v4059_v32 }
 0x727   :  { %v4094_v58 = vsub.f32 %v8544_v38, %v4057_v23 }
 0x729   :  { %4248 = vperm.xlu0 %4840, %v4094_v58   ;;  %4842 = vset.pattern.permute.xlu1 %v9098_v12 }
 0x72a   :  { %4177 = vperm.xlu1 %4842, %v8573_v48  }
 0x72d   :  { %4841 = vset.pattern.permute.xlu0 %v9098_v12  ;;  %v4063_v38 = vpop.permute.xlu0 %4062 }
 0x72e   :  { %4172 = vperm.xlu0 %4841, %v8581_v6   ;;  %v4061_v61 = vpop.permute.xlu1 %4060  ;;  %4843 = vset.pattern.permute.xlu1 %v9066_v57  ;;  %v4097_v0 = vsub.f32 %v8554_v30, %v4063_v38 }
 0x72f   :  { %4253 = vperm.xlu1 %4843, %v4095_v15   ;;  %v4096_v9 = vsub.f32 %v8560_v36, %v4061_v61 }
 0x732   :  { %4844 = vset.pattern.permute.xlu0 %v9066_v57  ;;  %v8644_v57 = vld [vmem:[%s8706_s6] sm:$0xf] }
 0x733   :  { %4258 = vperm.xlu1 %4843, %v4096_v9  }
 0x735   :  { %v4067_v33 = vpop.permute.xlu0 %4066 }
 0x736   :  { %v4065_v2 = vpop.permute.xlu1 %4064  ;;  %v4099_v47 = vsub.f32 %v8570_v34, %v4067_v33 }
 0x737   :  { %v4098_v48 = vsub.f32 %v8578_v40, %v4065_v2  ;;  %4263 = vperm.xlu1 %4843, %v4097_v0  }
 0x739   :  { %4268 = vperm.xlu0 %4844, %v4098_v48  }
 0x73b   :  { %4273 = vperm.xlu1 %4843, %v4099_v47  }
 0x73f   :  { %4845 = vset.pattern.permute.xlu1 %v9283_v25 }
 0x740   :  { %4304 = vperm.xlu1 %4845, %v8644_v57  }
 0x744   :  { %4846 = vset.pattern.permute.xlu1 %v9098_v12 }
 0x746   :  { %v4108_v40 = vpop.permute.xlu0 %4107 }
 0x747   :  { %v4103_v30 = vpop.permute.xlu1 %4102  ;;  %v4181_v18 = vmul.f32 %v4108_v40, %v8303_v11 }
 0x748   :  { %v4180_v16 = vmul.f32 %v4103_v30, %v8301_v49 }
 0x74a   :  { %v4113_v34 = vpop.permute.xlu0 %4112 }
 0x74b   :  { %v4118_v36 = vpop.permute.xlu1 %4117  ;;  %v4182_v53 = vmul.f32 %v4113_v34, %v8316_v21 }
 0x74c   :  { %v4183_v26 = vmul.f32 %v4118_v36, %v8319_v50 }
 0x74e   :  { %v4128_v14 = vpop.permute.xlu0 %4127 }
 0x74f   :  { %v4123_v6 = vpop.permute.xlu1 %4122  ;;  %v4185_v63 = vmul.f32 %v4128_v14, %v8335_v10 }
 0x750   :  { %v4184_v11 = vmul.f32 %v4123_v6, %v8331_v35 }
 0x752   :  { %v4133_v41 = vpop.permute.xlu0 %4132 }
 0x753   :  { %v4138_v29 = vpop.permute.xlu1 %4137  ;;  %v4186_v46 = vmul.f32 %v4133_v41, %v8347_v1 }
 0x754   :  { %v4187_v21 = vmul.f32 %v4138_v29, %v8351_v27 }
 0x756   :  { %v4148_v39 = vpop.permute.xlu0 %4147 }
 0x757   :  { %v4143_v13 = vpop.permute.xlu1 %4142  ;;  %v4189_v9 = vmul.f32 %v4148_v39, %v8367_v44 }
 0x758   :  { %v4188_v10 = vmul.f32 %v4143_v13, %v8363_v59 }
 0x75a   :  { %v4153_v17 = vpop.permute.xlu0 %4152 }
 0x75b   :  { %v4158_v31 = vpop.permute.xlu1 %4157  ;;  %v4190_v47 = vmul.f32 %v4153_v17, %v8379_v37 }
 0x75c   :  { %v4191_v33 = vmul.f32 %v4158_v31, %v8383_v7 }
 0x75e   :  { %v4168_v3 = vpop.permute.xlu0 %4167 }
 0x75f   :  { %v4163_v24 = vpop.permute.xlu1 %4162  ;;  %v4193_v29 = vmul.f32 %v4168_v3, %v8399_v55 }
 0x760   :  { %v4192_v34 = vmul.f32 %v4163_v24, %v8395_v54  ;;  %v4292_v54 = vld [vmem:[%s8705_s5] sm:$0x3] }
 0x77f   :  { %v4199_v8 = vpop.permute.xlu1 %4198 }
 0x780   :  { %v4276_v12 = vadd.f32 %v4199_v8, %v4180_v16 }
 0x783   :  { %v4204_v45 = vpop.permute.xlu1 %4203 }
 0x784   :  { %v4277_v43 = vadd.f32 %v4204_v45, %v4181_v18 }
 0x786   :  { %v4293_v56 = vpack.c.bf16 %v4277_v43, %v4276_v12 }
 0x787   :  { %v4214_v51 = vpop.permute.xlu1 %4213 }
 0x788   :  { %v4279_v52 = vadd.f32 %v4214_v51, %v4183_v26  ;;  %4772 = vmatpush3.bf16.msra.mxu0 %v4293_v56  ;;  %v4209_v20 = vpop.permute.xlu0 %4208 }
 0x789   :  { %4773 = vmatprep.subr.bf16.mxu0 %v5213_v5  ;;  %v4278_v22 = vadd.f32 %v4209_v20, %v4182_v53 }
 0x78b   :  { %v4294_v60 = vpack.c.bf16 %v4279_v52, %v4278_v22 }
 0x78d   :  { %4774 = vmatpush3.bf16.msra.mxu0 %v4294_v60 }
 0x78e   :  { %4775 = vmatprep.subr.bf16.mxu0 %v5213_v5 }
 0x790   :  { %v4219_v49 = vpop.permute.xlu1 %4218 }
 0x791   :  { %v4280_v4 = vadd.f32 %v4219_v49, %v4184_v11 }
 0x794   :  { %v4224_v50 = vpop.permute.xlu1 %4223 }
 0x795   :  { %v4281_v19 = vadd.f32 %v4224_v50, %v4185_v63 }
 0x797   :  { %v4295_v28 = vpack.c.bf16 %v4281_v19, %v4280_v4  ;;  %v4382_v4 = vld [vmem:[%s8707_s7] sm:$0xf] }
 0x798   :  { %v4234_v23 = vpop.permute.xlu1 %4233  ;;  %v4229_v58 = vpop.permute.xlu0 %4228 }
 0x799   :  { %v4283_v32 = vadd.f32 %v4234_v23, %v4187_v21  ;;  %v4282_v15 = vadd.f32 %v4229_v58, %v4186_v46  ;;  %4776 = vmatpush3.bf16.msra.mxu0 %v4295_v28  ;;  %v4383_v46 = vld [vmem:[%s8707_s7 + $0x4] sm:$0x1]  ;;  %s5215_s7 = smov [#allocation2]  }
 0x79a   :  { %4777 = vmatprep.subr.bf16.mxu0 %v5213_v5 }
 0x79b   :  { %v4296_v61 = vpack.c.bf16 %v4283_v32, %v4282_v15 }
 0x79d   :  { %4778 = vmatpush3.bf16.msra.mxu0 %v4296_v61 }
 0x79e   :  { %4779 = vmatprep.subr.bf16.mxu0 %v5213_v5 }
 0x7a0   :  { %v4239_v35 = vpop.permute.xlu1 %4238 }
 0x7a1   :  { %v4284_v38 = vadd.f32 %v4239_v35, %v4188_v10 }
 0x7a4   :  { %v4244_v27 = vpop.permute.xlu1 %4243 }
 0x7a5   :  { %v4285_v1 = vadd.f32 %v4244_v27, %v4189_v9 }
 0x7a7   :  { %v4297_v0 = vpack.c.bf16 %v4285_v1, %v4284_v38 }
 0x7a8   :  { %v4249_v48 = vpop.permute.xlu0 %4248 }
 0x7a9   :  { %v4178_v2 = vpop.permute.xlu1 %4177  ;;  %4780 = vmatpush3.bf16.msra.mxu0 %v4297_v0  ;;  %v4286_v36 = vadd.f32 %v4249_v48, %v4190_v47 }
 0x7aa   :  { %4781 = vmatprep.subr.bf16.mxu0 %v5213_v5  ;;  %v4195_v7 = vmul.f32 %v4178_v2, %v8415_v42 }
 0x7ad   :  { %v4173_v44 = vpop.permute.xlu0 %4172 }
 0x7ae   :  { %v4254_v30 = vpop.permute.xlu1 %4253  ;;  %v4194_v37 = vmul.f32 %v4173_v44, %v8411_v62 }
 0x7af   :  { %v4287_v40 = vadd.f32 %v4254_v30, %v4191_v33 }
 0x7b1   :  { %v4298_v6 = vpack.c.bf16 %v4287_v40, %v4286_v36 }
 0x7b2   :  { %v4259_v59 = vpop.permute.xlu1 %4258 }
 0x7b3   :  { %4782 = vmatpush3.bf16.msra.mxu0 %v4298_v6  ;;  %v4288_v13 = vadd.f32 %v4259_v59, %v4192_v34 }
 0x7b4   :  { %4783 = vmatprep.subr.bf16.mxu0 %v5213_v5 }
 0x7b6   :  { %v4264_v14 = vpop.permute.xlu1 %4263 }
 0x7b7   :  { %v4289_v41 = vadd.f32 %v4264_v14, %v4193_v29 }
 0x7b8   :  { %v4269_v39 = vpop.permute.xlu0 %4268 }
 0x7b9   :  { %v4299_v31 = vpack.c.bf16 %v4289_v41, %v4288_v13  ;;  %v4290_v8 = vadd.f32 %v4269_v39, %v4194_v37 }
 0x7ba   :  { %v4274_v17 = vpop.permute.xlu1 %4273 }
 0x7bb   :  { %v4291_v16 = vadd.f32 %v4274_v17, %v4195_v7  ;;  %4784 = vmatpush3.bf16.msra.mxu0 %v4299_v31 }
 0x7bc   :  { %4785 = vmatprep.subr.bf16.mxu0 %v5213_v5 }
 0x7bd   :  { %v4300_v18 = vpack.c.bf16 %v4291_v16, %v4290_v8 }
 0x7bf   :  { %4786 = vmatpush3.bf16.msra.mxu0 %v4300_v18  ;;  %v4305_v55 = vpop.permute.xlu1 %4304 }
 0x7c2   :  { %4788 = vmatmul.mubr.bf16.vlgmr.msra.gmra.mrb[64].mxu0 %v4292_v54 }
 0x895   :  { %v4341_v24 = vpop.f32.mrb[64].mxu0 }
 0x896   :  { %v4342_v45 = vadd.f32 %v4341_v24, %v4305_v55  ;;  %v4789_v42 = vpop.f32.mrb[65].mxu0 }
 0x897   :  { %v4344_v62 = vpop.f32.mrb[66].mxu0 }
 0x898   :  { %v4347_v12 = vmax.f32 %v4342_v45, 0.0  ;;  %v4790_v43 = vpop.f32.mrb[67].mxu0 }
 0x89a   :  { %v4349_v3 = vsel %vm4348_vm3, %v4347_v12, 0.0  ;;  %v4353_v26 = vmul.f32 %v4347_v12, %v4347_v12 }
 0x89b   :  { %4350 = vadd.xlane.f32.xlu0 %v4349_v3 }
 0x89c   :  { %v4354_v5 = vsel %vm4348_vm3, %v4353_v26, 0.0 }
 0x89d   :  { %4355 = vadd.xlane.f32.xlu1 %v4354_v5 }
 0x928   :  { %v4351_v56 = vpop.xlane.xlu0 %4350 }
 0x929   :  { %v4352_v51 = vmul.f32 0.0625, %v4351_v56 }
 0x92a   :  { %v4356_v53 = vpop.xlane.xlu1 %4355 }
 0x92b   :  { %v4358_v52 = vmul.f32 %v4352_v51, %v4352_v51  ;;  %v4357_v20 = vmul.f32 0.0625, %v4356_v53 }
 0x92d   :  { %v4359_v22 = vsub.f32 %v4357_v20, %v4358_v52 }
 0x92f   :  { %v4360_v60 = vmax.f32 %v4359_v22, 0.0 }
 0x931   :  { %v4361_v49 = vadd.f32 1e-05, %v4360_v60 }
 0x933   :  { %5093 = vrsqrt.f32 %v4361_v49 }
 0x93d   :  { %v5094_v11 = vpop.eup %5093 }
 0x93e   :  { %v4363_v63 = vmul.f32 %v5094_v11, %v8644_v57 }
 0x940   :  { %4372 = vperm.xlu1 %4846, %v4363_v63   ;;  %v4364_v50 = vmul.f32 %v4363_v63, %v4352_v51 }
 0x942   :  { %4366 = vrot.lane.b32.xlu0 %v4364_v50, %s5211_s24  ;;  %s4417_s24 = sshll.u32 %s5215_s7, 4  ;;  %s4418_s24 = int_to_ptr.vmem [resolvable:$true] %s4417_s24 }
 0x943   :  { %s5185_s30 = scalar_lea.vmem %s4418_s24, 16  ;;  %s5189_s9 = scalar_lea.vmem %s4418_s24, 32 }
 0x944   :  { %4847 = vset.pattern.permute.xlu1 %v9283_v25  ;;  %p5186_p0 = scmp.ne.s32.totalorder %s4418_s24, %s5185_s30  ;;  %p5190_p1 = scmp.lt.s32.totalorder %s4418_s24, %s4418_s24 }
 0x945   :  { %4386 = vperm.xlu1 %4847, %v4382_v4   ;;  %p5191_p2 = scmp.lt.s32.totalorder %s5189_s9, %s5185_s30 }
 0x947   :  { %p5192_p3 = por %p5191_p2, %p5190_p1 }
 0x949   :  { %p5193_p4 = pnand %p5192_p3, %p5186_p0 }
 0x9b4   :  { %v4367_v19 = vpop.permute.xlu0 %4366 }
 0x9b5   :  { %v4369_v21 = vsub.f32 %v8644_v57, %v4367_v19 }
 0x9b7   :  { %4378 = vperm.xlu0 %4844, %v4369_v21  }
 0x9bb   :  { %4848 = vset.pattern.permute.xlu0 %v9283_v25 }
 0x9bc   :  { %4399 = vperm.xlu0 %4848, %v4383_v46  }
 0x9bf   :  { %v4373_v28 = vpop.permute.xlu1 %4372 }
 0x9c0   :  { %v4375_v23 = vmul.f32 %v4373_v28, %v4347_v12 }
 0x9c4   :  { %v4387_v32 = vpop.permute.xlu1 %4386 }
 0xa36   :  { %v4379_v58 = vpop.permute.xlu0 %4378 }
 0xa37   :  { %v4381_v15 = vadd.f32 %v4379_v58, %v4375_v23 }
 0xa39   :  { %v4389_v61 = vmul.f32 %v4387_v32, %v4381_v15 }
 0xa3b   :  { %v4390_v35 = vsel %vm4348_vm3, %v4389_v61, 0.0  ;;  %v4400_v1 = vpop.permute.xlu0 %4399 }
 0xa3c   :  { %v4391_v10 = vrot.slane %v4390_v35, 4 }
 0xa3e   :  { %v4392_v9 = vadd.f32 %v4391_v10, %v4390_v35 }
 0xa40   :  { %v4393_v27 = vrot.slane %v4392_v9, 2 }
 0xa42   :  { %v4394_v57 = vadd.f32 %v4393_v27, %v4392_v9 }
 0xa44   :  { %v4395_v38 = vrot.slane %v4394_v57, 1 }
 0xa46   :  { %v4396_v0 = vadd.f32 %v4395_v38, %v4394_v57 }
 0xa48   :  { %v4402_v2 = vadd.f32 %v4400_v1, %v4396_v0 }
 0xa4a   :  { %v4525_v48 = vmul.f32 -1.442695, %v4402_v2 }
 0xa4c   :  { %5095 = vpow2.f32 %v4525_v48 }
 0xa56   :  { %v5096_v25 = vpop.eup %5095 }
 0xa57   :  { %v4406_v33 = vadd.f32 1.0, %v5096_v25 }
 0xa59   :  { %5097 = vrcp.f32 %v4406_v33 }
 0xa63   :  { %v5098_v47 = vpop.eup %5097 }
 0xa64   :  { %4410 = vst.msk [vmem:[#allocation2] sm:$0x1] %vm4409_vm4, %v5098_v47 }
 0xa65   :  { %5196 = shalt.err (!%p5193_p4)
}
 0xa66   :  { %s5197_s12 = scalar_lea.hbm %s8708_s8, 16 }
 0xa67   :  { %p5198_p5 = scmp.ne.s32.totalorder %s8708_s8, %s5197_s12  ;;  %p5201_p6 = scmp.lt.u32.totalorder %s5197_s12, %s8708_s8 }
 0xa69   :  { %p5203_p7 = pnand %p5201_p6, %p5198_p5 }
 0xa6b   :  { %5206 = shalt.err (!%p5203_p7)
}
 0xa6c   :  { %4420 = dma.vmem_to_hbm [thread:$0]  %s4418_s24, 16, %s8708_s8, [#allocation3]  }
 0xa6d   :  { %5207 = dma.done.wait [#allocation3], 16  }
 0xa6e   :  { %5208 = vsyncadd [#allocation3], 4294967280 }
 0xa6f   :  { %4424 = vsyncpa [#allocation3], 1 }

</bundles_post_ra>
